<compile_context>
chip_gen: v7x
topology: tpu7x:2x2x1
jax: 0.10.0
libtpu: 0.0.40
codegen_flags: <defaults>
</compile_context>

<pallas_src>
import jax
import jax.numpy as jnp
from jax import lax
from jax.experimental import pallas as pl
from jax.experimental.pallas import tpu as pltpu


# ------------------------------------------------------------------ in-kernel building blocks
def _three_nn_weights(pf, pc):
    """pf [Nf,3] fine points, pc [Nc,3] coarse points -> [Nf,Nc] inverse-distance 3-NN weights."""
    # MXU-based pairwise squared distances: ||a||^2 - 2 a.b + ||b||^2 (clamped at 0).
    cross = lax.dot_general(pf, pc, (((1,), (1,)), ((), ())),
                            preferred_element_type=jnp.float32)          # [Nf, Nc]
    sqf = jnp.sum(pf * pf, axis=1, keepdims=True)                        # [Nf, 1]
    sqc = lax.dot_general(jnp.ones((1, 3), jnp.float32), pc * pc,
                          (((1,), (1,)), ((), ())),
                          preferred_element_type=jnp.float32)            # [1, Nc]
    d = jnp.maximum(sqf - 2.0 * cross + sqc, 0.0)

    # TODO(synk): CUDA three_nn picks 3 distinct indices with cascaded '<' tie-breaking; here
    # exact float ties (measure-zero) would select every tied column.
    recips, onehots = [], []
    for _ in range(3):
        m = jnp.min(d, axis=1, keepdims=True)          # single cross-lane reduce per neighbour
        sel = d <= m
        onehots.append(sel.astype(jnp.float32))
        recips.append(1.0 / (jnp.sqrt(m) + 1e-8))
        d = jnp.where(sel, 1e30, d)
    inv_norm = 1.0 / (recips[0] + recips[1] + recips[2])
    w = (recips[0] * inv_norm) * onehots[0]
    w = w + (recips[1] * inv_norm) * onehots[1]
    w = w + (recips[2] * inv_norm) * onehots[2]
    return w


def _fp_block(pf, pc, fc, skip_pre, w1c, b1, w2, b2):
    """One upsampling FeaturePropogation stage, channels-first.
    fc [Cc,Nc] coarse features, skip_pre [H,Nf] conv1 pre-activation from the skip features."""
    wmat = _three_nn_weights(pf, pc)                                      # [Nf, Nc]
    interp = lax.dot_general(fc, wmat, (((1,), (1,)), ((), ())),
                             preferred_element_type=jnp.float32)          # [Cc, Nf]
    y = skip_pre + jnp.dot(w1c, interp, preferred_element_type=jnp.float32) + b1
    y = jnp.maximum(y, 0.0)
    y = jnp.dot(w2, y, preferred_element_type=jnp.float32) + b2
    return jnp.maximum(y, 0.0)


def _fused_decoder_kernel(cls_ref,
                          p1_ref, p2_ref, p3_ref, p4_ref,
                          f1_ref, f2_ref, f3_ref, f4_ref, tbl_ref,
                          a_w1s, a_w1c, a_b1, a_w2, a_b2,
                          b_w1s, b_w1c, b_b1, b_w2, b_b2,
                          c_w1s, c_w1c, c_b1, c_w2, c_b2,
                          out_ref):
    p1, p2, p3, p4 = p1_ref[0], p2_ref[0], p3_ref[0], p4_ref[0]
    f1, f2, f3, f4 = f1_ref[0], f2_ref[0], f3_ref[0], f4_ref[0]

    # decoder stage -1 (coarsest): fine p3/f3, coarse p4/f4
    skip = jnp.dot(a_w1s[...], f3, preferred_element_type=jnp.float32)
    ft3 = _fp_block(p3, p4, f4, skip, a_w1c[...], a_b1[...], a_w2[...], a_b2[...])

    # decoder stage -2: fine p2/f2, coarse p3/ft3
    skip = jnp.dot(b_w1s[...], f2, preferred_element_type=jnp.float32)
    ft2 = _fp_block(p2, p3, ft3, skip, b_w1c[...], b_b1[...], b_w2[...], b_b2[...])

    # decoder stage 0: fine p1, skip = [class embedding, f1], coarse p2/ft2
    lbl = cls_ref[pl.program_id(0)]
    num_cls = tbl_ref.shape[1]
    cls_mask = lax.broadcasted_iota(jnp.int32, (1, num_cls), 1) == lbl
    cls_col = jnp.sum(jnp.where(cls_mask, tbl_ref[...], 0.0), axis=1, keepdims=True)  # [h0, 1]
    skip = jnp.dot(c_w1s[...], f1, preferred_element_type=jnp.float32) + cls_col
    out_ref[0] = _fp_block(p1, p2, ft2, skip, c_w1c[...], c_b1[...], c_w2[...], c_b2[...])


# ------------------------------------------------------------------ wrapper (single pallas_call)
def decoder_forward(p, f, cls_label, kp):
    """p[i]: [B,Ni,3]; f[i]: [B,Ci,Ni] (PyTorch NCW); returns [B, Cout, N1] (PyTorch layout)."""
    B, n1, _ = p[1].shape
    n2, n3, n4 = p[2].shape[1], p[3].shape[1], p[4].shape[1]
    c1, c2, c3, c4 = f[1].shape[1], f[2].shape[1], f[3].shape[1], f[4].shape[1]
    cout = kp["c"]["w2"].shape[0]

    batched = lambda s: pl.BlockSpec((1,) + s, lambda b, cls: (b, 0, 0))
    rep2 = lambda s: pl.BlockSpec(s, lambda b, cls: (0, 0))

    stage_params, stage_specs = [], []
    for name in ("a", "b", "c"):
        for key_ in ("w1s", "w1c", "b1", "w2", "b2"):
            arr = kp[name][key_]
            stage_params.append(arr)
            stage_specs.append(rep2(arr.shape))

    grid_spec = pltpu.PrefetchScalarGridSpec(
        num_scalar_prefetch=1,
        grid=(B,),
        in_specs=[batched((n1, 3)), batched((n2, 3)), batched((n3, 3)), batched((n4, 3)),
                  batched((c1, n1)), batched((c2, n2)), batched((c3, n3)), batched((c4, n4)),
                  rep2(kp["cls_table"].shape)] + stage_specs,
        out_specs=pl.BlockSpec((1, cout, n1), lambda b, cls: (b, 0, 0)),
    )
    return pl.pallas_call(
        _fused_decoder_kernel,
        out_shape=jax.ShapeDtypeStruct((B, cout, n1), jnp.float32),
        grid_spec=grid_spec,
        compiler_params=pltpu.CompilerParams(
            dimension_semantics=("parallel",),     # 2 TCs on v7x; plain serial loop on v5e/v6e
            vmem_limit_bytes=16 * 1024 * 1024),
    )(cls_label.reshape(-1).astype(jnp.int32),
      p[1], p[2], p[3], p[4], f[1], f[2], f[3], f[4], kp["cls_table"], *stage_params)


# ------------------------------------------------------------------ parameters
def _conv_bn_params(key, cin, cout, with_bn=True):
    """1x1 Conv1d weights in channels-first orientation [Cout, Cin] + (inference) BN stats."""
    kw, kb, kg, kbe, km, kv = jax.random.split(key, 6)
    bound = 1.0 / (cin ** 0.5)
    w = jax.random.uniform(kw, (cout, cin), jnp.float32, -bound, bound)
    b = jax.random.uniform(kb, (cout, 1), jnp.float32, -bound, bound)
    if with_bn:
        gamma = jax.random.uniform(kg, (cout, 1), jnp.float32, 0.8, 1.2)
        beta = jax.random.uniform(kbe, (cout, 1), jnp.float32, -0.1, 0.1)
        rmean = 0.1 * jax.random.normal(km, (cout, 1), jnp.float32)
        rvar = jax.random.uniform(kv, (cout, 1), jnp.float32, 0.5, 1.5)
        scale = gamma / jnp.sqrt(rvar + 1e-5)
        shift = beta - rmean * scale
    else:
        scale = jnp.ones((cout, 1), jnp.float32)
        shift = jnp.zeros((cout, 1), jnp.float32)
    return w, b, scale, shift


def _fp_params(key, c_skip, c_coarse, fp):
    k1, k2 = jax.random.split(key)
    w1, b1, s1, t1 = _conv_bn_params(k1, c_skip + c_coarse, fp)
    w2, b2, s2, t2 = _conv_bn_params(k2, fp, fp)
    return dict(w1=w1, b1=b1, s1=s1, t1=t1, w2=w2, b2=b2, s2=s2, t2=t2)


def prepare_kernel_params(params, encoder_channel_list, cls_channels=64):
    """Fold BN into conv weights, split conv1 by input group, collapse convc to a class table."""
    def fold(prm):
        return (prm["w1"] * prm["s1"], prm["b1"] * prm["s1"] + prm["t1"],
                prm["w2"] * prm["s2"], prm["b2"] * prm["s2"] + prm["t2"])

    ecl = encoder_channel_list
    kp = {}
    for name, idx, c_skip in (("a", 2, ecl[2]), ("b", 1, ecl[1])):
        w1, b1, w2, b2 = fold(params["dec"][idx])
        kp[name] = dict(w1s=w1[:, :c_skip], w1c=w1[:, c_skip:], b1=b1, w2=w2, b2=b2)
    w1, b1, w2, b2 = fold(params["dec"][0])
    c_f1 = ecl[0]
    w1_cls = w1[:, :cls_channels]
    kp["c"] = dict(w1s=w1[:, cls_channels:cls_channels + c_f1],
                   w1c=w1[:, cls_channels + c_f1:], b1=b1, w2=w2, b2=b2)
    # relu(convc(one_hot)) is constant per class -> fold convc + its conv1 contribution into a
    # [fp0, num_classes] lookup table.
    cls_feat = jnp.maximum(params["convc_w"] + params["convc_b"], 0.0)          # [64, n_cls]
    kp["cls_table"] = jnp.dot(w1_cls, cls_feat, precision=jax.lax.Precision.HIGHEST)
    return kp


# ------------------------------------------------------------------ pure-JAX reference
def _ref_three_interp(p1, p2, fc):
    cross = jnp.einsum("bik,bjk->bij", p1, p2)
    d2 = jnp.sum(p1 * p1, -1)[:, :, None] - 2.0 * cross + jnp.sum(p2 * p2, -1)[:, None, :]
    d2 = jnp.maximum(d2, 0.0)
    neg_d, idx = jax.lax.top_k(-d2, 3)
    dist = jnp.sqrt(jnp.maximum(-neg_d, 0.0))
    w = 1.0 / (dist + 1e-8)
    w = w / jnp.sum(w, axis=-1, keepdims=True)
    gathered = jax.vmap(lambda fb, ib: fb[:, ib])(fc, idx)                      # [B, C, N1, 3]
    return jnp.sum(gathered * w[:, None, :, :], axis=-1)                        # [B, C, N1]


def _ref_fp(p1, p2, fs, fc, prm):
    interp = _ref_three_interp(p1, p2, fc)
    x = jnp.concatenate([fs, interp], axis=1)
    y = jnp.einsum("oc,bcn->bon", prm["w1"], x) + prm["b1"][None]
    y = jnp.maximum(y * prm["s1"][None] + prm["t1"][None], 0.0)
    y = jnp.einsum("oc,bcn->bon", prm["w2"], y) + prm["b2"][None]
    return jnp.maximum(y * prm["s2"][None] + prm["t2"][None], 0.0)


def _ref_forward(p, f, cls_label, params, num_classes=16):
    B, N1 = p[1].shape[0], p[1].shape[1]
    onehot = jax.nn.one_hot(cls_label[:, 0], num_classes, dtype=jnp.float32)
    cls_rep = jnp.broadcast_to(onehot[:, :, None], (B, num_classes, N1))
    cls_feat = jnp.maximum(
        jnp.einsum("oc,bcn->bon", params["convc_w"], cls_rep) + params["convc_b"][None], 0.0)
    ft3 = _ref_fp(p[3], p[4], f[3], f[4], params["dec"][2])
    ft2 = _ref_fp(p[2], p[3], f[2], ft3, params["dec"][1])
    skip0 = jnp.concatenate([cls_feat, f[1]], axis=1)
    return _ref_fp(p[1], p[2], skip0, ft2, params["dec"][0])


# ------------------------------------------------------------------ main
if __name__ == "__main__":
    key = jax.random.PRNGKey(0)
    B = 2
    num_classes = 16
    encoder_channel_list = [16, 32, 64, 128]
    Ns = [64, 64, 32, 16, 8]                      # per-stage point counts (stage 0 == stage 1)

    kp_, kf_, kc_, kparam = jax.random.split(key, 4)
    pkeys = jax.random.split(kp_, 5)
    fkeys = jax.random.split(kf_, 5)
    p = [jax.random.normal(pkeys[i], (B, Ns[i], 3), jnp.float32) for i in range(5)]
    f_ch = [7] + encoder_channel_list             # f[0] = raw input features (unused by decoder)
    f = [jax.random.normal(fkeys[i], (B, f_ch[i], Ns[i]), jnp.float32) for i in range(5)]
    cls_label = jax.random.randint(kc_, (B, 1), 0, num_classes)

    # deterministic parameters, shapes as implied by __init__ (cls_map='pointnet2')
    kcv, kd0, kd1, kd2 = jax.random.split(kparam, 4)
    convc_w, convc_b, _, _ = _conv_bn_params(kcv, num_classes, 64, with_bn=False)
    skip = list(encoder_channel_list[:-1])        # [16, 32, 64]
    fp_ch = list(encoder_channel_list[:-1])
    skip[0] += 64                                 # class-embedding channels prepended at stage 0
    in_ch = encoder_channel_list[-1]
    dec = [None, None, None]
    for idx, kk in ((2, kd2), (1, kd1), (0, kd0)):    # same order as _make_dec (i = -1, -2, -3)
        dec[idx] = _fp_params(kk, skip[idx], in_ch, fp_ch[idx])
        in_ch = fp_ch[idx]
    params = dict(convc_w=convc_w, convc_b=convc_b, dec=dec)

    kparams = prepare_kernel_params(params, encoder_channel_list, cls_channels=64)

    fwd = jax.jit(decoder_forward)
    out = jax.block_until_ready(fwd(p, f, cls_label, kparams))

    with jax.default_matmul_precision("highest"):
        ref = jax.block_until_ready(_ref_forward(p, f, cls_label, params, num_classes))

    assert out.shape == (B, encoder_channel_list[0], Ns[1]), out.shape
    assert bool(jnp.all(jnp.isfinite(out)))
    err = float(jnp.max(jnp.abs(out - ref)))
    assert bool(jnp.allclose(out, ref, rtol=2e-3, atol=2e-3)), err
    print("KERNEL_OK")
</pallas_src>

<mosaic_0001>
module attributes {stable_mosaic.version = 11 : i64} {
  func.func @_fused_decoder_kernel(%arg0: i32, %arg1: memref<2xi32, #tpu.memory_space<smem>>, %arg2: memref<1x64x3xf32, #tpu.memory_space<vmem>>, %arg3: memref<1x32x3xf32, #tpu.memory_space<vmem>>, %arg4: memref<1x16x3xf32, #tpu.memory_space<vmem>>, %arg5: memref<1x8x3xf32, #tpu.memory_space<vmem>>, %arg6: memref<1x16x64xf32, #tpu.memory_space<vmem>>, %arg7: memref<1x32x32xf32, #tpu.memory_space<vmem>>, %arg8: memref<1x64x16xf32, #tpu.memory_space<vmem>>, %arg9: memref<1x128x8xf32, #tpu.memory_space<vmem>>, %arg10: memref<16x16xf32, #tpu.memory_space<vmem>>, %arg11: memref<64x64xf32, #tpu.memory_space<vmem>>, %arg12: memref<64x128xf32, #tpu.memory_space<vmem>>, %arg13: memref<64x1xf32, #tpu.memory_space<vmem>>, %arg14: memref<64x64xf32, #tpu.memory_space<vmem>>, %arg15: memref<64x1xf32, #tpu.memory_space<vmem>>, %arg16: memref<32x32xf32, #tpu.memory_space<vmem>>, %arg17: memref<32x64xf32, #tpu.memory_space<vmem>>, %arg18: memref<32x1xf32, #tpu.memory_space<vmem>>, %arg19: memref<32x32xf32, #tpu.memory_space<vmem>>, %arg20: memref<32x1xf32, #tpu.memory_space<vmem>>, %arg21: memref<16x16xf32, #tpu.memory_space<vmem>>, %arg22: memref<16x32xf32, #tpu.memory_space<vmem>>, %arg23: memref<16x1xf32, #tpu.memory_space<vmem>>, %arg24: memref<16x16xf32, #tpu.memory_space<vmem>>, %arg25: memref<16x1xf32, #tpu.memory_space<vmem>>, %arg26: memref<1x16x64xf32, #tpu.memory_space<vmem>>) attributes {dimension_semantics = [#tpu.dimension_semantics<parallel>], iteration_bounds = array<i64: 2>, scalar_prefetch = 1 : i64, scratch_operands = 0 : i64, tpu.core_type = #tpu.core_type<tc>, window_params = [{transform_indices = @transform_0, window_bounds = array<i64: 1, 64, 3>}, {transform_indices = @transform_1, window_bounds = array<i64: 1, 32, 3>}, {transform_indices = @transform_2, window_bounds = array<i64: 1, 16, 3>}, {transform_indices = @transform_3, window_bounds = array<i64: 1, 8, 3>}, {transform_indices = @transform_4, window_bounds = array<i64: 1, 16, 64>}, {transform_indices = @transform_5, window_bounds = array<i64: 1, 32, 32>}, {transform_indices = @transform_6, window_bounds = array<i64: 1, 64, 16>}, {transform_indices = @transform_7, window_bounds = array<i64: 1, 128, 8>}, {pipeline_mode = #tpu.pipeline_mode<synchronous>, transform_indices = @transform_8, window_bounds = array<i64: 16, 16>}, {pipeline_mode = #tpu.pipeline_mode<synchronous>, transform_indices = @transform_9, window_bounds = array<i64: 64, 64>}, {pipeline_mode = #tpu.pipeline_mode<synchronous>, transform_indices = @transform_10, window_bounds = array<i64: 64, 128>}, {pipeline_mode = #tpu.pipeline_mode<synchronous>, transform_indices = @transform_11, window_bounds = array<i64: 64, 1>}, {pipeline_mode = #tpu.pipeline_mode<synchronous>, transform_indices = @transform_12, window_bounds = array<i64: 64, 64>}, {pipeline_mode = #tpu.pipeline_mode<synchronous>, transform_indices = @transform_13, window_bounds = array<i64: 64, 1>}, {pipeline_mode = #tpu.pipeline_mode<synchronous>, transform_indices = @transform_14, window_bounds = array<i64: 32, 32>}, {pipeline_mode = #tpu.pipeline_mode<synchronous>, transform_indices = @transform_15, window_bounds = array<i64: 32, 64>}, {pipeline_mode = #tpu.pipeline_mode<synchronous>, transform_indices = @transform_16, window_bounds = array<i64: 32, 1>}, {pipeline_mode = #tpu.pipeline_mode<synchronous>, transform_indices = @transform_17, window_bounds = array<i64: 32, 32>}, {pipeline_mode = #tpu.pipeline_mode<synchronous>, transform_indices = @transform_18, window_bounds = array<i64: 32, 1>}, {pipeline_mode = #tpu.pipeline_mode<synchronous>, transform_indices = @transform_19, window_bounds = array<i64: 16, 16>}, {pipeline_mode = #tpu.pipeline_mode<synchronous>, transform_indices = @transform_20, window_bounds = array<i64: 16, 32>}, {pipeline_mode = #tpu.pipeline_mode<synchronous>, transform_indices = @transform_21, window_bounds = array<i64: 16, 1>}, {pipeline_mode = #tpu.pipeline_mode<synchronous>, transform_indices = @transform_22, window_bounds = array<i64: 16, 16>}, {pipeline_mode = #tpu.pipeline_mode<synchronous>, transform_indices = @transform_23, window_bounds = array<i64: 16, 1>}, {transform_indices = @transform_24, window_bounds = array<i64: 1, 16, 64>}]} {
    %c0 = arith.constant 0 : index
    %c0_0 = arith.constant 0 : index
    %c0_1 = arith.constant 0 : index
    %0 = vector.load %arg2[%c0, %c0_0, %c0_1] : memref<1x64x3xf32, #tpu.memory_space<vmem>>, vector<1x64x3xf32>
    %1 = vector.shape_cast %0 : vector<1x64x3xf32> to vector<64x3xf32>
    %c0_2 = arith.constant 0 : index
    %c0_3 = arith.constant 0 : index
    %c0_4 = arith.constant 0 : index
    %2 = vector.load %arg3[%c0_2, %c0_3, %c0_4] : memref<1x32x3xf32, #tpu.memory_space<vmem>>, vector<1x32x3xf32>
    %3 = vector.shape_cast %2 : vector<1x32x3xf32> to vector<32x3xf32>
    %c0_5 = arith.constant 0 : index
    %c0_6 = arith.constant 0 : index
    %c0_7 = arith.constant 0 : index
    %4 = vector.load %arg4[%c0_5, %c0_6, %c0_7] : memref<1x16x3xf32, #tpu.memory_space<vmem>>, vector<1x16x3xf32>
    %5 = vector.shape_cast %4 : vector<1x16x3xf32> to vector<16x3xf32>
    %c0_8 = arith.constant 0 : index
    %c0_9 = arith.constant 0 : index
    %c0_10 = arith.constant 0 : index
    %6 = vector.load %arg5[%c0_8, %c0_9, %c0_10] : memref<1x8x3xf32, #tpu.memory_space<vmem>>, vector<1x8x3xf32>
    %7 = vector.shape_cast %6 : vector<1x8x3xf32> to vector<8x3xf32>
    %c0_11 = arith.constant 0 : index
    %c0_12 = arith.constant 0 : index
    %c0_13 = arith.constant 0 : index
    %8 = vector.load %arg6[%c0_11, %c0_12, %c0_13] : memref<1x16x64xf32, #tpu.memory_space<vmem>>, vector<1x16x64xf32>
    %9 = vector.shape_cast %8 : vector<1x16x64xf32> to vector<16x64xf32>
    %c0_14 = arith.constant 0 : index
    %c0_15 = arith.constant 0 : index
    %c0_16 = arith.constant 0 : index
    %10 = vector.load %arg7[%c0_14, %c0_15, %c0_16] : memref<1x32x32xf32, #tpu.memory_space<vmem>>, vector<1x32x32xf32>
    %11 = vector.shape_cast %10 : vector<1x32x32xf32> to vector<32x32xf32>
    %c0_17 = arith.constant 0 : index
    %c0_18 = arith.constant 0 : index
    %c0_19 = arith.constant 0 : index
    %12 = vector.load %arg8[%c0_17, %c0_18, %c0_19] : memref<1x64x16xf32, #tpu.memory_space<vmem>>, vector<1x64x16xf32>
    %13 = vector.shape_cast %12 : vector<1x64x16xf32> to vector<64x16xf32>
    %c0_20 = arith.constant 0 : index
    %c0_21 = arith.constant 0 : index
    %c0_22 = arith.constant 0 : index
    %14 = vector.load %arg9[%c0_20, %c0_21, %c0_22] : memref<1x128x8xf32, #tpu.memory_space<vmem>>, vector<1x128x8xf32>
    %15 = vector.shape_cast %14 : vector<1x128x8xf32> to vector<128x8xf32>
    %c0_23 = arith.constant 0 : index
    %c0_24 = arith.constant 0 : index
    %16 = vector.load %arg11[%c0_23, %c0_24] : memref<64x64xf32, #tpu.memory_space<vmem>>, vector<64x64xf32>
    %cst = arith.constant dense<0.000000e+00> : vector<64x16xf32>
    %17 = tpu.matmul %16, %13, %cst {dimension_numbers = #tpu.dot_dimension_numbers<[1], [0], [0], [1], [0, 0, 1, 1], [], []>} : vector<64x64xf32>, vector<64x16xf32>, vector<64x16xf32> -> vector<64x16xf32>
    %c0_25 = arith.constant 0 : index
    %c0_26 = arith.constant 0 : index
    %18 = vector.load %arg12[%c0_25, %c0_26] : memref<64x128xf32, #tpu.memory_space<vmem>>, vector<64x128xf32>
    %c0_27 = arith.constant 0 : index
    %c0_28 = arith.constant 0 : index
    %19 = vector.load %arg13[%c0_27, %c0_28] : memref<64x1xf32, #tpu.memory_space<vmem>>, vector<64x1xf32>
    %c0_29 = arith.constant 0 : index
    %c0_30 = arith.constant 0 : index
    %20 = vector.load %arg14[%c0_29, %c0_30] : memref<64x64xf32, #tpu.memory_space<vmem>>, vector<64x64xf32>
    %c0_31 = arith.constant 0 : index
    %c0_32 = arith.constant 0 : index
    %21 = vector.load %arg15[%c0_31, %c0_32] : memref<64x1xf32, #tpu.memory_space<vmem>>, vector<64x1xf32>
    %cst_33 = arith.constant dense<0.000000e+00> : vector<16x8xf32>
    %22 = tpu.matmul %5, %7, %cst_33 {dimension_numbers = #tpu.dot_dimension_numbers<[1], [1], [0], [0], [0, 0, 1, 0], [], []>} : vector<16x3xf32>, vector<8x3xf32>, vector<16x8xf32> -> vector<16x8xf32>
    %23 = arith.mulf %5, %5 : vector<16x3xf32>
    %cst_34 = arith.constant dense<0.000000e+00> : vector<16xf32>
    %24 = vector.multi_reduction <add>, %23, %cst_34 [1] : vector<16x3xf32> to vector<16xf32>
    %25 = vector.shape_cast %24 : vector<16xf32> to vector<16x1xf32>
    %cst_35 = arith.constant 1.000000e+00 : f32
    %26 = vector.broadcast %cst_35 : f32 to vector<1x3xf32>
    %27 = arith.mulf %7, %7 : vector<8x3xf32>
    %cst_36 = arith.constant dense<0.000000e+00> : vector<1x8xf32>
    %28 = tpu.matmul %26, %27, %cst_36 {dimension_numbers = #tpu.dot_dimension_numbers<[1], [1], [0], [0], [0, 0, 1, 0], [], []>} : vector<1x3xf32>, vector<8x3xf32>, vector<1x8xf32> -> vector<1x8xf32>
    %cst_37 = arith.constant 2.000000e+00 : f32
    %29 = vector.broadcast %cst_37 : f32 to vector<16x8xf32>
    %30 = arith.mulf %29, %22 : vector<16x8xf32>
    %31 = vector.broadcast %25 : vector<16x1xf32> to vector<16x8xf32>
    %32 = arith.subf %31, %30 : vector<16x8xf32>
    %33 = vector.broadcast %28 : vector<1x8xf32> to vector<16x8xf32>
    %34 = arith.addf %32, %33 : vector<16x8xf32>
    %cst_38 = arith.constant 0.000000e+00 : f32
    %35 = vector.broadcast %cst_38 : f32 to vector<16x8xf32>
    %36 = arith.maximumf %34, %35 : vector<16x8xf32>
    %cst_39 = arith.constant dense<0x7F800000> : vector<16xf32>
    %37 = vector.multi_reduction <minimumf>, %36, %cst_39 [1] : vector<16x8xf32> to vector<16xf32>
    %38 = vector.shape_cast %37 : vector<16xf32> to vector<16x1xf32>
    %39 = vector.broadcast %38 : vector<16x1xf32> to vector<16x8xf32>
    %40 = arith.cmpf ole, %36, %39 : vector<16x8xf32>
    %41 = arith.extui %40 : vector<16x8xi1> to vector<16x8xi32>
    %42 = arith.sitofp %41 : vector<16x8xi32> to vector<16x8xf32>
    %43 = math.sqrt %38 : vector<16x1xf32>
    %cst_40 = arith.constant 9.99999993E-9 : f32
    %44 = vector.broadcast %cst_40 : f32 to vector<16x1xf32>
    %45 = arith.addf %43, %44 : vector<16x1xf32>
    %cst_41 = arith.constant 1.000000e+00 : f32
    %46 = vector.broadcast %cst_41 : f32 to vector<16x1xf32>
    %47 = arith.divf %46, %45 : vector<16x1xf32>
    %cst_42 = arith.constant 1.000000e+30 : f32
    %48 = vector.broadcast %cst_42 : f32 to vector<16x8xf32>
    %49 = arith.select %40, %48, %36 : vector<16x8xi1>, vector<16x8xf32>
    %cst_43 = arith.constant dense<0x7F800000> : vector<16xf32>
    %50 = vector.multi_reduction <minimumf>, %49, %cst_43 [1] : vector<16x8xf32> to vector<16xf32>
    %51 = vector.shape_cast %50 : vector<16xf32> to vector<16x1xf32>
    %52 = vector.broadcast %51 : vector<16x1xf32> to vector<16x8xf32>
    %53 = arith.cmpf ole, %49, %52 : vector<16x8xf32>
    %54 = arith.extui %53 : vector<16x8xi1> to vector<16x8xi32>
    %55 = arith.sitofp %54 : vector<16x8xi32> to vector<16x8xf32>
    %56 = math.sqrt %51 : vector<16x1xf32>
    %cst_44 = arith.constant 9.99999993E-9 : f32
    %57 = vector.broadcast %cst_44 : f32 to vector<16x1xf32>
    %58 = arith.addf %56, %57 : vector<16x1xf32>
    %cst_45 = arith.constant 1.000000e+00 : f32
    %59 = vector.broadcast %cst_45 : f32 to vector<16x1xf32>
    %60 = arith.divf %59, %58 : vector<16x1xf32>
    %cst_46 = arith.constant 1.000000e+30 : f32
    %61 = vector.broadcast %cst_46 : f32 to vector<16x8xf32>
    %62 = arith.select %53, %61, %49 : vector<16x8xi1>, vector<16x8xf32>
    %cst_47 = arith.constant dense<0x7F800000> : vector<16xf32>
    %63 = vector.multi_reduction <minimumf>, %62, %cst_47 [1] : vector<16x8xf32> to vector<16xf32>
    %64 = vector.shape_cast %63 : vector<16xf32> to vector<16x1xf32>
    %65 = vector.broadcast %64 : vector<16x1xf32> to vector<16x8xf32>
    %66 = arith.cmpf ole, %62, %65 : vector<16x8xf32>
    %67 = arith.extui %66 : vector<16x8xi1> to vector<16x8xi32>
    %68 = arith.sitofp %67 : vector<16x8xi32> to vector<16x8xf32>
    %69 = math.sqrt %64 : vector<16x1xf32>
    %cst_48 = arith.constant 9.99999993E-9 : f32
    %70 = vector.broadcast %cst_48 : f32 to vector<16x1xf32>
    %71 = arith.addf %69, %70 : vector<16x1xf32>
    %cst_49 = arith.constant 1.000000e+00 : f32
    %72 = vector.broadcast %cst_49 : f32 to vector<16x1xf32>
    %73 = arith.divf %72, %71 : vector<16x1xf32>
    %74 = arith.addf %47, %60 : vector<16x1xf32>
    %75 = arith.addf %74, %73 : vector<16x1xf32>
    %cst_50 = arith.constant 1.000000e+00 : f32
    %76 = vector.broadcast %cst_50 : f32 to vector<16x1xf32>
    %77 = arith.divf %76, %75 : vector<16x1xf32>
    %78 = arith.mulf %47, %77 : vector<16x1xf32>
    %79 = vector.broadcast %78 : vector<16x1xf32> to vector<16x8xf32>
    %80 = arith.mulf %79, %42 : vector<16x8xf32>
    %81 = arith.mulf %60, %77 : vector<16x1xf32>
    %82 = vector.broadcast %81 : vector<16x1xf32> to vector<16x8xf32>
    %83 = arith.mulf %82, %55 : vector<16x8xf32>
    %84 = arith.addf %80, %83 : vector<16x8xf32>
    %85 = arith.mulf %73, %77 : vector<16x1xf32>
    %86 = vector.broadcast %85 : vector<16x1xf32> to vector<16x8xf32>
    %87 = arith.mulf %86, %68 : vector<16x8xf32>
    %88 = arith.addf %84, %87 : vector<16x8xf32>
    %cst_51 = arith.constant dense<0.000000e+00> : vector<128x16xf32>
    %89 = tpu.matmul %15, %88, %cst_51 {dimension_numbers = #tpu.dot_dimension_numbers<[1], [1], [0], [0], [0, 0, 1, 0], [], []>} : vector<128x8xf32>, vector<16x8xf32>, vector<128x16xf32> -> vector<128x16xf32>
    %cst_52 = arith.constant dense<0.000000e+00> : vector<64x16xf32>
    %90 = tpu.matmul %18, %89, %cst_52 {dimension_numbers = #tpu.dot_dimension_numbers<[1], [0], [0], [1], [0, 0, 1, 1], [], []>} : vector<64x128xf32>, vector<128x16xf32>, vector<64x16xf32> -> vector<64x16xf32>
    %91 = arith.addf %17, %90 : vector<64x16xf32>
    %92 = vector.broadcast %19 : vector<64x1xf32> to vector<64x16xf32>
    %93 = arith.addf %91, %92 : vector<64x16xf32>
    %cst_53 = arith.constant 0.000000e+00 : f32
    %94 = vector.broadcast %cst_53 : f32 to vector<64x16xf32>
    %95 = arith.maximumf %93, %94 : vector<64x16xf32>
    %cst_54 = arith.constant dense<0.000000e+00> : vector<64x16xf32>
    %96 = tpu.matmul %20, %95, %cst_54 {dimension_numbers = #tpu.dot_dimension_numbers<[1], [0], [0], [1], [0, 0, 1, 1], [], []>} : vector<64x64xf32>, vector<64x16xf32>, vector<64x16xf32> -> vector<64x16xf32>
    %97 = vector.broadcast %21 : vector<64x1xf32> to vector<64x16xf32>
    %98 = arith.addf %96, %97 : vector<64x16xf32>
    %cst_55 = arith.constant 0.000000e+00 : f32
    %99 = vector.broadcast %cst_55 : f32 to vector<64x16xf32>
    %100 = arith.maximumf %98, %99 : vector<64x16xf32>
    %c0_56 = arith.constant 0 : index
    %c0_57 = arith.constant 0 : index
    %101 = vector.load %arg16[%c0_56, %c0_57] : memref<32x32xf32, #tpu.memory_space<vmem>>, vector<32x32xf32>
    %cst_58 = arith.constant dense<0.000000e+00> : vector<32x32xf32>
    %102 = tpu.matmul %101, %11, %cst_58 {dimension_numbers = #tpu.dot_dimension_numbers<[1], [0], [0], [1], [0, 0, 1, 1], [], []>} : vector<32x32xf32>, vector<32x32xf32>, vector<32x32xf32> -> vector<32x32xf32>
    %c0_59 = arith.constant 0 : index
    %c0_60 = arith.constant 0 : index
    %103 = vector.load %arg17[%c0_59, %c0_60] : memref<32x64xf32, #tpu.memory_space<vmem>>, vector<32x64xf32>
    %c0_61 = arith.constant 0 : index
    %c0_62 = arith.constant 0 : index
    %104 = vector.load %arg18[%c0_61, %c0_62] : memref<32x1xf32, #tpu.memory_space<vmem>>, vector<32x1xf32>
    %c0_63 = arith.constant 0 : index
    %c0_64 = arith.constant 0 : index
    %105 = vector.load %arg19[%c0_63, %c0_64] : memref<32x32xf32, #tpu.memory_space<vmem>>, vector<32x32xf32>
    %c0_65 = arith.constant 0 : index
    %c0_66 = arith.constant 0 : index
    %106 = vector.load %arg20[%c0_65, %c0_66] : memref<32x1xf32, #tpu.memory_space<vmem>>, vector<32x1xf32>
    %cst_67 = arith.constant dense<0.000000e+00> : vector<32x16xf32>
    %107 = tpu.matmul %3, %5, %cst_67 {dimension_numbers = #tpu.dot_dimension_numbers<[1], [1], [0], [0], [0, 0, 1, 0], [], []>} : vector<32x3xf32>, vector<16x3xf32>, vector<32x16xf32> -> vector<32x16xf32>
    %108 = arith.mulf %3, %3 : vector<32x3xf32>
    %cst_68 = arith.constant dense<0.000000e+00> : vector<32xf32>
    %109 = vector.multi_reduction <add>, %108, %cst_68 [1] : vector<32x3xf32> to vector<32xf32>
    %110 = vector.shape_cast %109 : vector<32xf32> to vector<32x1xf32>
    %cst_69 = arith.constant 1.000000e+00 : f32
    %111 = vector.broadcast %cst_69 : f32 to vector<1x3xf32>
    %112 = arith.mulf %5, %5 : vector<16x3xf32>
    %cst_70 = arith.constant dense<0.000000e+00> : vector<1x16xf32>
    %113 = tpu.matmul %111, %112, %cst_70 {dimension_numbers = #tpu.dot_dimension_numbers<[1], [1], [0], [0], [0, 0, 1, 0], [], []>} : vector<1x3xf32>, vector<16x3xf32>, vector<1x16xf32> -> vector<1x16xf32>
    %cst_71 = arith.constant 2.000000e+00 : f32
    %114 = vector.broadcast %cst_71 : f32 to vector<32x16xf32>
    %115 = arith.mulf %114, %107 : vector<32x16xf32>
    %116 = vector.broadcast %110 : vector<32x1xf32> to vector<32x16xf32>
    %117 = arith.subf %116, %115 : vector<32x16xf32>
    %118 = vector.broadcast %113 : vector<1x16xf32> to vector<32x16xf32>
    %119 = arith.addf %117, %118 : vector<32x16xf32>
    %cst_72 = arith.constant 0.000000e+00 : f32
    %120 = vector.broadcast %cst_72 : f32 to vector<32x16xf32>
    %121 = arith.maximumf %119, %120 : vector<32x16xf32>
    %cst_73 = arith.constant dense<0x7F800000> : vector<32xf32>
    %122 = vector.multi_reduction <minimumf>, %121, %cst_73 [1] : vector<32x16xf32> to vector<32xf32>
    %123 = vector.shape_cast %122 : vector<32xf32> to vector<32x1xf32>
    %124 = vector.broadcast %123 : vector<32x1xf32> to vector<32x16xf32>
    %125 = arith.cmpf ole, %121, %124 : vector<32x16xf32>
    %126 = arith.extui %125 : vector<32x16xi1> to vector<32x16xi32>
    %127 = arith.sitofp %126 : vector<32x16xi32> to vector<32x16xf32>
    %128 = math.sqrt %123 : vector<32x1xf32>
    %cst_74 = arith.constant 9.99999993E-9 : f32
    %129 = vector.broadcast %cst_74 : f32 to vector<32x1xf32>
    %130 = arith.addf %128, %129 : vector<32x1xf32>
    %cst_75 = arith.constant 1.000000e+00 : f32
    %131 = vector.broadcast %cst_75 : f32 to vector<32x1xf32>
    %132 = arith.divf %131, %130 : vector<32x1xf32>
    %cst_76 = arith.constant 1.000000e+30 : f32
    %133 = vector.broadcast %cst_76 : f32 to vector<32x16xf32>
    %134 = arith.select %125, %133, %121 : vector<32x16xi1>, vector<32x16xf32>
    %cst_77 = arith.constant dense<0x7F800000> : vector<32xf32>
    %135 = vector.multi_reduction <minimumf>, %134, %cst_77 [1] : vector<32x16xf32> to vector<32xf32>
    %136 = vector.shape_cast %135 : vector<32xf32> to vector<32x1xf32>
    %137 = vector.broadcast %136 : vector<32x1xf32> to vector<32x16xf32>
    %138 = arith.cmpf ole, %134, %137 : vector<32x16xf32>
    %139 = arith.extui %138 : vector<32x16xi1> to vector<32x16xi32>
    %140 = arith.sitofp %139 : vector<32x16xi32> to vector<32x16xf32>
    %141 = math.sqrt %136 : vector<32x1xf32>
    %cst_78 = arith.constant 9.99999993E-9 : f32
    %142 = vector.broadcast %cst_78 : f32 to vector<32x1xf32>
    %143 = arith.addf %141, %142 : vector<32x1xf32>
    %cst_79 = arith.constant 1.000000e+00 : f32
    %144 = vector.broadcast %cst_79 : f32 to vector<32x1xf32>
    %145 = arith.divf %144, %143 : vector<32x1xf32>
    %cst_80 = arith.constant 1.000000e+30 : f32
    %146 = vector.broadcast %cst_80 : f32 to vector<32x16xf32>
    %147 = arith.select %138, %146, %134 : vector<32x16xi1>, vector<32x16xf32>
    %cst_81 = arith.constant dense<0x7F800000> : vector<32xf32>
    %148 = vector.multi_reduction <minimumf>, %147, %cst_81 [1] : vector<32x16xf32> to vector<32xf32>
    %149 = vector.shape_cast %148 : vector<32xf32> to vector<32x1xf32>
    %150 = vector.broadcast %149 : vector<32x1xf32> to vector<32x16xf32>
    %151 = arith.cmpf ole, %147, %150 : vector<32x16xf32>
    %152 = arith.extui %151 : vector<32x16xi1> to vector<32x16xi32>
    %153 = arith.sitofp %152 : vector<32x16xi32> to vector<32x16xf32>
    %154 = math.sqrt %149 : vector<32x1xf32>
    %cst_82 = arith.constant 9.99999993E-9 : f32
    %155 = vector.broadcast %cst_82 : f32 to vector<32x1xf32>
    %156 = arith.addf %154, %155 : vector<32x1xf32>
    %cst_83 = arith.constant 1.000000e+00 : f32
    %157 = vector.broadcast %cst_83 : f32 to vector<32x1xf32>
    %158 = arith.divf %157, %156 : vector<32x1xf32>
    %159 = arith.addf %132, %145 : vector<32x1xf32>
    %160 = arith.addf %159, %158 : vector<32x1xf32>
    %cst_84 = arith.constant 1.000000e+00 : f32
    %161 = vector.broadcast %cst_84 : f32 to vector<32x1xf32>
    %162 = arith.divf %161, %160 : vector<32x1xf32>
    %163 = arith.mulf %132, %162 : vector<32x1xf32>
    %164 = vector.broadcast %163 : vector<32x1xf32> to vector<32x16xf32>
    %165 = arith.mulf %164, %127 : vector<32x16xf32>
    %166 = arith.mulf %145, %162 : vector<32x1xf32>
    %167 = vector.broadcast %166 : vector<32x1xf32> to vector<32x16xf32>
    %168 = arith.mulf %167, %140 : vector<32x16xf32>
    %169 = arith.addf %165, %168 : vector<32x16xf32>
    %170 = arith.mulf %158, %162 : vector<32x1xf32>
    %171 = vector.broadcast %170 : vector<32x1xf32> to vector<32x16xf32>
    %172 = arith.mulf %171, %153 : vector<32x16xf32>
    %173 = arith.addf %169, %172 : vector<32x16xf32>
    %cst_85 = arith.constant dense<0.000000e+00> : vector<64x32xf32>
    %174 = tpu.matmul %100, %173, %cst_85 {dimension_numbers = #tpu.dot_dimension_numbers<[1], [1], [0], [0], [0, 0, 1, 0], [], []>} : vector<64x16xf32>, vector<32x16xf32>, vector<64x32xf32> -> vector<64x32xf32>
    %cst_86 = arith.constant dense<0.000000e+00> : vector<32x32xf32>
    %175 = tpu.matmul %103, %174, %cst_86 {dimension_numbers = #tpu.dot_dimension_numbers<[1], [0], [0], [1], [0, 0, 1, 1], [], []>} : vector<32x64xf32>, vector<64x32xf32>, vector<32x32xf32> -> vector<32x32xf32>
    %176 = arith.addf %102, %175 : vector<32x32xf32>
    %177 = vector.broadcast %104 : vector<32x1xf32> to vector<32x32xf32>
    %178 = arith.addf %176, %177 : vector<32x32xf32>
    %cst_87 = arith.constant 0.000000e+00 : f32
    %179 = vector.broadcast %cst_87 : f32 to vector<32x32xf32>
    %180 = arith.maximumf %178, %179 : vector<32x32xf32>
    %cst_88 = arith.constant dense<0.000000e+00> : vector<32x32xf32>
    %181 = tpu.matmul %105, %180, %cst_88 {dimension_numbers = #tpu.dot_dimension_numbers<[1], [0], [0], [1], [0, 0, 1, 1], [], []>} : vector<32x32xf32>, vector<32x32xf32>, vector<32x32xf32> -> vector<32x32xf32>
    %182 = vector.broadcast %106 : vector<32x1xf32> to vector<32x32xf32>
    %183 = arith.addf %181, %182 : vector<32x32xf32>
    %cst_89 = arith.constant 0.000000e+00 : f32
    %184 = vector.broadcast %cst_89 : f32 to vector<32x32xf32>
    %185 = arith.maximumf %183, %184 : vector<32x32xf32>
    %186 = arith.index_cast %arg0 : i32 to index
    %187 = memref.load %arg1[%186] : memref<2xi32, #tpu.memory_space<smem>>
    %188 = tpu.iota {dimensions = array<i32: 1>} : vector<1x16xi32>
    %189 = vector.broadcast %187 : i32 to vector<1x16xi32>
    %190 = arith.cmpi eq, %188, %189 : vector<1x16xi32>
    %c0_90 = arith.constant 0 : index
    %c0_91 = arith.constant 0 : index
    %191 = vector.load %arg10[%c0_90, %c0_91] : memref<16x16xf32, #tpu.memory_space<vmem>>, vector<16x16xf32>
    %cst_92 = arith.constant 0.000000e+00 : f32
    %192 = vector.shape_cast %190 : vector<1x16xi1> to vector<1x16xi1>
    %193 = vector.broadcast %192 : vector<1x16xi1> to vector<16x16xi1>
    %194 = vector.broadcast %cst_92 : f32 to vector<16x16xf32>
    %195 = arith.select %193, %191, %194 : vector<16x16xi1>, vector<16x16xf32>
    %cst_93 = arith.constant dense<0.000000e+00> : vector<16xf32>
    %196 = vector.multi_reduction <add>, %195, %cst_93 [1] : vector<16x16xf32> to vector<16xf32>
    %197 = vector.shape_cast %196 : vector<16xf32> to vector<16x1xf32>
    %c0_94 = arith.constant 0 : index
    %c0_95 = arith.constant 0 : index
    %198 = vector.load %arg21[%c0_94, %c0_95] : memref<16x16xf32, #tpu.memory_space<vmem>>, vector<16x16xf32>
    %cst_96 = arith.constant dense<0.000000e+00> : vector<16x64xf32>
    %199 = tpu.matmul %198, %9, %cst_96 {dimension_numbers = #tpu.dot_dimension_numbers<[1], [0], [0], [1], [0, 0, 1, 1], [], []>} : vector<16x16xf32>, vector<16x64xf32>, vector<16x64xf32> -> vector<16x64xf32>
    %200 = vector.broadcast %197 : vector<16x1xf32> to vector<16x64xf32>
    %201 = arith.addf %199, %200 : vector<16x64xf32>
    %c0_97 = arith.constant 0 : index
    %c0_98 = arith.constant 0 : index
    %202 = vector.load %arg22[%c0_97, %c0_98] : memref<16x32xf32, #tpu.memory_space<vmem>>, vector<16x32xf32>
    %c0_99 = arith.constant 0 : index
    %c0_100 = arith.constant 0 : index
    %203 = vector.load %arg23[%c0_99, %c0_100] : memref<16x1xf32, #tpu.memory_space<vmem>>, vector<16x1xf32>
    %c0_101 = arith.constant 0 : index
    %c0_102 = arith.constant 0 : index
    %204 = vector.load %arg24[%c0_101, %c0_102] : memref<16x16xf32, #tpu.memory_space<vmem>>, vector<16x16xf32>
    %c0_103 = arith.constant 0 : index
    %c0_104 = arith.constant 0 : index
    %205 = vector.load %arg25[%c0_103, %c0_104] : memref<16x1xf32, #tpu.memory_space<vmem>>, vector<16x1xf32>
    %cst_105 = arith.constant dense<0.000000e+00> : vector<64x32xf32>
    %206 = tpu.matmul %1, %3, %cst_105 {dimension_numbers = #tpu.dot_dimension_numbers<[1], [1], [0], [0], [0, 0, 1, 0], [], []>} : vector<64x3xf32>, vector<32x3xf32>, vector<64x32xf32> -> vector<64x32xf32>
    %207 = arith.mulf %1, %1 : vector<64x3xf32>
    %cst_106 = arith.constant dense<0.000000e+00> : vector<64xf32>
    %208 = vector.multi_reduction <add>, %207, %cst_106 [1] : vector<64x3xf32> to vector<64xf32>
    %209 = vector.shape_cast %208 : vector<64xf32> to vector<64x1xf32>
    %cst_107 = arith.constant 1.000000e+00 : f32
    %210 = vector.broadcast %cst_107 : f32 to vector<1x3xf32>
    %211 = arith.mulf %3, %3 : vector<32x3xf32>
    %cst_108 = arith.constant dense<0.000000e+00> : vector<1x32xf32>
    %212 = tpu.matmul %210, %211, %cst_108 {dimension_numbers = #tpu.dot_dimension_numbers<[1], [1], [0], [0], [0, 0, 1, 0], [], []>} : vector<1x3xf32>, vector<32x3xf32>, vector<1x32xf32> -> vector<1x32xf32>
    %cst_109 = arith.constant 2.000000e+00 : f32
    %213 = vector.broadcast %cst_109 : f32 to vector<64x32xf32>
    %214 = arith.mulf %213, %206 : vector<64x32xf32>
    %215 = vector.broadcast %209 : vector<64x1xf32> to vector<64x32xf32>
    %216 = arith.subf %215, %214 : vector<64x32xf32>
    %217 = vector.broadcast %212 : vector<1x32xf32> to vector<64x32xf32>
    %218 = arith.addf %216, %217 : vector<64x32xf32>
    %cst_110 = arith.constant 0.000000e+00 : f32
    %219 = vector.broadcast %cst_110 : f32 to vector<64x32xf32>
    %220 = arith.maximumf %218, %219 : vector<64x32xf32>
    %cst_111 = arith.constant dense<0x7F800000> : vector<64xf32>
    %221 = vector.multi_reduction <minimumf>, %220, %cst_111 [1] : vector<64x32xf32> to vector<64xf32>
    %222 = vector.shape_cast %221 : vector<64xf32> to vector<64x1xf32>
    %223 = vector.broadcast %222 : vector<64x1xf32> to vector<64x32xf32>
    %224 = arith.cmpf ole, %220, %223 : vector<64x32xf32>
    %225 = arith.extui %224 : vector<64x32xi1> to vector<64x32xi32>
    %226 = arith.sitofp %225 : vector<64x32xi32> to vector<64x32xf32>
    %227 = math.sqrt %222 : vector<64x1xf32>
    %cst_112 = arith.constant 9.99999993E-9 : f32
    %228 = vector.broadcast %cst_112 : f32 to vector<64x1xf32>
    %229 = arith.addf %227, %228 : vector<64x1xf32>
    %cst_113 = arith.constant 1.000000e+00 : f32
    %230 = vector.broadcast %cst_113 : f32 to vector<64x1xf32>
    %231 = arith.divf %230, %229 : vector<64x1xf32>
    %cst_114 = arith.constant 1.000000e+30 : f32
    %232 = vector.broadcast %cst_114 : f32 to vector<64x32xf32>
    %233 = arith.select %224, %232, %220 : vector<64x32xi1>, vector<64x32xf32>
    %cst_115 = arith.constant dense<0x7F800000> : vector<64xf32>
    %234 = vector.multi_reduction <minimumf>, %233, %cst_115 [1] : vector<64x32xf32> to vector<64xf32>
    %235 = vector.shape_cast %234 : vector<64xf32> to vector<64x1xf32>
    %236 = vector.broadcast %235 : vector<64x1xf32> to vector<64x32xf32>
    %237 = arith.cmpf ole, %233, %236 : vector<64x32xf32>
    %238 = arith.extui %237 : vector<64x32xi1> to vector<64x32xi32>
    %239 = arith.sitofp %238 : vector<64x32xi32> to vector<64x32xf32>
    %240 = math.sqrt %235 : vector<64x1xf32>
    %cst_116 = arith.constant 9.99999993E-9 : f32
    %241 = vector.broadcast %cst_116 : f32 to vector<64x1xf32>
    %242 = arith.addf %240, %241 : vector<64x1xf32>
    %cst_117 = arith.constant 1.000000e+00 : f32
    %243 = vector.broadcast %cst_117 : f32 to vector<64x1xf32>
    %244 = arith.divf %243, %242 : vector<64x1xf32>
    %cst_118 = arith.constant 1.000000e+30 : f32
    %245 = vector.broadcast %cst_118 : f32 to vector<64x32xf32>
    %246 = arith.select %237, %245, %233 : vector<64x32xi1>, vector<64x32xf32>
    %cst_119 = arith.constant dense<0x7F800000> : vector<64xf32>
    %247 = vector.multi_reduction <minimumf>, %246, %cst_119 [1] : vector<64x32xf32> to vector<64xf32>
    %248 = vector.shape_cast %247 : vector<64xf32> to vector<64x1xf32>
    %249 = vector.broadcast %248 : vector<64x1xf32> to vector<64x32xf32>
    %250 = arith.cmpf ole, %246, %249 : vector<64x32xf32>
    %251 = arith.extui %250 : vector<64x32xi1> to vector<64x32xi32>
    %252 = arith.sitofp %251 : vector<64x32xi32> to vector<64x32xf32>
    %253 = math.sqrt %248 : vector<64x1xf32>
    %cst_120 = arith.constant 9.99999993E-9 : f32
    %254 = vector.broadcast %cst_120 : f32 to vector<64x1xf32>
    %255 = arith.addf %253, %254 : vector<64x1xf32>
    %cst_121 = arith.constant 1.000000e+00 : f32
    %256 = vector.broadcast %cst_121 : f32 to vector<64x1xf32>
    %257 = arith.divf %256, %255 : vector<64x1xf32>
    %258 = arith.addf %231, %244 : vector<64x1xf32>
    %259 = arith.addf %258, %257 : vector<64x1xf32>
    %cst_122 = arith.constant 1.000000e+00 : f32
    %260 = vector.broadcast %cst_122 : f32 to vector<64x1xf32>
    %261 = arith.divf %260, %259 : vector<64x1xf32>
    %262 = arith.mulf %231, %261 : vector<64x1xf32>
    %263 = vector.broadcast %262 : vector<64x1xf32> to vector<64x32xf32>
    %264 = arith.mulf %263, %226 : vector<64x32xf32>
    %265 = arith.mulf %244, %261 : vector<64x1xf32>
    %266 = vector.broadcast %265 : vector<64x1xf32> to vector<64x32xf32>
    %267 = arith.mulf %266, %239 : vector<64x32xf32>
    %268 = arith.addf %264, %267 : vector<64x32xf32>
    %269 = arith.mulf %257, %261 : vector<64x1xf32>
    %270 = vector.broadcast %269 : vector<64x1xf32> to vector<64x32xf32>
    %271 = arith.mulf %270, %252 : vector<64x32xf32>
    %272 = arith.addf %268, %271 : vector<64x32xf32>
    %cst_123 = arith.constant dense<0.000000e+00> : vector<32x64xf32>
    %273 = tpu.matmul %185, %272, %cst_123 {dimension_numbers = #tpu.dot_dimension_numbers<[1], [1], [0], [0], [0, 0, 1, 0], [], []>} : vector<32x32xf32>, vector<64x32xf32>, vector<32x64xf32> -> vector<32x64xf32>
    %cst_124 = arith.constant dense<0.000000e+00> : vector<16x64xf32>
    %274 = tpu.matmul %202, %273, %cst_124 {dimension_numbers = #tpu.dot_dimension_numbers<[1], [0], [0], [1], [0, 0, 1, 1], [], []>} : vector<16x32xf32>, vector<32x64xf32>, vector<16x64xf32> -> vector<16x64xf32>
    %275 = arith.addf %201, %274 : vector<16x64xf32>
    %276 = vector.broadcast %203 : vector<16x1xf32> to vector<16x64xf32>
    %277 = arith.addf %275, %276 : vector<16x64xf32>
    %cst_125 = arith.constant 0.000000e+00 : f32
    %278 = vector.broadcast %cst_125 : f32 to vector<16x64xf32>
    %279 = arith.maximumf %277, %278 : vector<16x64xf32>
    %cst_126 = arith.constant dense<0.000000e+00> : vector<16x64xf32>
    %280 = tpu.matmul %204, %279, %cst_126 {dimension_numbers = #tpu.dot_dimension_numbers<[1], [0], [0], [1], [0, 0, 1, 1], [], []>} : vector<16x16xf32>, vector<16x64xf32>, vector<16x64xf32> -> vector<16x64xf32>
    %281 = vector.broadcast %205 : vector<16x1xf32> to vector<16x64xf32>
    %282 = arith.addf %280, %281 : vector<16x64xf32>
    %cst_127 = arith.constant 0.000000e+00 : f32
    %283 = vector.broadcast %cst_127 : f32 to vector<16x64xf32>
    %284 = arith.maximumf %282, %283 : vector<16x64xf32>
    %c0_128 = arith.constant 0 : index
    %c0_129 = arith.constant 0 : index
    %c0_130 = arith.constant 0 : index
    %285 = vector.load %arg26[%c0_128, %c0_129, %c0_130] : memref<1x16x64xf32, #tpu.memory_space<vmem>>, vector<1x16x64xf32>
    %286 = vector.shape_cast %285 : vector<1x16x64xf32> to vector<16x64xf32>
    %287 = vector.shape_cast %284 : vector<16x64xf32> to vector<1x16x64xf32>
    tpu.vector_store %arg26[%c0_128, %c0_129, %c0_130], %287 {strides = array<i32>} : memref<1x16x64xf32, #tpu.memory_space<vmem>>, vector<1x16x64xf32>,
    return
  }
  func.func @transform_0(%arg0: i32, %arg1: memref<2xi32, #tpu.memory_space<smem>>) -> (i32, i32, i32) {
    %c0_i32 = arith.constant 0 : i32
    %c0_i32_0 = arith.constant 0 : i32
    %c0_i32_1 = arith.constant 0 : i32
    return %arg0, %c0_i32, %c0_i32_0 : i32, i32, i32
  }
  func.func @transform_1(%arg0: i32, %arg1: memref<2xi32, #tpu.memory_space<smem>>) -> (i32, i32, i32) {
    %c0_i32 = arith.constant 0 : i32
    %c0_i32_0 = arith.constant 0 : i32
    %c0_i32_1 = arith.constant 0 : i32
    return %arg0, %c0_i32, %c0_i32_0 : i32, i32, i32
  }
  func.func @transform_2(%arg0: i32, %arg1: memref<2xi32, #tpu.memory_space<smem>>) -> (i32, i32, i32) {
    %c0_i32 = arith.constant 0 : i32
    %c0_i32_0 = arith.constant 0 : i32
    %c0_i32_1 = arith.constant 0 : i32
    return %arg0, %c0_i32, %c0_i32_0 : i32, i32, i32
  }
  func.func @transform_3(%arg0: i32, %arg1: memref<2xi32, #tpu.memory_space<smem>>) -> (i32, i32, i32) {
    %c0_i32 = arith.constant 0 : i32
    %c0_i32_0 = arith.constant 0 : i32
    %c0_i32_1 = arith.constant 0 : i32
    return %arg0, %c0_i32, %c0_i32_0 : i32, i32, i32
  }
  func.func @transform_4(%arg0: i32, %arg1: memref<2xi32, #tpu.memory_space<smem>>) -> (i32, i32, i32) {
    %c0_i32 = arith.constant 0 : i32
    %c0_i32_0 = arith.constant 0 : i32
    %c0_i32_1 = arith.constant 0 : i32
    return %arg0, %c0_i32, %c0_i32_0 : i32, i32, i32
  }
  func.func @transform_5(%arg0: i32, %arg1: memref<2xi32, #tpu.memory_space<smem>>) -> (i32, i32, i32) {
    %c0_i32 = arith.constant 0 : i32
    %c0_i32_0 = arith.constant 0 : i32
    %c0_i32_1 = arith.constant 0 : i32
    return %arg0, %c0_i32, %c0_i32_0 : i32, i32, i32
  }
  func.func @transform_6(%arg0: i32, %arg1: memref<2xi32, #tpu.memory_space<smem>>) -> (i32, i32, i32) {
    %c0_i32 = arith.constant 0 : i32
    %c0_i32_0 = arith.constant 0 : i32
    %c0_i32_1 = arith.constant 0 : i32
    return %arg0, %c0_i32, %c0_i32_0 : i32, i32, i32
  }
  func.func @transform_7(%arg0: i32, %arg1: memref<2xi32, #tpu.memory_space<smem>>) -> (i32, i32, i32) {
    %c0_i32 = arith.constant 0 : i32
    %c0_i32_0 = arith.constant 0 : i32
    %c0_i32_1 = arith.constant 0 : i32
    return %arg0, %c0_i32, %c0_i32_0 : i32, i32, i32
  }
  func.func @transform_8(%arg0: i32, %arg1: memref<2xi32, #tpu.memory_space<smem>>) -> (i32, i32) {
    %c0_i32 = arith.constant 0 : i32
    %c0_i32_0 = arith.constant 0 : i32
    %c0_i32_1 = arith.constant 0 : i32
    return %c0_i32, %c0_i32_0 : i32, i32
  }
  func.func @transform_9(%arg0: i32, %arg1: memref<2xi32, #tpu.memory_space<smem>>) -> (i32, i32) {
    %c0_i32 = arith.constant 0 : i32
    %c0_i32_0 = arith.constant 0 : i32
    %c0_i32_1 = arith.constant 0 : i32
    return %c0_i32, %c0_i32_0 : i32, i32
  }
  func.func @transform_10(%arg0: i32, %arg1: memref<2xi32, #tpu.memory_space<smem>>) -> (i32, i32) {
    %c0_i32 = arith.constant 0 : i32
    %c0_i32_0 = arith.constant 0 : i32
    %c0_i32_1 = arith.constant 0 : i32
    return %c0_i32, %c0_i32_0 : i32, i32
  }
  func.func @transform_11(%arg0: i32, %arg1: memref<2xi32, #tpu.memory_space<smem>>) -> (i32, i32) {
    %c0_i32 = arith.constant 0 : i32
    %c0_i32_0 = arith.constant 0 : i32
    %c0_i32_1 = arith.constant 0 : i32
    return %c0_i32, %c0_i32_0 : i32, i32
  }
  func.func @transform_12(%arg0: i32, %arg1: memref<2xi32, #tpu.memory_space<smem>>) -> (i32, i32) {
    %c0_i32 = arith.constant 0 : i32
    %c0_i32_0 = arith.constant 0 : i32
    %c0_i32_1 = arith.constant 0 : i32
    return %c0_i32, %c0_i32_0 : i32, i32
  }
  func.func @transform_13(%arg0: i32, %arg1: memref<2xi32, #tpu.memory_space<smem>>) -> (i32, i32) {
    %c0_i32 = arith.constant 0 : i32
    %c0_i32_0 = arith.constant 0 : i32
    %c0_i32_1 = arith.constant 0 : i32
    return %c0_i32, %c0_i32_0 : i32, i32
  }
  func.func @transform_14(%arg0: i32, %arg1: memref<2xi32, #tpu.memory_space<smem>>) -> (i32, i32) {
    %c0_i32 = arith.constant 0 : i32
    %c0_i32_0 = arith.constant 0 : i32
    %c0_i32_1 = arith.constant 0 : i32
    return %c0_i32, %c0_i32_0 : i32, i32
  }
  func.func @transform_15(%arg0: i32, %arg1: memref<2xi32, #tpu.memory_space<smem>>) -> (i32, i32) {
    %c0_i32 = arith.constant 0 : i32
    %c0_i32_0 = arith.constant 0 : i32
    %c0_i32_1 = arith.constant 0 : i32
    return %c0_i32, %c0_i32_0 : i32, i32
  }
  func.func @transform_16(%arg0: i32, %arg1: memref<2xi32, #tpu.memory_space<smem>>) -> (i32, i32) {
    %c0_i32 = arith.constant 0 : i32
    %c0_i32_0 = arith.constant 0 : i32
    %c0_i32_1 = arith.constant 0 : i32
    return %c0_i32, %c0_i32_0 : i32, i32
  }
  func.func @transform_17(%arg0: i32, %arg1: memref<2xi32, #tpu.memory_space<smem>>) -> (i32, i32) {
    %c0_i32 = arith.constant 0 : i32
    %c0_i32_0 = arith.constant 0 : i32
    %c0_i32_1 = arith.constant 0 : i32
    return %c0_i32, %c0_i32_0 : i32, i32
  }
  func.func @transform_18(%arg0: i32, %arg1: memref<2xi32, #tpu.memory_space<smem>>) -> (i32, i32) {
    %c0_i32 = arith.constant 0 : i32
    %c0_i32_0 = arith.constant 0 : i32
    %c0_i32_1 = arith.constant 0 : i32
    return %c0_i32, %c0_i32_0 : i32, i32
  }
  func.func @transform_19(%arg0: i32, %arg1: memref<2xi32, #tpu.memory_space<smem>>) -> (i32, i32) {
    %c0_i32 = arith.constant 0 : i32
    %c0_i32_0 = arith.constant 0 : i32
    %c0_i32_1 = arith.constant 0 : i32
    return %c0_i32, %c0_i32_0 : i32, i32
  }
  func.func @transform_20(%arg0: i32, %arg1: memref<2xi32, #tpu.memory_space<smem>>) -> (i32, i32) {
    %c0_i32 = arith.constant 0 : i32
    %c0_i32_0 = arith.constant 0 : i32
    %c0_i32_1 = arith.constant 0 : i32
    return %c0_i32, %c0_i32_0 : i32, i32
  }
  func.func @transform_21(%arg0: i32, %arg1: memref<2xi32, #tpu.memory_space<smem>>) -> (i32, i32) {
    %c0_i32 = arith.constant 0 : i32
    %c0_i32_0 = arith.constant 0 : i32
    %c0_i32_1 = arith.constant 0 : i32
    return %c0_i32, %c0_i32_0 : i32, i32
  }
  func.func @transform_22(%arg0: i32, %arg1: memref<2xi32, #tpu.memory_space<smem>>) -> (i32, i32) {
    %c0_i32 = arith.constant 0 : i32
    %c0_i32_0 = arith.constant 0 : i32
    %c0_i32_1 = arith.constant 0 : i32
    return %c0_i32, %c0_i32_0 : i32, i32
  }
  func.func @transform_23(%arg0: i32, %arg1: memref<2xi32, #tpu.memory_space<smem>>) -> (i32, i32) {
    %c0_i32 = arith.constant 0 : i32
    %c0_i32_0 = arith.constant 0 : i32
    %c0_i32_1 = arith.constant 0 : i32
    return %c0_i32, %c0_i32_0 : i32, i32
  }
  func.func @transform_24(%arg0: i32, %arg1: memref<2xi32, #tpu.memory_space<smem>>) -> (i32, i32, i32) {
    %c0_i32 = arith.constant 0 : i32
    %c0_i32_0 = arith.constant 0 : i32
    %c0_i32_1 = arith.constant 0 : i32
    return %arg0, %c0_i32, %c0_i32_0 : i32, i32, i32
  }
}

</mosaic_0001>

<bundles_post_ra>
// kernel: decoder_forward.1
= control target key start
LH: loop header
LB: loop body
LE: loop exit
PB: predicated region body
PF: predicated region fallthrough
CT: control target
= control target key end

     0   :  { %s7249_s0 = inlined_call_operand.vmem [shape: s32[2], index: 0, kind: input, shape index: {}]   ;;  %s7250_s1 = inlined_call_operand.vmem [shape: f32[2,64,3], index: 1, kind: input, shape index: {}]   ;;  %s7251_s2 = inlined_call_operand.vmem [shape: f32[2,32,3], index: 2, kind: input, shape index: {}]   ;;  %s7252_s3 = inlined_call_operand.vmem [shape: f32[2,16,3], index: 3, kind: input, shape index: {}]   ;;  %s7253_s4 = inlined_call_operand.vmem [shape: f32[2,8,3], index: 4, kind: input, shape index: {}]   ;;  %s7254_s5 = inlined_call_operand.vmem [shape: f32[2,16,64], index: 5, kind: input, shape index: {}]   ;;  %s7255_s6 = inlined_call_operand.vmem [shape: f32[2,32,32], index: 6, kind: input, shape index: {}]   ;;  %s7256_s7 = inlined_call_operand.vmem [shape: f32[2,64,16], index: 7, kind: input, shape index: {}]   ;;  %s7257_s8 = inlined_call_operand.vmem [shape: f32[2,128,8], index: 8, kind: input, shape index: {}]   ;;  %s7258_s9 = inlined_call_operand.vmem [shape: f32[16,16], index: 9, kind: input, shape index: {}]   ;;  %s7259_s10 = inlined_call_operand.vmem [shape: f32[64,64], index: 10, kind: input, shape index: {}]   ;;  %s7260_s11 = inlined_call_operand.vmem [shape: f32[64,128], index: 11, kind: input, shape index: {}]   ;;  %s7261_s12 = inlined_call_operand.vmem [shape: f32[64,1], index: 12, kind: input, shape index: {}]   ;;  %s7262_s13 = inlined_call_operand.vmem [shape: f32[64,64], index: 13, kind: input, shape index: {}]   ;;  %s7263_s14 = inlined_call_operand.vmem [shape: f32[64,1], index: 14, kind: input, shape index: {}]   ;;  %s7264_s15 = inlined_call_operand.vmem [shape: f32[32,32], index: 15, kind: input, shape index: {}]   ;;  %s7265_s16 = inlined_call_operand.vmem [shape: f32[32,64], index: 16, kind: input, shape index: {}]   ;;  %s7266_s17 = inlined_call_operand.vmem [shape: f32[32,1], index: 17, kind: input, shape index: {}]   ;;  %s7267_s18 = inlined_call_operand.vmem [shape: f32[32,32], index: 18, kind: input, shape index: {}]   ;;  %s7268_s19 = inlined_call_operand.vmem [shape: f32[32,1], index: 19, kind: input, shape index: {}]   ;;  %s7269_s20 = inlined_call_operand.vmem [shape: f32[16,16], index: 20, kind: input, shape index: {}]   ;;  %s7270_s21 = inlined_call_operand.vmem [shape: f32[16,32], index: 21, kind: input, shape index: {}]   ;;  %s7271_s22 = inlined_call_operand.vmem [shape: f32[16,1], index: 22, kind: input, shape index: {}]   ;;  %s7272_s23 = inlined_call_operand.vmem [shape: f32[16,16], index: 23, kind: input, shape index: {}]   ;;  %s7273_s24 = inlined_call_operand.vmem [shape: f32[16,1], index: 24, kind: input, shape index: {}]   ;;  %s7274_s25 = inlined_call_operand.hbm [shape: f32[2,16,64], index: 25, kind: output, shape index: {}]  }
   0x1   :  { %7331 = sst [smem:[#allocation39_spill]] %s7249_s0 }
   0x2   :  { %7332 = sst [smem:[#allocation40_spill]] %s7250_s1 }
   0x3   :  { %7333 = sst [smem:[#allocation41_spill]] %s7251_s2 }
   0x4   :  { %7334 = sst [smem:[#allocation42_spill]] %s7252_s3 }
   0x5   :  { %7335 = sst [smem:[#allocation43_spill]] %s7253_s4 }
   0x6   :  { %7336 = sst [smem:[#allocation44_spill]] %s7254_s5 }
   0x7   :  { %7337 = sst [smem:[#allocation45_spill]] %s7255_s6  ;;  %s7342_s6 = sld [smem:[#allocation39_spill]] }
   0x8   :  { %7338 = sst [smem:[#allocation46_spill]] %s7256_s7 }
   0x9   :  { %7339 = sst [smem:[#allocation47_spill]] %s7257_s8 }
   0xa   :  { %7340 = sst [smem:[#allocation48_spill]] %s7258_s9 }
   0xb   :  { %7341 = sst [smem:[#allocation49_spill]] %s7268_s19 }
   0xd   :  { %s30_s19 = sshll.u32 %s7342_s6, 4  ;;  %s31_s19 = int_to_ptr.vmem [resolvable:$true] %s30_s19 }
   0xe   :  { %s5359_s30 = scalar_lea.vmem %s31_s19, 16  ;;  %p5364_p1 = scmp.lt.s32.totalorder %s31_s19, %s31_s19 }
   0xf   :  { %p5360_p0 = scmp.ne.s32.totalorder %s31_s19, %s5359_s30  ;;  %p5365_p2 = scmp.lt.s32.totalorder %s5359_s30, %s5359_s30 }
  0x11   :  { %p5366_p3 = por %p5365_p2, %p5364_p1 }
  0x13   :  { %p5367_p4 = pnand %p5366_p3, %p5360_p0 }
  0x15   :  { %5370 = shalt.err (!%p5367_p4)  }
  0x16   :  { %s5437_s7 = smov [#allocation3]  }
  0x17   :  { %33 = dma.vmem_to_smem %s31_s19, 16, %s5437_s7, [#allocation2] }
  0x18   :  { %5415 = dma.done.wait [#allocation2], 16 }
  0x19   :  { %5416 = vsyncadd [#allocation2], 4294967280 }
  0x1a   :  { %35 = sfence }
  0x1b   :  { %36 = vsyncpa [#allocation5], 0 }
  0x1c   :  { %38 = vsyncpa [#allocation5 + $0x1], 0  ;;  %s5579_s3 = smov 0   ;;  %s5581_s26 = smov 0  }
  0x1d   :  { %s5583_s1 = smov 0   ;;  %s5585_s8 = smov 0  }
  0x1e LB: > { %7343 = sst [smem:[#allocation8_spill]] %s5431_s1  ;;  %s5600_s19 = sadd.s32 4294967295, %s5435_s8   ;;  %s5435_s8 = sphi %s5585_s8, %s7461_s8   ;;  %s5431_s1 = sphi %s5583_s1, %s7463_s1   ;;  %s5427_s26 = sphi %s5581_s26, %s7465_s26   ;;  %s5423_s3 = sphi %s5579_s3, %s7464_s3  }
  0x1f   : > { %s4258_s27 = sadd.s32 4294967294, %s5435_s8   ;;  %s5604_s4 = sadd.s32 1, %s5435_s8  }
  0x20   : > { %7344 = sst [smem:[#allocation9_spill]] %s5604_s4  ;;  %s595_s28 = sadd.s32 1, %s5431_s1 }
  0x21   : > { %s592_s9 = ssub.s32 %s5435_s8, %s5604_s4  ;;  %p605_p5 = scmp.ne.s32.totalorder %s5431_s1, %s5427_s26 }
  0x22   : > { %p593_p6 = scmp.eq.s32.totalorder %s592_s9, 0  ;;  %p606_p7 = scmp.eq.s32.totalorder %s5600_s19, 1 }
  0x23   : > { %p611_p8 = scmp.ne.s32.totalorder %s5427_s26, %s5423_s3  ;;  %p612_p9 = scmp.eq.s32.totalorder %s4258_s27, 1 }
  0x24   : > { %s5615_s5 = scalar_select %p593_p6, %s5431_s1, %s595_s28  }
  0x25   : > { %p5617_p10 = por %p606_p7, %p605_p5  ;;  %p5621_p11 = por %p612_p9, %p611_p8 }
  0x26   : > { %7345 = sst [smem:[#allocation10_spill]] %s5615_s5  ;;  %p4261_p12 = scmp.ge.s32.totalorder %s5435_s8, 1 }
  0x27   : > { %s7347_s29 = scalar_select %p5621_p11, 1, 0 }
  0x28   : > { %p741_p13 = scmp.lt.s32.totalorder %s5435_s8, 3 }
  0x29   : > { %7348 = sst [smem:[#allocation11_spill]] %s7347_s29 }
  0x2a   : > { %p742_p0 = pnand %p4261_p12, %p741_p13 }
  0x2c   : > { %745 = sbr.rel (%p742_p0) target bundleno = 3929 (0xf59), region = 116 }
  0x33   : > { %p841_p1 = scmp.lt.s32.totalorder %s5600_s19, 1  ;;  %vm7285_vm0 = vcmask 23552   ;;  %s7349_s27 = sld [smem:[#allocation43_spill]]  ;;  %v7290_v5 = vmov 0.0   ;;  %vm7282_vm1 = vmmov 0   ;;  %v7287_v11 = vmov 1.0  }
  0x34   : > { %s7350_s4 = sld [smem:[#allocation42_spill]]  ;;  %v7286_v12 = vlaneseq  ;;  %vm1147_vm2 = vcmask 64512   ;;  %s7353_s7 = sld [smem:[#allocation46_spill]] }
  0x35   : > { %s5629_s2 = scalar_select %p841_p1, %s5600_s19, 1 }
  0x36   : > { %v1140_v14 = vshrl.u32 %v7286_v12, 7 }
  0x37   : > { %s4269_s6 = sshll.u32 %s5629_s2, 3  ;;  %s7281_s9 = sshll.u32 %s5629_s2, 4 }
  0x38   : > { %v5664_v18 = vsub.s32 0, %v1140_v14  ;;  %s4438_s1 = sshll.u32 %s5629_s2, 7  ;;  %s7361_s30 = sshll.u32 %s5629_s2, 5 }
  0x39   : > { %s859_s28 = scalar_lea.vmem %s7349_s27, %s4269_s6 }
  0x3a   : > { %v894_v0 = vld [vmem:[%s859_s28] sm:$0xff]  ;;  %s855_s29 = scalar_lea.vmem %s7350_s4, %s7281_s9  ;;  %7351 = vst [vmem:[#allocation12_spill] sm:$0xff] %v5664_v18  ;;  %s7283_s9 = sshll.u32 %s5629_s2, 6 }
  0x3b   : > { %4611 = vmatprep.subr.msk.mxu0 %vm7285_vm0, %v894_v0  ;;  %v1058_v1 = vmul.f32 %v894_v0, %v894_v0  ;;  %v892_v2 = vld [vmem:[%s855_s29] sm:$0xff]  ;;  %v893_v3 = vld [vmem:[%s855_s29 + $0x8] sm:$0xff]  ;;  %s7352_s29 = sld [smem:[#allocation47_spill]]  ;;  %s874_s27 = scalar_lea.vmem %s7353_s7, %s7283_s9 }
  0x3c   : > { %4612 = vmatpush3.xpose.msk.msra.mxu0 %vm7285_vm0, %v894_v0  ;;  %4613 = vmatprep.mubr.msk.f32.mxu0 %vm7285_vm0, %v892_v2  ;;  %v5644_v4 = vpack.c.bf16 %v893_v3, %v892_v2  ;;  %v5647_v6 = vmul.f32 %v892_v2, %v892_v2  ;;  %v5649_v7 = vmul.f32 %v893_v3, %v893_v3  ;;  %s7354_s28 = sld [smem:[#allocation41_spill]]  ;;  %s7363_s7 = sshll.u32 %s5629_s2, 6 }
  0x3d   : > { %4616 = vmatprep.subr.mxu0 %v7290_v5  ;;  %s7381_s9 = sshll.u32 %s5629_s2, 4 }
  0x3e   : > { %v1052_v8 = vsel %vm7285_vm0, %v5647_v6, 0.0  ;;  %v4991_v9 = vpack.c.bf16 %v5649_v7, %v5647_v6  ;;  %v1055_v10 = vsel %vm7285_vm0, %v5649_v7, 0.0 }
  0x3f   : > { %4614 = vmatmul.mubr.msk.f32.vlgmr.msra.gmra.mrb[0].mxu0 %vm7285_vm0, %v893_v3  ;;  %1053 = vadd.xlane.f32.xlu0 %v1052_v8 }
  0x40   : > { %4617 = vmatpush3.xpose.msk.msra.mxu0 %vm7285_vm0, %v1058_v1  ;;  %4618 = vmatprep.mubr.msk.f32.mxu0 %vm7282_vm1, %v7290_v5 }
  0x41   : > { %s5727_s6 = scalar_lea.vmem %s7352_s29, %s4438_s1  ;;  %s2902_s29 = sld [smem:[#allocation3 + %s5600_s19]] }
  0x42   : > { %v909_v44 = vld [vmem:[%s5727_s6] sm:$0xff] }
  0x43   : > { %4619 = vmatmul.mubr.msk.f32.vlgmr.msra.gmra.mrb[2].mxu0 %vm7285_vm0, %v7287_v11  ;;  %1056 = vadd.xlane.f32.xlu0 %v1055_v10 }
  0x44   : > { %4625 = vmatprep.mubr.msk.f32.mxu1 %vm1147_vm2, %v909_v44 }
  0xcc   : > { %v1054_v13 = vpop.xlane.xlu0 %1053 }
  0xd0   : > { %v1057_v20 = vpop.xlane.xlu0 %1056 }
 0x112   : > { %v4615_v15 = vpop.f32.mrb[0].mxu0 }
 0x113   : > { %v1136_v16 = vmul.f32 2.0, %v4615_v15  ;;  %v1041_v17 = vpop.f32.mrb[1].mxu0 }
 0x114   : > { %v1135_v19 = vmul.f32 2.0, %v1041_v17 }
 0x115   : > { %v1138_v23 = vsub.f32 %v1057_v20, %v1136_v16 }
 0x116   : > { %v1137_v21 = vsub.f32 %v1054_v13, %v1135_v19  ;;  %v1131_v22 = vpop.f32.mrb[2].mxu0 }
 0x117   : > { %v1142_v24 = vrot.slane %v1131_v22, %v5664_v18  ;;  %v4620_v25 = vpop.f32.mrb[3].mxu0 }
 0x119   : > { %v1143_v26 = vadd.f32 %v1142_v24, %v1137_v21  ;;  %v1144_v27 = vadd.f32 %v1142_v24, %v1138_v23 }
 0x11b   : > { %v5667_v28 = vmax.f32 %v1143_v26, 0.0  ;;  %v5669_v29 = vmax.f32 %v1144_v27, 0.0 }
 0x11d   : > { %v1148_v30 = vsel %vm1147_vm2, %v5667_v28, inf  ;;  %v1151_v31 = vsel %vm1147_vm2, %v5669_v29, inf }
 0x11e   : > { %1149 = vmin.xlane.f32.xlu1 %v1148_v30 }
 0x122   : > { %1152 = vmin.xlane.f32.xlu1 %v1151_v31 }
 0x1ab   : > { %v5675_v32 = vpop.xlane.xlu1 %1149 }
 0x1ac   : > { %vm1154_vm3 = vcmp.le.f32.partialorder %v5667_v28, %v5675_v32  ;;  %vm1162_vm8 = vcmp.eq.f32.partialorder %v5675_v32, inf  ;;  %v1165_v58 = vand.u32 2147483648, %v5675_v32  ;;  %vm1164_vm11 = vcmp.eq.f32.partialorder %v5675_v32, 0.0 }
 0x1ad   : > { %v5683_v33 = vsel %vm1154_vm3, 1e+30, %v5667_v28 }
 0x1ae   : > { %v1182_v34 = vsel %vm1147_vm2, %v5683_v33, inf }
 0x1af   : > { %v5687_v35 = vpop.xlane.xlu1 %1152  ;;  %1183 = vmin.xlane.f32.xlu0 %v1182_v34 }
 0x1b0   : > { %vm1155_vm4 = vcmp.le.f32.partialorder %v5669_v29, %v5687_v35  ;;  %vm1169_vm12 = vcmp.eq.f32.partialorder %v5687_v35, inf  ;;  %v1172_v3 = vand.u32 2147483648, %v5687_v35  ;;  %vm1171_vm14 = vcmp.eq.f32.partialorder %v5687_v35, 0.0 }
 0x1b1   : > { %v5695_v36 = vsel %vm1155_vm4, 1e+30, %v5669_v29 }
 0x1b2   : > { %v1185_v37 = vsel %vm1147_vm2, %v5695_v36, inf }
 0x1b3   : > { %1186 = vmin.xlane.f32.xlu1 %v1185_v37 }
 0x23c   : > { %v5699_v38 = vpop.xlane.xlu0 %1183 }
 0x23d   : > { %vm1188_vm5 = vcmp.le.f32.partialorder %v5683_v33, %v5699_v38  ;;  %5163 = vrsqrt.f32 %v5699_v38  ;;  %vm1196_vm7 = vcmp.eq.f32.partialorder %v5699_v38, inf  ;;  %v1199_v55 = vand.u32 2147483648, %v5699_v38 }
 0x23e   : > { %v5707_v39 = vsel %vm1188_vm5, 1e+30, %v5683_v33  ;;  %5165 = vrsqrt.f32 %v5675_v32  ;;  %vm1198_vm9 = vcmp.eq.f32.partialorder %v5699_v38, 0.0 }
 0x23f   : > { %v1216_v40 = vsel %vm1147_vm2, %v5707_v39, inf }
 0x240   : > { %v5711_v41 = vpop.xlane.xlu1 %1186  ;;  %1217 = vmin.xlane.f32.xlu0 %v1216_v40 }
 0x241   : > { %vm1189_vm6 = vcmp.le.f32.partialorder %v5695_v36, %v5711_v41  ;;  %5167 = vrsqrt.f32 %v5711_v41  ;;  %vm1203_vm10 = vcmp.eq.f32.partialorder %v5711_v41, inf  ;;  %v1206_v61 = vand.u32 2147483648, %v5711_v41 }
 0x242   : > { %v5719_v42 = vsel %vm1189_vm6, 1e+30, %v5695_v36  ;;  %5169 = vrsqrt.f32 %v5687_v35  ;;  %vm1205_vm13 = vcmp.eq.f32.partialorder %v5711_v41, 0.0  ;;  %v4286_v33 = vsel %vm1189_vm6, 1.0, %v7290_v5  ;;  %v911_v36 = vld [vmem:[%s5727_s6 + $0x10] sm:$0xff] }
 0x243   : > { %v1219_v43 = vsel %vm1147_vm2, %v5719_v42, inf }
 0x244   : > { %1220 = vmin.xlane.f32.xlu1 %v1219_v43 }
 0x247   : > { %v5164_v45 = vpop.eup %5163 }
 0x248   : > { %v5166_v46 = vpop.eup %5165  ;;  %v1195_v48 = vmul.f32 %v5164_v45, %v5699_v38 }
 0x249   : > { %v1161_v50 = vmul.f32 %v5166_v46, %v5675_v32 }
 0x24a   : > { %v1197_v53 = vsel %vm1196_vm7, %v5699_v38, %v1195_v48 }
 0x24b   : > { %v5168_v47 = vpop.eup %5167  ;;  %v1163_v56 = vsel %vm1162_vm8, %v5675_v32, %v1161_v50  ;;  %v1200_v59 = vsel %vm1198_vm9, %v1199_v55, %v1197_v53  ;;  %v4285_v53 = vsel %vm1188_vm5, 1.0, %v7290_v5  ;;  %v4284_v32 = vsel %vm1155_vm4, 1.0, %v7290_v5  ;;  %vm5959_vm4 = vmpackc.low %vm7285_vm0, %vm7285_vm0 }
 0x24c   : > { %v5170_v51 = vpop.eup %5169  ;;  %v1202_v52 = vmul.f32 %v5168_v47, %v5711_v41  ;;  %v1166_v62 = vsel %vm1164_vm11, %v1165_v58, %v1163_v56  ;;  %v1208_v0 = vadd.f32 1e-08, %v1200_v59  ;;  %vm2168_vm5 = vcmask 130048  }
 0x24d   : > { %v1168_v57 = vmul.f32 %v5170_v51, %v5687_v35  ;;  %v1174_v8 = vadd.f32 1e-08, %v1166_v62 }
 0x24e   : > { %v1204_v60 = vsel %vm1203_vm10, %v5711_v41, %v1202_v52  ;;  %v4283_v52 = vsel %vm1154_vm3, 1.0, %v7290_v5  ;;  %vm4915_vm3 = vmpackc.low %vm1147_vm2, %vm1147_vm2  ;;  %v912_v41 = vld [vmem:[%s5727_s6 + $0x18] sm:$0xff] }
 0x24f   : > { %v1170_v63 = vsel %vm1169_vm12, %v5687_v35, %v1168_v57  ;;  %v1207_v1 = vsel %vm1205_vm13, %v1206_v61, %v1204_v60  ;;  %v910_v35 = vld [vmem:[%s5727_s6 + $0x8] sm:$0xff] }
 0x250   : > { %v1173_v13 = vsel %vm1171_vm14, %v1172_v3, %v1170_v63  ;;  %v1209_v14 = vadd.f32 1e-08, %v1207_v1  ;;  %v913_v1 = vld [vmem:[%s5727_s6 + $0x20] sm:$0xff]  ;;  %v915_v3 = vld [vmem:[%s5727_s6 + $0x30] sm:$0xff] }
 0x251   : > { %v1175_v20 = vadd.f32 1e-08, %v1173_v13  ;;  %v918_v13 = vld [vmem:[%s5727_s6 + $0x48] sm:$0xff] }
 0x2cd   : > { %v5736_v49 = vpop.xlane.xlu0 %1217 }
 0x2ce   : > { %5171 = vrsqrt.f32 %v5736_v49  ;;  %vm1230_vm15 = vcmp.eq.f32.partialorder %v5736_v49, inf  ;;  %v1233_v15 = vand.u32 2147483648, %v5736_v49  ;;  %vm1232_vm7 = vcmp.eq.f32.partialorder %v5736_v49, 0.0 }
 0x2cf   : > { %vm1222_vm10 = vcmp.le.f32.partialorder %v5707_v39, %v5736_v49 }
 0x2d0   : > { %v4287_v55 = vsel %vm1222_vm10, 1.0, %v7290_v5 }
 0x2d1   : > { %v5743_v54 = vpop.xlane.xlu1 %1220 }
 0x2d2   : > { %5173 = vrsqrt.f32 %v5743_v54  ;;  %vm1237_vm8 = vcmp.eq.f32.partialorder %v5743_v54, inf  ;;  %v1240_v23 = vand.u32 2147483648, %v5743_v54  ;;  %vm1239_vm9 = vcmp.eq.f32.partialorder %v5743_v54, 0.0 }
 0x2d3   : > { %5175 = vrcp.f32 %v1208_v0  ;;  %vm1223_vm11 = vcmp.le.f32.partialorder %v5719_v42, %v5743_v54 }
 0x2d4   : > { %5177 = vrcp.f32 %v1174_v8  ;;  %v4288_v61 = vsel %vm1223_vm11, 1.0, %v7290_v5  ;;  %v916_v8 = vld [vmem:[%s5727_s6 + $0x38] sm:$0xff] }
 0x2d5   : > { %5179 = vrcp.f32 %v1209_v14  ;;  %v919_v14 = vld [vmem:[%s5727_s6 + $0x50] sm:$0xff] }
 0x2d8   : > { %v5172_v2 = vpop.eup %5171 }
 0x2d9   : > { %v1229_v10 = vmul.f32 %v5172_v2, %v5736_v49  ;;  %v914_v2 = vld [vmem:[%s5727_s6 + $0x28] sm:$0xff] }
 0x2db   : > { %v1231_v16 = vsel %vm1230_vm15, %v5736_v49, %v1229_v10  ;;  %v917_v10 = vld [vmem:[%s5727_s6 + $0x40] sm:$0xff] }
 0x2dc   : > { %v5174_v17 = vpop.eup %5173  ;;  %v1234_v19 = vsel %vm1232_vm7, %v1233_v15, %v1231_v16  ;;  %v920_v15 = vld [vmem:[%s5727_s6 + $0x58] sm:$0xff]  ;;  %v921_v16 = vld [vmem:[%s5727_s6 + $0x60] sm:$0xff] }
 0x2dd   : > { %v1242_v21 = vadd.f32 1e-08, %v1234_v19  ;;  %v1236_v22 = vmul.f32 %v5174_v17, %v5743_v54  ;;  %v5176_v27 = vpop.eup %5175  ;;  %v922_v17 = vld [vmem:[%s5727_s6 + $0x68] sm:$0xff]  ;;  %v923_v19 = vld [vmem:[%s5727_s6 + $0x70] sm:$0xff] }
 0x2de   : > { %v5178_v30 = vpop.eup %5177 }
 0x2df   : > { %v1238_v24 = vsel %vm1237_vm8, %v5743_v54, %v1236_v22  ;;  %5181 = vrcp.f32 %v1242_v21  ;;  %v5180_v31 = vpop.eup %5179  ;;  %v1248_v34 = vadd.f32 %v5178_v30, %v5176_v27  ;;  %v933_v21 = vld [vmem:[%s7260_s11] sm:$0xff]  ;;  %v942_v22 = vld [vmem:[%s7261_s12 + $0x8] sm:$0xff] }
 0x2e0   : > { %v1241_v25 = vsel %vm1239_vm9, %v1240_v23, %v1238_v24  ;;  %5183 = vrcp.f32 %v1175_v20  ;;  %v924_v20 = vld [vmem:[%s5727_s6 + $0x78] sm:$0xff]  ;;  %v5441_v23 = vmov 0   ;;  %v941_v24 = vld [vmem:[%s7261_s12] sm:$0xff]  ;;  %s7382_s6 = sld [smem:[#allocation44_spill]] }
 0x2e1   : > { %v1243_v26 = vadd.f32 1e-08, %v1241_v25  ;;  %5162 = vset.pattern.permute.xlu1 %v5441_v23  ;;  %5161 = vset.pattern.permute.xlu0 %v5441_v23  ;;  %v943_v25 = vld [vmem:[%s7261_s12 + $0x10] sm:$0xff]  ;;  %v930_v23 = vld [vmem:[%s7259_s10 + $0x28] sm:$0xff] }
 0x2e2   : > { %1713 = vperm.xlu1 %5162, %v942_v22   ;;  %1708 = vperm.xlu0 %5161, %v941_v24   ;;  %v929_v22 = vld [vmem:[%s7259_s10 + $0x20] sm:$0xff]  ;;  %v931_v24 = vld [vmem:[%s7259_s10 + $0x30] sm:$0xff] }
 0x2e3   : > { %5185 = vrcp.f32 %v1243_v26  ;;  %v944_v26 = vld [vmem:[%s7261_s12 + $0x18] sm:$0xff] }
 0x2e6   : > { %1718 = vperm.xlu1 %5162, %v943_v25   ;;  %v932_v25 = vld [vmem:[%s7259_s10 + $0x38] sm:$0xff] }
 0x2e9   : > { %v5182_v37 = vpop.eup %5181 }
 0x2ea   : > { %v1250_v40 = vadd.f32 %v5182_v37, %v1248_v34  ;;  %v5184_v43 = vpop.eup %5183  ;;  %1723 = vperm.xlu1 %5162, %v944_v26   ;;  %v948_v34 = vld [vmem:[%s7261_s12 + $0x38] sm:$0xff]  ;;  %v949_v26 = vld [vmem:[%s7262_s13] sm:$0xff] }
 0x2eb   : > { %v1249_v44 = vadd.f32 %v5184_v43, %v5180_v31 }
 0x2ec   : > { %5187 = vrcp.f32 %v1250_v40 }
 0x2ed   : > { %v5186_v45 = vpop.eup %5185 }
 0x2ee   : > { %v1251_v46 = vadd.f32 %v5186_v45, %v1249_v44 }
 0x2f0   : > { %5189 = vrcp.f32 %v1251_v46 }
 0x2f6   : > { %v5188_v47 = vpop.eup %5187 }
 0x2f7   : > { %v1256_v48 = vmul.f32 %v5188_v47, %v5178_v30  ;;  %v1260_v50 = vmul.f32 %v5188_v47, %v5176_v27  ;;  %v1266_v51 = vmul.f32 %v5188_v47, %v5182_v37  ;;  %v945_v27 = vld [vmem:[%s7261_s12 + $0x20] sm:$0xff]  ;;  %v946_v30 = vld [vmem:[%s7261_s12 + $0x28] sm:$0xff] }
 0x2f8   : > { %1728 = vperm.xlu1 %5162, %v945_v27  }
 0x2f9   : > { %v1258_v56 = vmul.f32 %v4283_v52, %v1256_v48  ;;  %v1262_v57 = vmul.f32 %v4285_v53, %v1260_v50  ;;  %v1268_v39 = vmul.f32 %v4287_v55, %v1266_v51 }
 0x2fa   : > { %v5190_v58 = vpop.eup %5189 }
 0x2fb   : > { %v1257_v49 = vmul.f32 %v5190_v58, %v5184_v43  ;;  %v1261_v59 = vmul.f32 %v5190_v58, %v5180_v31  ;;  %v1264_v60 = vadd.f32 %v1262_v57, %v1258_v56  ;;  %v1267_v28 = vmul.f32 %v5190_v58, %v5186_v45  ;;  %v947_v31 = vld [vmem:[%s7261_s12 + $0x30] sm:$0xff] }
 0x2fc   : > { %1733 = vperm.xlu1 %5162, %v946_v30  }
 0x2fd   : > { %v1259_v38 = vmul.f32 %v4284_v32, %v1257_v49  ;;  %v1263_v42 = vmul.f32 %v4286_v33, %v1261_v59  ;;  %v1270_v54 = vadd.f32 %v1268_v39, %v1264_v60  ;;  %v1269_v63 = vmul.f32 %v4288_v61, %v1267_v28  ;;  %v901_v32 = vld [vmem:[%s874_s27] sm:$0xff]  ;;  %v902_v33 = vld [vmem:[%s874_s27 + $0x8] sm:$0xff] }
 0x2fe   : > { %v4952_v61 = vpack.c.bf16 %v902_v33, %v901_v32 }
 0x2ff   : > { %v1265_v62 = vadd.f32 %v1263_v42, %v1259_v38 }
 0x300   : > { %1738 = vperm.xlu1 %5162, %v947_v31  }
 0x301   : > { %v1271_v0 = vadd.f32 %v1269_v63, %v1265_v62  ;;  %v903_v62 = vld [vmem:[%s874_s27 + $0x10] sm:$0xff]  ;;  %v904_v63 = vld [vmem:[%s874_s27 + $0x18] sm:$0xff] }
 0x303   : > { %v4914_v29 = vpack.c.bf16 %v1271_v0, %v1270_v54  ;;  %v934_v0 = vld [vmem:[%s7260_s11 + $0x8] sm:$0xff] }
 0x304   : > { %1743 = vperm.xlu1 %5162, %v948_v34  }
 0x305   : > { %4916 = vmatprep.subr.msk.bf16.mxu1 %vm4915_vm3, %v4914_v29 }
 0x306   : > { %4919 = vmatpush3.bf16.xpose.msk.msra.mxu1 %vm4915_vm3, %v4914_v29  ;;  %v935_v29 = vld [vmem:[%s7260_s11 + $0x10] sm:$0xff] }
 0x30d   : > { %4626 = vmatmul.mubr.msk.f32.vlgmr.msra.gmra.mrb[0].mxu1 %vm1147_vm2, %v910_v35  ;;  %v4956_v35 = vpack.c.bf16 %v904_v63, %v903_v62 }
 0x30e   : > { %4628 = vmatprep.mubr.msk.f32.mxu1 %vm1147_vm2, %v911_v36  ;;  %v905_v36 = vld [vmem:[%s874_s27 + $0x20] sm:$0xff] }
 0x311   : > { %4629 = vmatmul.mubr.msk.f32.gmra.mrb[2].mxu1 %vm1147_vm2, %v912_v41  ;;  %v906_v41 = vld [vmem:[%s874_s27 + $0x28] sm:$0xff] }
 0x312   : > { %4631 = vmatprep.mubr.msk.f32.mxu1 %vm1147_vm2, %v913_v1  ;;  %v936_v1 = vld [vmem:[%s7260_s11 + $0x18] sm:$0xff] }
 0x315   : > { %4632 = vmatmul.mubr.msk.f32.gmra.mrb[4].mxu1 %vm1147_vm2, %v914_v2  ;;  %v937_v2 = vld [vmem:[%s7260_s11 + $0x20] sm:$0xff] }
 0x316   : > { %4634 = vmatprep.mubr.msk.f32.mxu1 %vm1147_vm2, %v915_v3  ;;  %v4960_v3 = vpack.c.bf16 %v906_v41, %v905_v36 }
 0x319   : > { %4635 = vmatmul.mubr.msk.f32.gmra.mrb[6].mxu1 %vm1147_vm2, %v916_v8  ;;  %v907_v8 = vld [vmem:[%s874_s27 + $0x30] sm:$0xff] }
 0x31a   : > { %4637 = vmatprep.mubr.msk.f32.mxu1 %vm1147_vm2, %v917_v10  ;;  %v908_v10 = vld [vmem:[%s874_s27 + $0x38] sm:$0xff]  ;;  %s7284_s27 = sshll.u32 %s5629_s2, 5  ;;  %s7419_s2 = sld [smem:[#allocation48_spill]] }
 0x31b   : > { %s850_s1 = scalar_lea.vmem %s7354_s28, %s7284_s27  ;;  %s838_s28 = sand.u32 1, %s5427_s26  }
 0x31c   : > { %v5921_v27 = vld [vmem:[%s850_s1] sm:$0xff]  ;;  %v5923_v30 = vld [vmem:[%s850_s1 + $0x8] sm:$0xff]  ;;  %v5925_v31 = vld [vmem:[%s850_s1 + $0x10] sm:$0xff] }
 0x31d   : > { %4638 = vmatmul.mubr.msk.f32.gmra.mrb[8].mxu1 %vm1147_vm2, %v918_v13  ;;  %v938_v13 = vld [vmem:[%s7260_s11 + $0x28] sm:$0xff]  ;;  %v5927_v34 = vld [vmem:[%s850_s1 + $0x18] sm:$0xff]  ;;  %s7362_s1 = sld [smem:[#allocation45_spill]] }
 0x31e   : > { %4640 = vmatprep.mubr.msk.f32.mxu1 %vm1147_vm2, %v919_v14  ;;  %v939_v14 = vld [vmem:[%s7260_s11 + $0x30] sm:$0xff] }
 0x321   : > { %4641 = vmatmul.mubr.msk.f32.gmra.mrb[10].mxu1 %vm1147_vm2, %v920_v15  ;;  %v4964_v15 = vpack.c.bf16 %v908_v10, %v907_v8 }
 0x322   : > { %4643 = vmatprep.mubr.msk.f32.mxu1 %vm1147_vm2, %v921_v16  ;;  %v940_v16 = vld [vmem:[%s7260_s11 + $0x38] sm:$0xff] }
 0x323   : > { %s869_s4 = scalar_lea.vmem %s7362_s1, %s7361_s30  ;;  %s864_s30 = scalar_lea.vmem %s7382_s6, %s7381_s9 }
 0x324   : > { %s4262_s1 = sshll.u32 %s838_s28, 4  ;;  %s4439_s9 = sshll.u32 %s5600_s19, 8 }
 0x325   : > { %4644 = vmatmul.mubr.msk.f32.gmra.mrb[12].mxu1 %vm1147_vm2, %v922_v17  ;;  %v925_v17 = vld [vmem:[%s7259_s10] sm:$0xff]  ;;  %s7204_s6 = scalar_lea.hbm %s7274_s25, %s4439_s9  ;;  %s7208_s19 = scalar_lea.sflag [#allocation5], %s838_s28 }
 0x326   : > { %4646 = vmatprep.mubr.msk.f32.mxu1 %vm1147_vm2, %v923_v19  ;;  %v926_v19 = vld [vmem:[%s7259_s10 + $0x8] sm:$0xff] }
 0x329   : > { %4647 = vmatmul.mubr.msk.f32.gmra.mrb[14].mxu1 %vm1147_vm2, %v924_v20  ;;  %vm7294_vm2 = vcmask 523264   ;;  %v927_v20 = vld [vmem:[%s7259_s10 + $0x10] sm:$0xff] }
 0x32a   : > { %4681 = vmatprep.mubr.f32.mxu1 %v933_v21  ;;  %v928_v21 = vld [vmem:[%s7259_s10 + $0x18] sm:$0xff]  ;;  %4737 = vmatprep.mubr.msk.f32.mxu0 %vm7294_vm2, %v949_v26  ;;  %v954_v26 = vld [vmem:[%s7262_s13 + $0x28] sm:$0xff] }
 0x3e0   : > { %v4627_v37 = vpop.f32.mrb[0].mxu1 }
 0x3e1   : > { %v1392_v40 = vpop.f32.mrb[1].mxu1 }
 0x3e2   : > { %v4920_v43 = vpack.c.bf16 %v4627_v37, %v1392_v40  ;;  %v5931_v37 = vmul.f32 %v5923_v30, %v5923_v30  ;;  %v5935_v40 = vmul.f32 %v5921_v27, %v5921_v27 }
 0x3e4   : > { %v4630_v44 = vpop.f32.mrb[2].mxu1  ;;  %4921 = vmatprep.subr.bf16.mxu1 %v4920_v43 }
 0x3e5   : > { %v1402_v45 = vpop.f32.mrb[3].mxu1  ;;  %4923 = vmatpush3.bf16.msra.mxu1 %v4920_v43  ;;  %v5939_v43 = vmul.f32 %v5927_v34, %v5927_v34 }
 0x3e6   : > { %v4924_v46 = vpack.c.bf16 %v4630_v44, %v1402_v45  ;;  %v5943_v44 = vmul.f32 %v5925_v31, %v5925_v31  ;;  %v2063_v45 = vsel %vm7285_vm0, %v5931_v37, 0.0 }
 0x3e7   : > { %2064 = vadd.xlane.f32.xlu0 %v2063_v45  ;;  %v955_v45 = vld [vmem:[%s7262_s13 + $0x30] sm:$0xff] }
 0x3e8   : > { %v4633_v47 = vpop.f32.mrb[4].mxu1  ;;  %4925 = vmatprep.subr.bf16.mxu1 %v4924_v46  ;;  %7355 = vst [vmem:[#allocation13_spill] sm:$0xff] %v5943_v44 }
 0x3e9   : > { %v1412_v48 = vpop.f32.mrb[5].mxu1  ;;  %4927 = vmatpush3.bf16.msra.mxu1 %v4924_v46  ;;  %v2060_v46 = vsel %vm7285_vm0, %v5935_v40, 0.0 }
 0x3ea   : > { %v4928_v50 = vpack.c.bf16 %v4633_v47, %v1412_v48  ;;  %2061 = vadd.xlane.f32.xlu1 %v2060_v46  ;;  %v7288_v46 = vmov 0.0|0.0  }
 0x3ec   : > { %v4636_v51 = vpop.f32.mrb[6].mxu1  ;;  %4929 = vmatprep.subr.bf16.mxu1 %v4928_v50 }
 0x3ed   : > { %v1422_v52 = vpop.f32.mrb[7].mxu1  ;;  %4931 = vmatpush3.bf16.msra.mxu1 %v4928_v50  ;;  %v2069_v50 = vsel %vm7285_vm0, %v5939_v43, 0.0 }
 0x3ee   : > { %v4932_v53 = vpack.c.bf16 %v4636_v51, %v1422_v52  ;;  %v2066_v51 = vsel %vm7285_vm0, %v5943_v44, 0.0  ;;  %2070 = vadd.xlane.f32.xlu1 %v2069_v50  ;;  %v1714_v52 = vpop.permute.xlu1 %1713  ;;  %v956_v50 = vld [vmem:[%s7262_s13 + $0x38] sm:$0xff] }
 0x3ef   : > { %2067 = vadd.xlane.f32.xlu0 %v2066_v51 }
 0x3f0   : > { %v4639_v55 = vpop.f32.mrb[8].mxu1  ;;  %4933 = vmatprep.subr.bf16.mxu1 %v4932_v53 }
 0x3f1   : > { %v1432_v56 = vpop.f32.mrb[9].mxu1  ;;  %4935 = vmatpush3.bf16.msra.mxu1 %v4932_v53 }
 0x3f2   : > { %v4936_v57 = vpack.c.bf16 %v4639_v55, %v1432_v56  ;;  %v1719_v53 = vpop.permute.xlu1 %1718 }
 0x3f4   : > { %v4642_v58 = vpop.f32.mrb[10].mxu1  ;;  %4937 = vmatprep.subr.bf16.mxu1 %v4936_v57 }
 0x3f5   : > { %v1442_v39 = vpop.f32.mrb[11].mxu1  ;;  %4939 = vmatpush3.bf16.msra.mxu1 %v4936_v57  ;;  %v1709_v57 = vpop.permute.xlu0 %1708 }
 0x3f6   : > { %v4940_v49 = vpack.c.bf16 %v4642_v58, %v1442_v39  ;;  %v1724_v55 = vpop.permute.xlu1 %1723 }
 0x3f8   : > { %v4645_v59 = vpop.f32.mrb[12].mxu1  ;;  %4941 = vmatprep.subr.bf16.mxu1 %v4940_v49 }
 0x3f9   : > { %v1452_v60 = vpop.f32.mrb[13].mxu1  ;;  %4943 = vmatpush3.bf16.msra.mxu1 %v4940_v49 }
 0x3fa   : > { %v4944_v28 = vpack.c.bf16 %v4645_v59, %v1452_v60  ;;  %v1729_v56 = vpop.permute.xlu1 %1728 }
 0x3fc   : > { %v4648_v38 = vpop.f32.mrb[14].mxu1  ;;  %4945 = vmatprep.subr.bf16.mxu1 %v4944_v28 }
 0x3fd   : > { %v1462_v42 = vpop.f32.mrb[15].mxu1  ;;  %4947 = vmatpush3.bf16.msra.mxu1 %v4944_v28 }
 0x3fe   : > { %v4948_v54 = vpack.c.bf16 %v4648_v38, %v1462_v42  ;;  %v1734_v58 = vpop.permute.xlu1 %1733 }
 0x400   : > { %4949 = vmatprep.subr.bf16.mxu1 %v4948_v54 }
 0x401   : > { %4951 = vmatpush3.bf16.msra.mxu1 %v4948_v54 }
 0x402   : > { %4953 = vmatprep.subr.bf16.mxu1 %v4952_v61  ;;  %v1739_v54 = vpop.permute.xlu1 %1738 }
 0x404   : > { %4682 = vmatmul.mubr.f32.vlgmr.msra.gmra.mrb[16].mxu1 %v934_v0 }
 0x405   : > { %4955 = vmatpush3.bf16.msra.mxu1 %v4952_v61  ;;  %4684 = vmatprep.mubr.f32.mxu1 %v935_v29 }
 0x406   : > { %4957 = vmatprep.subr.bf16.mxu1 %v4956_v35 }
 0x408   : > { %4685 = vmatmul.mubr.f32.gmra.mrb[18].mxu1 %v936_v1 }
 0x409   : > { %4959 = vmatpush3.bf16.msra.mxu1 %v4956_v35  ;;  %4687 = vmatprep.mubr.f32.mxu1 %v937_v2 }
 0x40a   : > { %4961 = vmatprep.subr.bf16.mxu1 %v4960_v3 }
 0x40c   : > { %4688 = vmatmul.mubr.f32.gmra.mrb[20].mxu1 %v938_v13 }
 0x40d   : > { %4963 = vmatpush3.bf16.msra.mxu1 %v4960_v3  ;;  %4690 = vmatprep.mubr.f32.mxu1 %v939_v14  ;;  %v1744_v3 = vpop.permute.xlu1 %1743 }
 0x40e   : > { %4965 = vmatprep.subr.bf16.mxu1 %v4964_v15 }
 0x410   : > { %4691 = vmatmul.mubr.f32.gmra.mrb[22].mxu1 %v940_v16 }
 0x411   : > { %4967 = vmatpush3.bf16.msra.mxu1 %v4964_v15  ;;  %4709 = vmatprep.mubr.msk.f32.mxu1 %vm7294_vm2, %v925_v17 }
 0x414   : > { %4710 = vmatmul.mubr.msk.f32.vlgmr.msra.gmra.mrb[16].mxu1 %vm7294_vm2, %v926_v19 }
 0x415   : > { %4712 = vmatprep.mubr.msk.f32.mxu1 %vm7294_vm2, %v927_v20 }
 0x418   : > { %4713 = vmatmul.mubr.msk.f32.gmra.mrb[18].mxu1 %vm7294_vm2, %v928_v21 }
 0x419   : > { %4715 = vmatprep.mubr.msk.f32.mxu1 %vm7294_vm2, %v929_v22  ;;  %v950_v22 = vld [vmem:[%s7262_s13 + $0x8] sm:$0xff] }
 0x41c   : > { %4716 = vmatmul.mubr.msk.f32.gmra.mrb[20].mxu1 %vm7294_vm2, %v930_v23  ;;  %v951_v23 = vld [vmem:[%s7262_s13 + $0x10] sm:$0xff] }
 0x41d   : > { %4718 = vmatprep.mubr.msk.f32.mxu1 %vm7294_vm2, %v931_v24  ;;  %v952_v24 = vld [vmem:[%s7262_s13 + $0x18] sm:$0xff] }
 0x420   : > { %4719 = vmatmul.mubr.msk.f32.gmra.mrb[22].mxu1 %vm7294_vm2, %v932_v25  ;;  %v953_v25 = vld [vmem:[%s7262_s13 + $0x20] sm:$0xff] }
 0x4e7   : > { %v4711_v39 = vpop.f32.mrb[16].mxu1 }
 0x4e8   : > { %v1747_v49 = vadd.f32 %v4711_v39, %v1714_v52  ;;  %v1667_v59 = vpop.f32.mrb[17].mxu1 }
 0x4e9   : > { %v1746_v60 = vadd.f32 %v1709_v57, %v1667_v59 }
 0x4ea   : > { %v1755_v28 = vmax.f32 %v1747_v49, 0.0 }
 0x4eb   : > { %v1754_v32 = vmax.f32 %v1746_v60, 0.0  ;;  %v4714_v33 = vpop.f32.mrb[18].mxu1 }
 0x4ec   : > { %v1749_v38 = vadd.f32 %v4714_v33, %v1724_v55  ;;  %v1677_v42 = vpop.f32.mrb[19].mxu1 }
 0x4ed   : > { %v4968_v61 = vpack.c.bf16 %v1755_v28, %v1754_v32  ;;  %v1748_v62 = vadd.f32 %v1719_v53, %v1677_v42 }
 0x4ee   : > { %v1757_v63 = vmax.f32 %v1749_v38, 0.0 }
 0x4ef   : > { %v1756_v0 = vmax.f32 %v1748_v62, 0.0  ;;  %v4717_v29 = vpop.f32.mrb[20].mxu1  ;;  %4969 = vmatprep.subr.bf16.mxu0 %v4968_v61 }
 0x4f0   : > { %v1751_v35 = vadd.f32 %v4717_v29, %v1734_v58  ;;  %v1687_v36 = vpop.f32.mrb[21].mxu1  ;;  %4971 = vmatpush3.bf16.msra.mxu0 %v4968_v61  ;;  %v2062_v58 = vpop.xlane.xlu1 %2061 }
 0x4f1   : > { %v4972_v41 = vpack.c.bf16 %v1757_v63, %v1756_v0  ;;  %v1750_v1 = vadd.f32 %v1729_v56, %v1687_v36  ;;  %v2065_v56 = vpop.xlane.xlu0 %2064 }
 0x4f2   : > { %v1759_v2 = vmax.f32 %v1751_v35, 0.0 }
 0x4f3   : > { %v1758_v8 = vmax.f32 %v1750_v1, 0.0  ;;  %v4720_v10 = vpop.f32.mrb[22].mxu1  ;;  %4973 = vmatprep.subr.bf16.mxu0 %v4972_v41 }
 0x4f4   : > { %v1753_v13 = vadd.f32 %v4720_v10, %v1744_v3  ;;  %v1697_v14 = vpop.f32.mrb[23].mxu1  ;;  %4975 = vmatpush3.bf16.msra.mxu0 %v4972_v41  ;;  %v2071_v42 = vpop.xlane.xlu1 %2070 }
 0x4f5   : > { %v4976_v15 = vpack.c.bf16 %v1759_v2, %v1758_v8  ;;  %v1752_v16 = vadd.f32 %v1739_v54, %v1697_v14  ;;  %v2068_v33 = vpop.xlane.xlu0 %2067 }
 0x4f6   : > { %v1761_v17 = vmax.f32 %v1753_v13, 0.0 }
 0x4f7   : > { %v1760_v19 = vmax.f32 %v1752_v16, 0.0  ;;  %4977 = vmatprep.subr.bf16.mxu0 %v4976_v15 }
 0x4f8   : > { %4979 = vmatpush3.bf16.msra.mxu0 %v4976_v15 }
 0x4f9   : > { %v4980_v20 = vpack.c.bf16 %v1761_v17, %v1760_v19 }
 0x4fb   : > { %4981 = vmatprep.subr.bf16.mxu0 %v4980_v20 }
 0x4fc   : > { %4983 = vmatpush3.bf16.msra.mxu0 %v4980_v20 }
 0x4fd   : > { %4986 = vmatprep.subr.msk.bf16.mxu0 %vm5959_vm4, %v5644_v4 }
 0x4ff   : > { %4738 = vmatmul.mubr.msk.f32.vlgmr.msra.gmra.mrb[4].mxu0 %vm7294_vm2, %v950_v22 }
 0x500   : > { %4740 = vmatprep.mubr.msk.f32.mxu0 %vm7294_vm2, %v951_v23 }
 0x503   : > { %4741 = vmatmul.mubr.msk.f32.gmra.mrb[6].mxu0 %vm7294_vm2, %v952_v24 }
 0x504   : > { %4743 = vmatprep.mubr.msk.f32.mxu0 %vm7294_vm2, %v953_v25 }
 0x505   : > { %4989 = vmatpush3.bf16.xpose.msk.msra.mxu0 %vm5959_vm4, %v5644_v4 }
 0x506   : > { %4990 = vmatprep.subr.bf16.mxu0 %v7288_v46 }
 0x507   : > { %4744 = vmatmul.mubr.msk.f32.gmra.mrb[8].mxu0 %vm7294_vm2, %v954_v26 }
 0x508   : > { %4746 = vmatprep.mubr.msk.f32.mxu0 %vm7294_vm2, %v955_v45 }
 0x50b   : > { %4747 = vmatmul.mubr.msk.f32.gmra.mrb[10].mxu0 %vm7294_vm2, %v956_v50 }
 0x50c   : > { %4753 = vmatprep.mubr.msk.f32.mxu0 %vm7285_vm0, %v5921_v27 }
 0x50f   : > { %4754 = vmatmul.mubr.msk.f32.vlgmr.msra.gmra.mrb[12].mxu0 %vm7285_vm0, %v5923_v30 }
 0x510   : > { %4993 = vmatpush3.bf16.xpose.msk.msra.mxu0 %vm5959_vm4, %v4991_v9  ;;  %4756 = vmatprep.mubr.msk.f32.mxu0 %vm7285_vm0, %v5925_v31 }
 0x513   : > { %4757 = vmatmul.mubr.msk.f32.gmra.mrb[14].mxu0 %vm7285_vm0, %v5927_v34 }
 0x514   : > { %4763 = vmatprep.mubr.msk.f32.mxu0 %vm7282_vm1, %v7290_v5 }
 0x517   : > { %4764 = vmatmul.mubr.msk.f32.vlgmr.msra.gmra.mrb[16].mxu0 %vm7285_vm0, %v7287_v11 }
 0x5d2   : > { %v6015_v4 = vpop.f32.mrb[4].mxu0 }
 0x5d3   : > { %v6017_v51 = vpop.f32.mrb[5].mxu0 }
 0x5d6   : > { %v6019_v6 = vpop.f32.mrb[6].mxu0 }
 0x5d7   : > { %v6021_v7 = vpop.f32.mrb[7].mxu0 }
 0x5da   : > { %v6023_v9 = vpop.f32.mrb[8].mxu0 }
 0x5db   : > { %v6025_v52 = vpop.f32.mrb[9].mxu0 }
 0x5de   : > { %v6027_v53 = vpop.f32.mrb[10].mxu0 }
 0x5df   : > { %v6029_v55 = vpop.f32.mrb[11].mxu0 }
 0x5e2   : > { %v4755_v57 = vpop.f32.mrb[12].mxu0 }
 0x5e3   : > { %v2037_v39 = vpop.f32.mrb[13].mxu0  ;;  %v2149_v59 = vmul.f32 2.0, %v4755_v57 }
 0x5e4   : > { %v2148_v60 = vmul.f32 2.0, %v2037_v39 }
 0x5e5   : > { %v2153_v62 = vsub.f32 %v2065_v56, %v2149_v59 }
 0x5e6   : > { %v4758_v49 = vpop.f32.mrb[14].mxu0  ;;  %v2152_v63 = vsub.f32 %v2062_v58, %v2148_v60 }
 0x5e7   : > { %v2151_v28 = vmul.f32 2.0, %v4758_v49  ;;  %v2047_v32 = vpop.f32.mrb[15].mxu0 }
 0x5e8   : > { %v2150_v38 = vmul.f32 2.0, %v2047_v32 }
 0x5e9   : > { %v2155_v0 = vsub.f32 %v2071_v42, %v2151_v28 }
 0x5ea   : > { %v2154_v54 = vsub.f32 %v2068_v33, %v2150_v38  ;;  %v2144_v61 = vpop.f32.mrb[16].mxu0 }
 0x5eb   : > { %v2159_v29 = vrot.slane %v2144_v61, %v5664_v18  ;;  %v4765_v35 = vpop.f32.mrb[17].mxu0 }
 0x5ed   : > { %v2161_v36 = vadd.f32 %v2159_v29, %v2153_v62  ;;  %v2160_v41 = vadd.f32 %v2159_v29, %v2152_v63  ;;  %v2163_v1 = vadd.f32 %v2159_v29, %v2155_v0  ;;  %v2162_v2 = vadd.f32 %v2159_v29, %v2154_v54 }
 0x5ef   : > { %v6032_v3 = vmax.f32 %v2161_v36, 0.0  ;;  %v6034_v8 = vmax.f32 %v2160_v41, 0.0  ;;  %v6040_v14 = vmax.f32 %v2163_v1, 0.0  ;;  %v6042_v15 = vmax.f32 %v2162_v2, 0.0 }
 0x5f1   : > { %v2172_v10 = vsel %vm2168_vm5, %v6032_v3, inf  ;;  %v2169_v13 = vsel %vm2168_vm5, %v6034_v8, inf  ;;  %v2178_v16 = vsel %vm2168_vm5, %v6040_v14, inf  ;;  %v2175_v17 = vsel %vm2168_vm5, %v6042_v15, inf }
 0x5f2   : > { %2173 = vmin.xlane.f32.xlu1 %v2172_v10  ;;  %2170 = vmin.xlane.f32.xlu0 %v2169_v13 }
 0x5f6   : > { %2179 = vmin.xlane.f32.xlu1 %v2178_v16  ;;  %2176 = vmin.xlane.f32.xlu0 %v2175_v17 }
 0x67f   : > { %v6048_v19 = vpop.xlane.xlu1 %2173  ;;  %v6050_v20 = vpop.xlane.xlu0 %2170 }
 0x680   : > { %vm2182_vm6 = vcmp.le.f32.partialorder %v6032_v3, %v6048_v19  ;;  %vm2181_vm12 = vcmp.le.f32.partialorder %v6034_v8, %v6050_v20  ;;  %5191 = vrsqrt.f32 %v6048_v19  ;;  %vm2202_vm8 = vcmp.eq.f32.partialorder %v6048_v19, inf }
 0x681   : > { %v6060_v22 = vsel %vm2182_vm6, 1e+30, %v6032_v3  ;;  %v6068_v24 = vsel %vm2181_vm12, 1e+30, %v6034_v8  ;;  %5193 = vrsqrt.f32 %v6050_v20  ;;  %vm2195_vm9 = vcmp.eq.f32.partialorder %v6050_v20, inf }
 0x682   : > { %v2240_v26 = vsel %vm2168_vm5, %v6060_v22, inf  ;;  %v2237_v45 = vsel %vm2168_vm5, %v6068_v24, inf  ;;  %v2205_v0 = vand.u32 2147483648, %v6048_v19  ;;  %vm2204_vm3 = vcmp.eq.f32.partialorder %v6048_v19, 0.0 }
 0x683   : > { %v6062_v23 = vpop.xlane.xlu1 %2179  ;;  %v6070_v25 = vpop.xlane.xlu0 %2176  ;;  %2241 = vmin.xlane.f32.xlu1 %v2240_v26  ;;  %2238 = vmin.xlane.f32.xlu0 %v2237_v45  ;;  %v2198_v35 = vand.u32 2147483648, %v6050_v20 }
 0x684   : > { %vm2184_vm13 = vcmp.le.f32.partialorder %v6040_v14, %v6062_v23  ;;  %vm2183_vm14 = vcmp.le.f32.partialorder %v6042_v15, %v6070_v25  ;;  %vm2209_vm0 = vcmp.eq.f32.partialorder %v6070_v25, inf }
 0x685   : > { %v6084_v50 = vsel %vm2184_vm13, 1e+30, %v6040_v14  ;;  %v6090_v56 = vsel %vm2183_vm14, 1e+30, %v6042_v15 }
 0x686   : > { %v2246_v57 = vsel %vm2168_vm5, %v6084_v50, inf  ;;  %v2243_v58 = vsel %vm2168_vm5, %v6090_v56, inf }
 0x687   : > { %2247 = vmin.xlane.f32.xlu1 %v2246_v57  ;;  %2244 = vmin.xlane.f32.xlu0 %v2243_v58 }
 0x68a   : > { %v5192_v39 = vpop.eup %5191 }
 0x68b   : > { %v5194_v49 = vpop.eup %5193  ;;  %v2201_v28 = vmul.f32 %v5192_v39, %v6048_v19 }
 0x68c   : > { %v2194_v32 = vmul.f32 %v5194_v49, %v6050_v20 }
 0x68d   : > { %v2203_v62 = vsel %vm2202_vm8, %v6048_v19, %v2201_v28  ;;  %vm2197_vm8 = vcmp.eq.f32.partialorder %v6050_v20, 0.0 }
 0x68e   : > { %v2196_v29 = vsel %vm2195_vm9, %v6050_v20, %v2194_v32  ;;  %v2206_v1 = vsel %vm2204_vm3, %v2205_v0, %v2203_v62 }
 0x68f   : > { %v2199_v13 = vsel %vm2197_vm8, %v2198_v35, %v2196_v29  ;;  %v2222_v26 = vadd.f32 1e-08, %v2206_v1  ;;  %v958_v29 = vld [vmem:[%s7263_s14 + $0x8] sm:$0xff] }
 0x690   : > { %v2221_v57 = vadd.f32 1e-08, %v2199_v13 }
 0x710   : > { %v6098_v59 = vpop.xlane.xlu1 %2241  ;;  %v6101_v60 = vpop.xlane.xlu0 %2238 }
 0x711   : > { %5195 = vrsqrt.f32 %v6098_v59  ;;  %vm2250_vm15 = vcmp.le.f32.partialorder %v6060_v22, %v6098_v59  ;;  %vm2249_vm7 = vcmp.le.f32.partialorder %v6068_v24, %v6101_v60  ;;  %vm2270_vm9 = vcmp.eq.f32.partialorder %v6098_v59, inf }
 0x712   : > { %5197 = vrsqrt.f32 %v6101_v60  ;;  %v6114_v33 = vsel %vm2250_vm15, 1e+30, %v6060_v22  ;;  %v6122_v42 = vsel %vm2249_vm7, 1e+30, %v6068_v24  ;;  %v2273_v58 = vand.u32 2147483648, %v6098_v59 }
 0x713   : > { %v2308_v54 = vsel %vm2168_vm5, %v6114_v33, inf  ;;  %v2305_v63 = vsel %vm2168_vm5, %v6122_v42, inf  ;;  %vm2272_vm3 = vcmp.eq.f32.partialorder %v6098_v59, 0.0  ;;  %vm2263_vm8 = vcmp.eq.f32.partialorder %v6101_v60, inf }
 0x714   : > { %v6116_v38 = vpop.xlane.xlu1 %2247  ;;  %v6127_v61 = vpop.xlane.xlu0 %2244  ;;  %2309 = vmin.xlane.f32.xlu1 %v2308_v54  ;;  %2306 = vmin.xlane.f32.xlu0 %v2305_v63  ;;  %v2266_v28 = vand.u32 2147483648, %v6101_v60  ;;  %vm2265_vm1 = vcmp.eq.f32.partialorder %v6101_v60, 0.0  ;;  %5199 = vrcp.f32 %v2222_v26  ;;  %v957_v26 = vld [vmem:[%s7263_s14] sm:$0xff] }
 0x715   : > { %vm2252_vm10 = vcmp.le.f32.partialorder %v6084_v50, %v6116_v38  ;;  %vm2251_vm11 = vcmp.le.f32.partialorder %v6090_v56, %v6127_v61  ;;  %5201 = vrcp.f32 %v2221_v57  ;;  %v960_v57 = vld [vmem:[%s7263_s14 + $0x18] sm:$0xff] }
 0x716   : > { %v6145_v36 = vsel %vm2252_vm10, 1e+30, %v6084_v50  ;;  %v6151_v41 = vsel %vm2251_vm11, 1e+30, %v6090_v56 }
 0x717   : > { %v2314_v2 = vsel %vm2168_vm5, %v6145_v36, inf  ;;  %v2311_v10 = vsel %vm2168_vm5, %v6151_v41, inf }
 0x718   : > { %2315 = vmin.xlane.f32.xlu1 %v2314_v2  ;;  %2312 = vmin.xlane.f32.xlu0 %v2311_v10  ;;  %v959_v10 = vld [vmem:[%s7263_s14 + $0x10] sm:$0xff] }
 0x71b   : > { %v5196_v16 = vpop.eup %5195 }
 0x71c   : > { %v5198_v17 = vpop.eup %5197  ;;  %v2269_v45 = vmul.f32 %v5196_v16, %v6098_v59 }
 0x71d   : > { %v2262_v39 = vmul.f32 %v5198_v17, %v6101_v60 }
 0x71e   : > { %v2271_v49 = vsel %vm2270_vm9, %v6098_v59, %v2269_v45  ;;  %v6171_v35 = vpop.eup %5199  ;;  %v961_v45 = vld [vmem:[%s7263_s14 + $0x20] sm:$0xff]  ;;  %vm2277_vm9 = vcmp.eq.f32.partialorder %v6127_v61, inf }
 0x71f   : > { %v2274_v32 = vsel %vm2272_vm3, %v2273_v58, %v2271_v49  ;;  %v2264_v54 = vsel %vm2263_vm8, %v6101_v60, %v2262_v39  ;;  %v6173_v1 = vpop.eup %5201  ;;  %v963_v58 = vld [vmem:[%s7263_s14 + $0x30] sm:$0xff]  ;;  %v962_v39 = vld [vmem:[%s7263_s14 + $0x28] sm:$0xff]  ;;  %v1947_v49 = vld [vmem:[%s7266_s17] sm:$0xff]  ;;  %vm2286_vm3 = vcmp.eq.f32.partialorder %v6116_v38, 0.0  ;;  %vm2279_vm8 = vcmp.eq.f32.partialorder %v6127_v61, 0.0 }
 0x720   : > { %v2290_v62 = vadd.f32 1e-08, %v2274_v32  ;;  %v2267_v63 = vsel %vm2265_vm1, %v2266_v28, %v2264_v54  ;;  %v964_v28 = vld [vmem:[%s7263_s14 + $0x38] sm:$0xff]  ;;  %v1949_v32 = vld [vmem:[%s7266_s17 + $0x10] sm:$0xff]  ;;  %v1948_v54 = vld [vmem:[%s7266_s17 + $0x8] sm:$0xff]  ;;  %vm2284_vm1 = vcmp.eq.f32.partialorder %v6116_v38, inf }
 0x721   : > { %v2289_v0 = vadd.f32 1e-08, %v2267_v63 }
 0x722   : > { %5203 = vrcp.f32 %v2290_v62  ;;  %v1950_v62 = vld [vmem:[%s7266_s17 + $0x18] sm:$0xff] }
 0x723   : > { %5205 = vrcp.f32 %v2289_v0 }
 0x724   : > { %5207 = vrsqrt.f32 %v6116_v38 }
 0x725   : > { %5209 = vrsqrt.f32 %v6127_v61 }
 0x726   : > { %5211 = vrsqrt.f32 %v6062_v23 }
 0x727   : > { %5213 = vrsqrt.f32 %v6070_v25 }
 0x729   : > { %1769 = vperm.xlu1 %5162, %v958_v29  }
 0x72c   : > { %v6175_v2 = vpop.eup %5203 }
 0x72d   : > { %v6180_v13 = vpop.eup %5205  ;;  %v6184_v16 = vadd.f32 %v6175_v2, %v6171_v35  ;;  %1774 = vperm.xlu1 %5162, %v959_v10  }
 0x72e   : > { %v6188_v17 = vadd.f32 %v6180_v13, %v6173_v1  ;;  %1764 = vperm.xlu0 %5161, %v957_v26   ;;  %v5208_v63 = vpop.eup %5207 }
 0x72f   : > { %v5210_v0 = vpop.eup %5209  ;;  %v2283_v29 = vmul.f32 %v5208_v63, %v6116_v38 }
 0x730   : > { %v5212_v10 = vpop.eup %5211  ;;  %v2276_v26 = vmul.f32 %v5210_v0, %v6127_v61 }
 0x731   : > { %1784 = vperm.xlu1 %5162, %v961_v45   ;;  %v5214_v45 = vpop.eup %5213 }
 0x732   : > { %1779 = vperm.xlu0 %5161, %v960_v57  }
 0x735   : > { %1794 = vperm.xlu1 %5162, %v963_v58   ;;  %v2215_v58 = vmul.f32 %v5212_v10, %v6062_v23 }
 0x736   : > { %1789 = vperm.xlu0 %5161, %v962_v39   ;;  %v2285_v39 = vsel %vm2284_vm1, %v6116_v38, %v2283_v29  ;;  %vm2216_vm1 = vcmp.eq.f32.partialorder %v6062_v23, inf }
 0x739   : > { %2755 = vperm.xlu1 %5162, %v1947_v49  }
 0x73a   : > { %1799 = vperm.xlu0 %5161, %v964_v28   ;;  %v2208_v28 = vmul.f32 %v5214_v45, %v6070_v25 }
 0x73c   : > { %v2210_v45 = vsel %vm2209_vm0, %v6070_v25, %v2208_v28 }
 0x73d   : > { %2765 = vperm.xlu1 %5162, %v1949_v32   ;;  %v2287_v32 = vand.u32 2147483648, %v6116_v38 }
 0x73e   : > { %2760 = vperm.xlu0 %5161, %v1948_v54   ;;  %v2278_v54 = vsel %vm2277_vm9, %v6127_v61, %v2276_v26  ;;  %v2217_v26 = vsel %vm2216_vm1, %v6062_v23, %v2215_v58  ;;  %vm2218_vm9 = vcmp.eq.f32.partialorder %v6062_v23, 0.0 }
 0x73f   : > { %v2288_v63 = vsel %vm2286_vm3, %v2287_v32, %v2285_v39  ;;  %v2219_v39 = vand.u32 2147483648, %v6062_v23  ;;  %v2212_v32 = vand.u32 2147483648, %v6070_v25  ;;  %vm2211_vm3 = vcmp.eq.f32.partialorder %v6070_v25, 0.0 }
 0x740   : > { %v2292_v12 = vadd.f32 1e-08, %v2288_v63 }
 0x741   : > { %v2213_v11 = vsel %vm2211_vm3, %v2212_v32, %v2210_v45 }
 0x742   : > { %2770 = vperm.xlu0 %5161, %v1950_v62   ;;  %v2280_v62 = vand.u32 2147483648, %v6127_v61  ;;  %v2223_v46 = vadd.f32 1e-08, %v2213_v11 }
 0x744   : > { %v2281_v29 = vsel %vm2279_vm8, %v2280_v62, %v2278_v54  ;;  %v2220_v62 = vsel %vm2218_vm9, %v2219_v39, %v2217_v26 }
 0x745   : > { %v2291_v54 = vadd.f32 1e-08, %v2281_v29  ;;  %v2224_v58 = vadd.f32 1e-08, %v2220_v62 }
 0x7a1   : > { %v6227_v57 = vpop.xlane.xlu1 %2309  ;;  %v6233_v49 = vpop.xlane.xlu0 %2306 }
 0x7a2   : > { %5215 = vrsqrt.f32 %v6227_v57  ;;  %vm2338_vm0 = vcmp.eq.f32.partialorder %v6227_v57, inf  ;;  %vm2340_vm8 = vcmp.eq.f32.partialorder %v6227_v57, 0.0  ;;  %v2341_v63 = vand.u32 2147483648, %v6227_v57 }
 0x7a3   : > { %5217 = vrsqrt.f32 %v6233_v49  ;;  %vm2331_vm1 = vcmp.eq.f32.partialorder %v6233_v49, inf  ;;  %vm2333_vm9 = vcmp.eq.f32.partialorder %v6233_v49, 0.0 }
 0x7a5   : > { %v6242_v0 = vpop.xlane.xlu1 %2315  ;;  %v6247_v10 = vpop.xlane.xlu0 %2312 }
 0x7a6   : > { %5219 = vrsqrt.f32 %v6242_v0  ;;  %vm2352_vm3 = vcmp.eq.f32.partialorder %v6242_v0, inf  ;;  %v2355_v44 = vand.u32 2147483648, %v6242_v0 }
 0x7a7   : > { %5221 = vrsqrt.f32 %v6247_v10 }
 0x7a8   : > { %5223 = vrcp.f32 %v2292_v12  ;;  %v2334_v12 = vand.u32 2147483648, %v6233_v49 }
 0x7a9   : > { %5225 = vrcp.f32 %v2291_v54 }
 0x7ac   : > { %v5216_v48 = vpop.eup %5215 }
 0x7ad   : > { %v5218_v47 = vpop.eup %5217  ;;  %v2337_v28 = vmul.f32 %v5216_v48, %v6227_v57  ;;  %v1765_v18 = vpop.permute.xlu0 %1764 }
 0x7ae   : > { %v2330_v5 = vmul.f32 %v5218_v47, %v6233_v49  ;;  %v1893_v11 = vadd.f32 %v6017_v51, %v1765_v18  ;;  %v2348_v51 = vand.u32 2147483648, %v6247_v10 }
 0x7af   : > { %v2339_v29 = vsel %vm2338_vm0, %v6227_v57, %v2337_v28  ;;  %vm2354_vm0 = vcmp.eq.f32.partialorder %v6242_v0, 0.0 }
 0x7b0   : > { %v5220_v26 = vpop.eup %5219  ;;  %v2342_v45 = vsel %vm2340_vm8, %v2341_v63, %v2339_v29  ;;  %v2332_v48 = vsel %vm2331_vm1, %v6233_v49, %v2330_v5  ;;  %v1931_v62 = vmax.f32 %v1893_v11, 0.0  ;;  %vm2345_vm8 = vcmp.eq.f32.partialorder %v6247_v10, inf }
 0x7b1   : > { %v5222_v39 = vpop.eup %5221  ;;  %v2358_v32 = vadd.f32 1e-08, %v2342_v45  ;;  %v2335_v47 = vsel %vm2333_vm9, %v2334_v12, %v2332_v48  ;;  %v2351_v54 = vmul.f32 %v5220_v26, %v6242_v0  ;;  %vm2347_vm1 = vcmp.eq.f32.partialorder %v6247_v10, 0.0 }
 0x7b2   : > { %v2357_v28 = vadd.f32 1e-08, %v2335_v47  ;;  %v2344_v18 = vmul.f32 %v5222_v39, %v6247_v10  ;;  %4774 = vmatprep.mubr.msk.f32.mxu1 %vm2168_vm5, %v1931_v62  ;;  %v5224_v26 = vpop.eup %5223  ;;  %vm2317_vm9 = vcmp.le.f32.partialorder %v6122_v42, %v6233_v49 }
 0x7b3   : > { %5227 = vrcp.f32 %v2358_v32  ;;  %v2353_v5 = vsel %vm2352_vm3, %v6242_v0, %v2351_v54  ;;  %v5226_v48 = vpop.eup %5225  ;;  %vm2318_vm3 = vcmp.le.f32.partialorder %v6114_v33, %v6227_v57 }
 0x7b4   : > { %5229 = vrcp.f32 %v2357_v28  ;;  %v2356_v63 = vsel %vm2354_vm0, %v2355_v44, %v2353_v5  ;;  %v2346_v29 = vsel %vm2345_vm8, %v6247_v10, %v2344_v18 }
 0x7b5   : > { %5231 = vrcp.f32 %v2224_v58  ;;  %v2360_v12 = vadd.f32 1e-08, %v2356_v63  ;;  %v2349_v11 = vsel %vm2347_vm1, %v2348_v51, %v2346_v29  ;;  %v7358_v63 = vmov 0.0  }
 0x7b6   : > { %5233 = vrcp.f32 %v2223_v46  ;;  %v2359_v45 = vadd.f32 1e-08, %v2349_v11  ;;  %v4335_v29 = vsel %vm2184_vm13, 1.0, %v7358_v63  ;;  %v4334_v3 = vsel %vm2183_vm14, 1.0, %v7358_v63  ;;  %vm6332_vm13 = vmpackc.low %vm2168_vm5, %vm2168_vm5 }
 0x7b7   : > { %5235 = vrcp.f32 %v2360_v12  ;;  %v4337_v8 = vsel %vm2250_vm15, 1.0, %v7358_v63  ;;  %v4336_v14 = vsel %vm2249_vm7, 1.0, %v7358_v63  ;;  %v4339_v19 = vsel %vm2252_vm10, 1.0, %v7358_v63 }
 0x7b8   : > { %5237 = vrcp.f32 %v2359_v45  ;;  %v4340_v23 = vsel %vm2317_vm9, 1.0, %v7358_v63  ;;  %v4341_v22 = vsel %vm2318_vm3, 1.0, %v7358_v63  ;;  %vm2655_vm14 = vcmask 261120  }
 0x7b9   : > { %vm7365_vm15 = vcmask 23552  }
 0x7ba   : > { %vm7366_vm7 = vmmov %vm7365_vm15 }
 0x7bb   : > { %vm7367_vm10 = vmmov %vm7366_vm7 }
 0x7bc   : > { %vm7369_vm0 = vmmov %vm7366_vm7 }
 0x7bd   : > { %v5228_v39 = vpop.eup %5227  ;;  %vm7370_vm8 = vmmov %vm7369_vm0 }
 0x7be   : > { %v5230_v32 = vpop.eup %5229  ;;  %v2374_v47 = vadd.f32 %v5228_v39, %v6184_v16  ;;  %v4333_v16 = vsel %vm2182_vm6, 1.0, %v7358_v63  ;;  %vm2319_vm6 = vcmp.le.f32.partialorder %v6151_v41, %v6247_v10  ;;  %v1780_v41 = vpop.permute.xlu0 %1779  ;;  %vm7371_vm1 = vmmov %vm7369_vm0 }
 0x7bf   : > { %v5232_v54 = vpop.eup %5231  ;;  %v2373_v44 = vadd.f32 %v5230_v32, %v6188_v17  ;;  %v4332_v17 = vsel %vm2181_vm12, 1.0, %v7358_v63  ;;  %vm2320_vm12 = vcmp.le.f32.partialorder %v6145_v36, %v6242_v0  ;;  %v4342_v56 = vsel %vm2319_vm6, 1.0, %v7358_v63  ;;  %vm7372_vm9 = vmmov %vm7369_vm0 }
 0x7c0   : > { %v5234_v62 = vpop.eup %5233  ;;  %v2372_v28 = vadd.f32 %v5232_v54, %v5224_v26  ;;  %5239 = vrcp.f32 %v2374_v47  ;;  %vm7373_vm3 = vmmov %vm7369_vm0 }
 0x7c1   : > { %v5236_v18 = vpop.eup %5235  ;;  %v2371_v58 = vadd.f32 %v5234_v62, %v5226_v48  ;;  %5241 = vrcp.f32 %v2373_v44  ;;  %vm7374_vm6 = vmmov %vm7369_vm0 }
 0x7c2   : > { %v5238_v5 = vpop.eup %5237  ;;  %v2376_v51 = vadd.f32 %v5236_v18, %v2372_v28 }
 0x7c3   : > { %v2375_v46 = vadd.f32 %v5238_v5, %v2371_v58  ;;  %v4338_v58 = vsel %vm2251_vm11, 1.0, %v7358_v63  ;;  %vm7368_vm11 = vmmov %vm7366_vm7 }
 0x7c4   : > { %5243 = vrcp.f32 %v2376_v51 }
 0x7c5   : > { %5245 = vrcp.f32 %v2375_v46 }
 0x7ca   : > { %v5240_v12 = vpop.eup %5239 }
 0x7cb   : > { %v5242_v20 = vpop.eup %5241  ;;  %v2386_v15 = vmul.f32 %v5240_v12, %v6171_v35  ;;  %v2394_v25 = vmul.f32 %v5240_v12, %v6175_v2  ;;  %v2406_v33 = vmul.f32 %v5240_v12, %v5228_v39 }
 0x7cc   : > { %v2385_v59 = vmul.f32 %v5242_v20, %v6173_v1  ;;  %v2393_v24 = vmul.f32 %v5242_v20, %v6180_v13  ;;  %v2405_v60 = vmul.f32 %v5242_v20, %v5230_v32 }
 0x7cd   : > { %v2390_v42 = vmul.f32 %v4333_v16, %v2386_v15  ;;  %v2398_v57 = vmul.f32 %v4337_v8, %v2394_v25  ;;  %v2410_v49 = vmul.f32 %v4341_v22, %v2406_v33  ;;  %v1908_v25 = vadd.f32 %v6019_v6, %v1780_v41 }
 0x7ce   : > { %v5244_v50 = vpop.eup %5243  ;;  %v2389_v38 = vmul.f32 %v4332_v17, %v2385_v59  ;;  %v2397_v35 = vmul.f32 %v4336_v14, %v2393_v24  ;;  %v2409_v2 = vmul.f32 %v4340_v23, %v2405_v60  ;;  %v1790_v23 = vpop.permute.xlu0 %1789 }
 0x7cf   : > { %v5246_v11 = vpop.eup %5245  ;;  %v2402_v45 = vadd.f32 %v2398_v57, %v2390_v42  ;;  %v2388_v39 = vmul.f32 %v5244_v50, %v5232_v54  ;;  %v2396_v1 = vmul.f32 %v5244_v50, %v5224_v26  ;;  %v2408_v47 = vmul.f32 %v5244_v50, %v5236_v18 }
 0x7d0   : > { %v2401_v13 = vadd.f32 %v2397_v35, %v2389_v38  ;;  %v2387_v32 = vmul.f32 %v5246_v11, %v5234_v62  ;;  %v2395_v44 = vmul.f32 %v5246_v11, %v5226_v48  ;;  %v2407_v28 = vmul.f32 %v5246_v11, %v5238_v5  ;;  %v1770_v5 = vpop.permute.xlu1 %1769  ;;  %v1940_v48 = vld [vmem:[%s7264_s15 + $0x8] sm:$0xff] }
 0x7d1   : > { %v2414_v51 = vadd.f32 %v2410_v49, %v2402_v45  ;;  %v2392_v46 = vmul.f32 %v4335_v29, %v2388_v39  ;;  %v2400_v16 = vmul.f32 %v4339_v19, %v2396_v1  ;;  %v4343_v54 = vsel %vm2320_vm12, 1.0, %v7358_v63  ;;  %v897_v1 = vld [vmem:[%s869_s4] sm:$0xff]  ;;  %vm7375_vm12 = vmmov %vm7369_vm0 }
 0x7d2   : > { %v2413_v17 = vadd.f32 %v2409_v2, %v2401_v13  ;;  %v2391_v26 = vmul.f32 %v4334_v3, %v2387_v32  ;;  %v2399_v18 = vmul.f32 %v4338_v58, %v2395_v44  ;;  %v2412_v62 = vmul.f32 %v4343_v54, %v2408_v47  ;;  %v1800_v57 = vpop.permute.xlu0 %1799  ;;  %v898_v47 = vld [vmem:[%s869_s4 + $0x8] sm:$0xff]  ;;  %v899_v58 = vld [vmem:[%s869_s4 + $0x10] sm:$0xff]  ;;  %v1946_v54 = vld [vmem:[%s7265_s16 + $0x18] sm:$0xff] }
 0x7d3   : > { %v2404_v61 = vadd.f32 %v2400_v16, %v2392_v46  ;;  %v2411_v36 = vmul.f32 %v4342_v56, %v2407_v28  ;;  %v1898_v10 = vadd.f32 %v6015_v4, %v1770_v5  ;;  %v1934_v24 = vmax.f32 %v1908_v25, 0.0  ;;  %v1944_v46 = vld [vmem:[%s7265_s16 + $0x8] sm:$0xff]  ;;  %v1945_v16 = vld [vmem:[%s7265_s16 + $0x10] sm:$0xff] }
 0x7d4   : > { %v4994_v29 = vpack.c.bf16 %v2414_v51, %v2413_v17  ;;  %v2403_v12 = vadd.f32 %v2399_v18, %v2391_v26  ;;  %v1775_v14 = vpop.permute.xlu1 %1774  ;;  %v1918_v60 = vadd.f32 %v6023_v9, %v1790_v23  ;;  %v1943_v9 = vld [vmem:[%s7265_s16] sm:$0xff]  ;;  %v5022_v28 = vpack.c.bf16 %v898_v47, %v897_v1  ;;  %v900_v51 = vld [vmem:[%s869_s4 + $0x18] sm:$0xff]  ;;  %s7364_s4 = sld [smem:[#allocation40_spill]]  ;;  %v896_v47 = vld [vmem:[%s864_s30 + $0x8] sm:$0xff] }
 0x7d5   : > { %v2416_v0 = vadd.f32 %v2412_v62, %v2404_v61  ;;  %v1903_v20 = vadd.f32 %v6021_v7, %v1775_v14  ;;  %v1932_v15 = vmax.f32 %v1898_v10, 0.0  ;;  %v1928_v7 = vadd.f32 %v6027_v53, %v1800_v57  ;;  %4802 = vmatprep.mubr.msk.f32.mxu0 %vm7294_vm2, %v1943_v9  ;;  %v1939_v18 = vld [vmem:[%s7264_s15] sm:$0xff] }
 0x7d6   : > { %4996 = vmatprep.subr.msk.bf16.mxu1 %vm6332_vm13, %v4994_v29  ;;  %v2415_v3 = vadd.f32 %v2411_v36, %v2403_v12  ;;  %v1936_v6 = vmax.f32 %v1918_v60, 0.0  ;;  %v5026_v17 = vpack.c.bf16 %v900_v51, %v899_v58  ;;  %v5042_v26 = vpack.c.bf16 %v5923_v30, %v5921_v27  ;;  %v1941_v27 = vld [vmem:[%s7264_s15 + $0x10] sm:$0xff]  ;;  %v1942_v30 = vld [vmem:[%s7264_s15 + $0x18] sm:$0xff]  ;;  %v1951_v61 = vld [vmem:[%s7267_s18] sm:$0xff] }
 0x7d7   : > { %4999 = vmatpush3.bf16.xpose.msk.msra.mxu1 %vm6332_vm13, %v4994_v29  ;;  %v1933_v33 = vmax.f32 %v1903_v20, 0.0  ;;  %v1938_v50 = vmax.f32 %v1928_v7, 0.0  ;;  %v5048_v56 = vpack.c.bf16 %v5927_v34, %v5925_v31  ;;  %v895_v1 = vld [vmem:[%s864_s30] sm:$0xff]  ;;  %v1953_v58 = vld [vmem:[%s7267_s18 + $0x10] sm:$0xff]  ;;  %v1954_v51 = vld [vmem:[%s7267_s18 + $0x18] sm:$0xff] }
 0x7d8   : > { %v5000_v8 = vpack.c.bf16 %v2416_v0, %v2415_v3  ;;  %v1785_v19 = vpop.permute.xlu1 %1784 }
 0x7d9   : > { %v1913_v22 = vadd.f32 %v6025_v52, %v1785_v19 }
 0x7da   : > { %5002 = vmatprep.subr.msk.bf16.mxu1 %vm6332_vm13, %v5000_v8  ;;  %s845_s5 = scalar_lea.vmem %s7364_s4, %s7363_s7  ;;  %s7414_s7 = sld [smem:[#allocation49_spill]] }
 0x7db   : > { %v1935_v42 = vmax.f32 %v1913_v22, 0.0  ;;  %v880_v31 = vld [vmem:[%s845_s5] sm:$0xff]  ;;  %v881_v34 = vld [vmem:[%s845_s5 + $0x8] sm:$0xff]  ;;  %v882_v62 = vld [vmem:[%s845_s5 + $0x10] sm:$0xff]  ;;  %s840_s4 = scalar_lea.vmem [#allocation4], %s4262_s1  ;;  %s5443_s1 = smov [#allocation4]  }
 0x7dc   : > { %v1795_v59 = vpop.permute.xlu1 %1794  ;;  %v883_v5 = vld [vmem:[%s845_s5 + $0x18] sm:$0xff]  ;;  %v884_v29 = vld [vmem:[%s845_s5 + $0x20] sm:$0xff]  ;;  %v885_v12 = vld [vmem:[%s845_s5 + $0x28] sm:$0xff]  ;;  %v3140_v3 = vmul.f32 %v881_v34, %v881_v34  ;;  %v3141_v14 = vmul.f32 %v882_v62, %v882_v62 }
 0x7dd   : > { %v1923_v4 = vadd.f32 %v6029_v55, %v1795_v59  ;;  %v886_v36 = vld [vmem:[%s845_s5 + $0x30] sm:$0xff]  ;;  %v887_v0 = vld [vmem:[%s845_s5 + $0x38] sm:$0xff]  ;;  %v3142_v41 = vmul.f32 %v883_v5, %v883_v5  ;;  %v3144_v25 = vmul.f32 %v885_v12, %v885_v12  ;;  %s4112_s5 = sshll.u32 %s840_s4, 4  ;;  %s7199_s5 = int_to_ptr.vmem [resolvable:$true] %s4112_s5 }
 0x7de   : > { %v3150_v10 = vsel %vm7373_vm3, %v3140_v3, 0.0  ;;  %v3153_v20 = vsel %vm7375_vm12, %v3141_v14, 0.0  ;;  %v3145_v59 = vmul.f32 %v886_v36, %v886_v36  ;;  %s5371_s30 = scalar_lea.vmem %s7199_s5, 256 }
 0x7df   : > { %5005 = vmatpush3.bf16.xpose.msk.msra.mxu1 %vm6332_vm13, %v5000_v8  ;;  %v1937_v52 = vmax.f32 %v1923_v4, 0.0  ;;  %v3139_v8 = vmul.f32 %v880_v31, %v880_v31  ;;  %3151 = vadd.xlane.f32.xlu0 %v3150_v10  ;;  %vm7376_vm13 = vmmov %vm7369_vm0  ;;  %v2761_v4 = vpop.permute.xlu0 %2760  ;;  %p5372_p2 = scmp.ne.s32.totalorder %s7199_s5, %s5371_s30 }
 0x7e0   : > { %v3156_v23 = vsel %vm7376_vm13, %v3142_v41, 0.0  ;;  %v2756_v57 = vpop.permute.xlu1 %2755 }
 0x7e1   : > { %v3147_v19 = vsel %vm7374_vm6, %v3139_v8, 0.0  ;;  %p5373_p3 = pnand %p5372_p2, %p5617_p10 }
 0x7e2   : > { %3148 = vadd.xlane.f32.xlu1 %v3147_v19 }
 0x7e3   : > { %3154 = vadd.xlane.f32.xlu0 %v3153_v20  ;;  %p5374_p4 = pneg %p5373_p3 }
 0x7e6   : > { %4775 = vmatmul.mubr.msk.f32.vlgmr.msra.gmra.mrb[24].mxu1 %vm2168_vm5, %v1932_v15  ;;  %v3143_v15 = vmul.f32 %v884_v29, %v884_v29  ;;  %3157 = vadd.xlane.f32.xlu1 %v3156_v23 }
 0x7e7   : > { %4777 = vmatprep.mubr.msk.f32.mxu1 %vm2168_vm5, %v1933_v33 }
 0x7ea   : > { %4778 = vmatmul.mubr.msk.f32.gmra.mrb[26].mxu1 %vm2168_vm5, %v1934_v24  ;;  %v3146_v24 = vmul.f32 %v887_v0, %v887_v0 }
 0x7eb   : > { %4780 = vmatprep.mubr.msk.f32.mxu1 %vm2168_vm5, %v1935_v42 }
 0x7ee   : > { %4781 = vmatmul.mubr.msk.f32.gmra.mrb[28].mxu1 %vm2168_vm5, %v1936_v6 }
 0x7ef   : > { %4783 = vmatprep.mubr.msk.f32.mxu1 %vm2168_vm5, %v1937_v52 }
 0x7f2   : > { %4784 = vmatmul.mubr.msk.f32.gmra.mrb[30].mxu1 %vm2168_vm5, %v1938_v50 }
 0x7f3   : > { %4830 = vmatprep.mubr.msk.f32.mxu1 %vm2655_vm14, %v1951_v61 }
 0x8b9   : > { %v4776_v55 = vpop.f32.mrb[24].mxu1 }
 0x8ba   : > { %v2519_v38 = vpop.f32.mrb[25].mxu1 }
 0x8bb   : > { %v5006_v35 = vpack.c.bf16 %v4776_v55, %v2519_v38  ;;  %v2771_v55 = vpop.permute.xlu0 %2770 }
 0x8bd   : > { %v4779_v2 = vpop.f32.mrb[26].mxu1  ;;  %5007 = vmatprep.subr.bf16.mxu0 %v5006_v35 }
 0x8be   : > { %v2529_v53 = vpop.f32.mrb[27].mxu1  ;;  %5009 = vmatpush3.bf16.msra.mxu0 %v5006_v35 }
 0x8bf   : > { %v5010_v49 = vpack.c.bf16 %v4779_v2, %v2529_v53  ;;  %v2766_v2 = vpop.permute.xlu1 %2765 }
 0x8c1   : > { %v4782_v11 = vpop.f32.mrb[28].mxu1  ;;  %5011 = vmatprep.subr.bf16.mxu0 %v5010_v49 }
 0x8c2   : > { %v2539_v45 = vpop.f32.mrb[29].mxu1  ;;  %5013 = vmatpush3.bf16.msra.mxu0 %v5010_v49 }
 0x8c3   : > { %v5014_v39 = vpack.c.bf16 %v4782_v11, %v2539_v45  ;;  %v3149_v21 = vpop.xlane.xlu1 %3148 }
 0x8c5   : > { %v4785_v13 = vpop.f32.mrb[30].mxu1  ;;  %5015 = vmatprep.subr.bf16.mxu0 %v5014_v39 }
 0x8c6   : > { %v2549_v32 = vpop.f32.mrb[31].mxu1  ;;  %5017 = vmatpush3.bf16.msra.mxu0 %v5014_v39 }
 0x8c7   : > { %v5018_v44 = vpack.c.bf16 %v4785_v13, %v2549_v32 }
 0x8c9   : > { %5019 = vmatprep.subr.bf16.mxu0 %v5018_v44 }
 0x8ca   : > { %5021 = vmatpush3.bf16.msra.mxu0 %v5018_v44  ;;  %v5038_v44 = vpack.c.bf16 %v896_v47, %v895_v1 }
 0x8cb   : > { %5023 = vmatprep.subr.bf16.mxu0 %v5022_v28 }
 0x8cd   : > { %4803 = vmatmul.mubr.msk.f32.vlgmr.msra.gmra.mrb[18].mxu0 %vm7294_vm2, %v1944_v46  ;;  %v2919_v46 = vld [vmem:[%s7269_s20] sm:$0xff] }
 0x8ce   : > { %5025 = vmatpush3.bf16.msra.mxu0 %v5022_v28  ;;  %4805 = vmatprep.mubr.msk.f32.mxu0 %vm7294_vm2, %v1945_v16  ;;  %v1952_v28 = vld [vmem:[%s7267_s18 + $0x8] sm:$0xff]  ;;  %v7383_v16 = vmov 0.0|0.0  }
 0x8cf   : > { %5027 = vmatprep.subr.bf16.mxu0 %v5026_v17 }
 0x8d1   : > { %4806 = vmatmul.mubr.msk.f32.gmra.mrb[20].mxu0 %vm7294_vm2, %v1946_v54  ;;  %v7385_v54 = vpack.c.bf16 %v5931_v37, %v5935_v40 }
 0x8d2   : > { %5029 = vmatpush3.bf16.msra.mxu0 %v5026_v17  ;;  %4816 = vmatprep.mubr.msk.f32.mxu0 %vm2655_vm14, %v1939_v18  ;;  %v2920_v17 = vld [vmem:[%s7269_s20 + $0x8] sm:$0xff] }
 0x8d3   : > { %5044 = vmatprep.subr.msk.bf16.mxu0 %vm5959_vm4, %v5042_v26 }
 0x8d5   : > { %4817 = vmatmul.mubr.msk.f32.vlgmr.msra.gmra.mrb[18].mxu0 %vm2655_vm14, %v1940_v48  ;;  %v7388_v48 = vmov 1.0  }
 0x8d6   : > { %4819 = vmatprep.mubr.msk.f32.mxu0 %vm2655_vm14, %v1941_v27 }
 0x8d9   : > { %4820 = vmatmul.mubr.msk.f32.gmra.mrb[20].mxu0 %vm2655_vm14, %v1942_v30 }
 0x8da   : > { %4851 = vmatprep.mubr.msk.f32.mxu0 %vm7365_vm15, %v880_v31  ;;  %vm7377_vm15 = vmmov %vm7369_vm0 }
 0x8db   : > { %5047 = vmatpush3.bf16.xpose.msk.msra.mxu0 %vm5959_vm4, %v5042_v26  ;;  %v3159_v33 = vsel %vm7377_vm15, %v3143_v15, 0.0  ;;  %v7386_v26 = vld [vmem:[#allocation13_spill] sm:$0xff] }
 0x8dc   : > { %5050 = vmatprep.subr.msk.bf16.mxu0 %vm5959_vm4, %v5048_v56  ;;  %3160 = vadd.xlane.f32.xlu0 %v3159_v33  ;;  %v7387_v18 = vpack.c.bf16 %v5939_v43, %v7386_v26 }
 0x8e3   : > { %5053 = vmatpush3.bf16.xpose.msk.msra.mxu0 %vm5959_vm4, %v5048_v56 }
 0x8ea   : > { %4852 = vmatmul.mubr.msk.f32.vlgmr.msra.gmra.mrb[22].mxu0 %vm7366_vm7, %v881_v34  ;;  %vm7378_vm7 = vmmov %vm7369_vm0 }
 0x8eb   : > { %4854 = vmatprep.mubr.msk.f32.mxu0 %vm7367_vm10, %v882_v62  ;;  %v3162_v22 = vsel %vm7378_vm7, %v3144_v25, 0.0  ;;  %vm7379_vm10 = vmmov %vm7369_vm0 }
 0x8ec   : > { %3163 = vadd.xlane.f32.xlu1 %v3162_v22  ;;  %v3165_v60 = vsel %vm7379_vm10, %v3145_v59, 0.0 }
 0x8ed   : > { %3166 = vadd.xlane.f32.xlu0 %v3165_v60 }
 0x8ee   : > { %4855 = vmatmul.mubr.msk.f32.gmra.mrb[24].mxu0 %vm7368_vm11, %v883_v5  ;;  %vm7380_vm11 = vmmov %vm7369_vm0 }
 0x8ef   : > { %4857 = vmatprep.mubr.msk.f32.mxu0 %vm7369_vm0, %v884_v29  ;;  %v3168_v42 = vsel %vm7380_vm11, %v3146_v24, 0.0  ;;  %vm7384_vm0 = vmmov 0   ;;  %v3152_v29 = vpop.xlane.xlu0 %3151 }
 0x8f0   : > { %3169 = vadd.xlane.f32.xlu1 %v3168_v42 }
 0x8f2   : > { %4858 = vmatmul.mubr.msk.f32.gmra.mrb[26].mxu0 %vm7370_vm8, %v885_v12  ;;  %vm7389_vm8 = vmmov %vm7371_vm1 }
 0x8f3   : > { %4860 = vmatprep.mubr.msk.f32.mxu0 %vm7371_vm1, %v886_v36  ;;  %v3155_v36 = vpop.xlane.xlu0 %3154 }
 0x8f6   : > { %4861 = vmatmul.mubr.msk.f32.gmra.mrb[28].mxu0 %vm7372_vm9, %v887_v0  ;;  %v3158_v0 = vpop.xlane.xlu1 %3157 }
 0x969   : > { %v3161_v3 = vpop.xlane.xlu0 %3160 }
 0x979   : > { %v3164_v8 = vpop.xlane.xlu1 %3163 }
 0x97a   : > { %v3167_v33 = vpop.xlane.xlu0 %3166 }
 0x97d   : > { %v3170_v22 = vpop.xlane.xlu1 %3169 }
 0x9a8   : > { %v4818_v6 = vpop.f32.mrb[18].mxu0 }
 0x9a9   : > { %v2774_v7 = vadd.f32 %v4818_v6, %v2761_v4  ;;  %v2734_v52 = vpop.f32.mrb[19].mxu0 }
 0x9aa   : > { %v2773_v50 = vadd.f32 %v2756_v57, %v2734_v52 }
 0x9ab   : > { %v2778_v9 = vmax.f32 %v2774_v7, 0.0 }
 0x9ac   : > { %v2777_v38 = vmax.f32 %v2773_v50, 0.0  ;;  %v4821_v35 = vpop.f32.mrb[20].mxu0  ;;  %v7393_v50 = vld [vmem:[#allocation12_spill] sm:$0xff] }
 0x9ad   : > { %v2776_v53 = vadd.f32 %v4821_v35, %v2771_v55  ;;  %v2744_v49 = vpop.f32.mrb[21].mxu0 }
 0x9ae   : > { %v5030_v11 = vpack.c.bf16 %v2778_v9, %v2777_v38  ;;  %v2775_v45 = vadd.f32 %v2766_v2, %v2744_v49 }
 0x9af   : > { %v2780_v39 = vmax.f32 %v2776_v53, 0.0 }
 0x9b0   : > { %v2779_v13 = vmax.f32 %v2775_v45, 0.0  ;;  %5031 = vmatprep.subr.bf16.mxu1 %v5030_v11 }
 0x9b1   : > { %5033 = vmatpush3.bf16.msra.mxu1 %v5030_v11 }
 0x9b2   : > { %v5034_v32 = vpack.c.bf16 %v2780_v39, %v2779_v13 }
 0x9b4   : > { %5035 = vmatprep.subr.bf16.mxu1 %v5034_v32 }
 0x9b5   : > { %5037 = vmatpush3.bf16.msra.mxu1 %v5034_v32 }
 0x9b6   : > { %5039 = vmatprep.subr.bf16.mxu1 %v5038_v44 }
 0x9b8   : > { %4831 = vmatmul.mubr.msk.f32.vlgmr.msra.gmra.mrb[32].mxu1 %vm2655_vm14, %v1952_v28 }
 0x9b9   : > { %5041 = vmatpush3.bf16.msra.mxu1 %v5038_v44  ;;  %4833 = vmatprep.mubr.msk.f32.mxu1 %vm2655_vm14, %v1953_v58 }
 0x9ba   : > { %5054 = vmatprep.subr.bf16.mxu1 %v7383_v16 }
 0x9bc   : > { %4834 = vmatmul.mubr.msk.f32.gmra.mrb[34].mxu1 %vm2655_vm14, %v1954_v51 }
 0x9bd   : > { %4840 = vmatprep.mubr.msk.f32.mxu1 %vm2168_vm5, %v2919_v46  ;;  %v4853_v27 = vpop.f32.mrb[22].mxu0 }
 0x9be   : > { %v3100_v30 = vpop.f32.mrb[23].mxu0  ;;  %v3254_v20 = vmul.f32 2.0, %v4853_v27 }
 0x9bf   : > { %v3253_v23 = vmul.f32 2.0, %v3100_v30 }
 0x9c0   : > { %4841 = vmatmul.mubr.msk.f32.vlgmr.msra.gmra.mrb[36].mxu1 %vm2168_vm5, %v2920_v17  ;;  %v3262_v4 = vsub.f32 %v3152_v29, %v3254_v20 }
 0x9c1   : > { %4871 = vmatprep.mubr.msk.f32.mxu1 %vm7384_vm0, %v7358_v63  ;;  %v4856_v56 = vpop.f32.mrb[24].mxu0  ;;  %v3261_v57 = vsub.f32 %v3149_v21, %v3253_v23 }
 0x9c2   : > { %5057 = vmatpush3.bf16.xpose.msk.msra.mxu1 %vm5959_vm4, %v7385_v54  ;;  %v3110_v61 = vpop.f32.mrb[25].mxu0  ;;  %v3256_v15 = vmul.f32 2.0, %v4856_v56 }
 0x9c3   : > { %5058 = vmatprep.subr.bf16.mxu1 %v7383_v16  ;;  %v3255_v14 = vmul.f32 2.0, %v3110_v61 }
 0x9c4   : > { %v3264_v6 = vsub.f32 %v3158_v0, %v3256_v15 }
 0x9c5   : > { %v4859_v31 = vpop.f32.mrb[26].mxu0  ;;  %v3263_v59 = vsub.f32 %v3155_v36, %v3255_v14 }
 0x9c6   : > { %v3120_v37 = vpop.f32.mrb[27].mxu0  ;;  %v3258_v41 = vmul.f32 2.0, %v4859_v31 }
 0x9c7   : > { %v3257_v10 = vmul.f32 2.0, %v3120_v37 }
 0x9c8   : > { %v3266_v24 = vsub.f32 %v3164_v8, %v3258_v41 }
 0x9c9   : > { %v4862_v40 = vpop.f32.mrb[28].mxu0  ;;  %v3265_v60 = vsub.f32 %v3161_v3, %v3257_v10 }
 0x9ca   : > { %5061 = vmatpush3.bf16.xpose.msk.msra.mxu1 %vm5959_vm4, %v7387_v18  ;;  %v3130_v34 = vpop.f32.mrb[29].mxu0  ;;  %v3260_v25 = vmul.f32 2.0, %v4862_v40 }
 0x9cb   : > { %v3259_v19 = vmul.f32 2.0, %v3130_v34 }
 0x9cc   : > { %v3268_v52 = vsub.f32 %v3170_v22, %v3260_v25 }
 0x9cd   : > { %v3267_v42 = vsub.f32 %v3167_v33, %v3259_v19 }
 0x9d1   : > { %4872 = vmatmul.mubr.msk.f32.vlgmr.msra.gmra.mrb[38].mxu1 %vm7389_vm8, %v7388_v48 }
 0xa8b   : > { %v6477_v62 = vpop.f32.mrb[32].mxu1 }
 0xa8c   : > { %7390 = vst [vmem:[#allocation13_spill] sm:$0xff] %v6477_v62  ;;  %v6479_v5 = vpop.f32.mrb[33].mxu1  ;;  %v1958_v62 = vld [vmem:[%s7414_s7 + $0x18] sm:$0xff] }
 0xa8f   : > { %v6481_v43 = vpop.f32.mrb[34].mxu1 }
 0xa90   : > { %7391 = vst [vmem:[#allocation14_spill] sm:$0xff] %v6481_v43  ;;  %v6483_v12 = vpop.f32.mrb[35].mxu1  ;;  %v1957_v43 = vld [vmem:[%s7414_s7 + $0x10] sm:$0xff] }
 0xa91   : > { %7392 = vst [vmem:[#allocation15_spill] sm:$0xff] %v6483_v12  ;;  %v1955_v12 = vld [vmem:[%s7414_s7] sm:$0xff] }
 0xaa4   : > { %v3249_v7 = vpop.f32.mrb[38].mxu1 }
 0xaa5   : > { %v3272_v9 = vrot.slane %v3249_v7, %v7393_v50  ;;  %v4873_v55 = vpop.f32.mrb[39].mxu1 }
 0xaa7   : > { %v3275_v38 = vadd.f32 %v3272_v9, %v3263_v59  ;;  %v3278_v35 = vadd.f32 %v3272_v9, %v3266_v24  ;;  %v3277_v2 = vadd.f32 %v3272_v9, %v3265_v60  ;;  %v3279_v53 = vadd.f32 %v3272_v9, %v3267_v42 }
 0xaa8   : > { %v3280_v49 = vadd.f32 %v3272_v9, %v3268_v52  ;;  %v3274_v11 = vadd.f32 %v3272_v9, %v3262_v4  ;;  %v3273_v45 = vadd.f32 %v3272_v9, %v3261_v57  ;;  %v3276_v39 = vadd.f32 %v3272_v9, %v3264_v6 }
 0xaa9   : > { %v6496_v28 = vmax.f32 %v3275_v38, 0.0  ;;  %v6498_v58 = vmax.f32 %v3278_v35, 0.0  ;;  %v6504_v16 = vmax.f32 %v3277_v2, 0.0  ;;  %v6506_v17 = vmax.f32 %v3279_v53, 0.0 }
 0xaaa   : > { %v6486_v1 = vmax.f32 %v3274_v11, 0.0  ;;  %v6488_v47 = vmax.f32 %v3273_v45, 0.0  ;;  %v6494_v44 = vmax.f32 %v3276_v39, 0.0  ;;  %v6508_v54 = vmax.f32 %v3280_v49, 0.0 }
 0xaab   : > { %v3295_v46 = vsel %vm2655_vm14, %v6496_v28, inf  ;;  %7394 = vst [vmem:[#allocation12_spill] sm:$0xff] %v6506_v17  ;;  %v3304_v26 = vsel %vm2655_vm14, %v6498_v58, inf  ;;  %v3301_v18 = vsel %vm2655_vm14, %v6504_v16, inf  ;;  %v3307_v27 = vsel %vm2655_vm14, %v6506_v17, inf }
 0xaac   : > { %v3292_v13 = vsel %vm2655_vm14, %v6486_v1, inf  ;;  %v3289_v32 = vsel %vm2655_vm14, %v6488_v47, inf  ;;  %v3298_v51 = vsel %vm2655_vm14, %v6494_v44, inf  ;;  %7395 = vst [vmem:[#allocation16_spill] sm:$0xff] %v6508_v54  ;;  %v3310_v48 = vsel %vm2655_vm14, %v6508_v54, inf }
 0xaad   : > { %3293 = vmin.xlane.f32.xlu1 %v3292_v13  ;;  %3290 = vmin.xlane.f32.xlu0 %v3289_v32 }
 0xab1   : > { %3299 = vmin.xlane.f32.xlu1 %v3298_v51  ;;  %3296 = vmin.xlane.f32.xlu0 %v3295_v46 }
 0xab5   : > { %3305 = vmin.xlane.f32.xlu1 %v3304_v26  ;;  %3302 = vmin.xlane.f32.xlu0 %v3301_v18 }
 0xab9   : > { %3311 = vmin.xlane.f32.xlu1 %v3310_v48  ;;  %3308 = vmin.xlane.f32.xlu0 %v3307_v27 }
 0xb3a   : > { %v6518_v30 = vpop.xlane.xlu1 %3293  ;;  %v6520_v56 = vpop.xlane.xlu0 %3290 }
 0xb3b   : > { %vm3314_vm4 = vcmp.le.f32.partialorder %v6486_v1, %v6518_v30  ;;  %vm3313_vm1 = vcmp.le.f32.partialorder %v6488_v47, %v6520_v56  ;;  %5247 = vrsqrt.f32 %v6518_v30  ;;  %vm3346_vm7 = vcmp.eq.f32.partialorder %v6518_v30, inf }
 0xb3c   : > { %v6534_v37 = vsel %vm3314_vm4, 1e+30, %v6486_v1  ;;  %v6540_v40 = vsel %vm3313_vm1, 1e+30, %v6488_v47  ;;  %5249 = vrsqrt.f32 %v6520_v56  ;;  %v3349_v52 = vand.u32 2147483648, %v6518_v30 }
 0xb3d   : > { %v3428_v34 = vsel %vm2655_vm14, %v6534_v37, inf  ;;  %v3425_v29 = vsel %vm2655_vm14, %v6540_v40, inf  ;;  %vm3348_vm10 = vcmp.eq.f32.partialorder %v6518_v30, 0.0  ;;  %vm3339_vm11 = vcmp.eq.f32.partialorder %v6520_v56, inf }
 0xb3e   : > { %v6526_v61 = vpop.xlane.xlu1 %3299  ;;  %v6528_v31 = vpop.xlane.xlu0 %3296  ;;  %3429 = vmin.xlane.f32.xlu1 %v3428_v34  ;;  %3426 = vmin.xlane.f32.xlu0 %v3425_v29  ;;  %v3342_v2 = vand.u32 2147483648, %v6520_v56  ;;  %vm3341_vm0 = vcmp.eq.f32.partialorder %v6520_v56, 0.0 }
 0xb3f   : > { %vm3316_vm9 = vcmp.le.f32.partialorder %v6494_v44, %v6526_v61  ;;  %vm3315_vm3 = vcmp.le.f32.partialorder %v6496_v28, %v6528_v31  ;;  %5251 = vrsqrt.f32 %v6526_v61  ;;  %vm3360_vm8 = vcmp.eq.f32.partialorder %v6526_v61, inf }
 0xb40   : > { %v6558_v0 = vsel %vm3316_vm9, 1e+30, %v6494_v44  ;;  %v6564_v3 = vsel %vm3315_vm3, 1e+30, %v6496_v28  ;;  %5253 = vrsqrt.f32 %v6528_v31  ;;  %v3363_v39 = vand.u32 2147483648, %v6526_v61 }
 0xb41   : > { %v3434_v8 = vsel %vm2655_vm14, %v6558_v0, inf  ;;  %v3431_v14 = vsel %vm2655_vm14, %v6564_v3, inf  ;;  %v3356_v51 = vand.u32 2147483648, %v6528_v31  ;;  %v7018_v1 = vsel %vm3315_vm3, 1.0, %v7358_v63 }
 0xb42   : > { %v6550_v21 = vpop.xlane.xlu1 %3305  ;;  %v6552_v36 = vpop.xlane.xlu0 %3302  ;;  %3435 = vmin.xlane.f32.xlu1 %v3434_v8  ;;  %3432 = vmin.xlane.f32.xlu0 %v3431_v14 }
 0xb43   : > { %vm3318_vm6 = vcmp.le.f32.partialorder %v6498_v58, %v6550_v21  ;;  %vm3317_vm12 = vcmp.le.f32.partialorder %v6504_v16, %v6552_v36  ;;  %5255 = vrsqrt.f32 %v6550_v21  ;;  %v3377_v29 = vand.u32 2147483648, %v6550_v21 }
 0xb44   : > { %v6578_v41 = vsel %vm3318_vm6, 1e+30, %v6498_v58  ;;  %v6586_v19 = vsel %vm3317_vm12, 1e+30, %v6504_v16  ;;  %5257 = vrsqrt.f32 %v6552_v36  ;;  %v3370_v14 = vand.u32 2147483648, %v6552_v36 }
 0xb45   : > { %v3440_v10 = vsel %vm2655_vm14, %v6578_v41, inf  ;;  %v3437_v23 = vsel %vm2655_vm14, %v6586_v19, inf  ;;  %v5248_v24 = vpop.eup %5247  ;;  %v7024_v47 = vsel %vm3318_vm6, 1.0, %v7358_v63  ;;  %v7032_v44 = vsel %vm3317_vm12, 1.0, %v7358_v63 }
 0xb46   : > { %v6588_v20 = vpop.xlane.xlu1 %3311  ;;  %v6592_v15 = vpop.xlane.xlu0 %3308  ;;  %3441 = vmin.xlane.f32.xlu1 %v3440_v10  ;;  %3438 = vmin.xlane.f32.xlu0 %v3437_v23  ;;  %v3345_v60 = vmul.f32 %v5248_v24, %v6518_v30 }
 0xb47   : > { %7396 = vst [vmem:[#allocation17_spill] sm:$0xff] %v6588_v20  ;;  %7397 = vst [vmem:[#allocation18_spill] sm:$0xff] %v6592_v15  ;;  %vm7296_vm13 = vcmp.le.f32.partialorder %v6508_v54, %v6588_v20  ;;  %vm7295_vm15 = vcmp.le.f32.partialorder %v6506_v17, %v6592_v15  ;;  %v5250_v42 = vpop.eup %5249 }
 0xb48   : > { %v6602_v25 = vsel %vm7296_vm13, 1e+30, %v6508_v54  ;;  %v6610_v22 = vsel %vm7295_vm15, 1e+30, %v6506_v17  ;;  %v3347_v57 = vsel %vm3346_vm7, %v6518_v30, %v3345_v60  ;;  %v3338_v6 = vmul.f32 %v5250_v42, %v6520_v56 }
 0xb49   : > { %7398 = vst [vmem:[#allocation19_spill] sm:$0xff] %v6602_v25  ;;  %v3446_v33 = vsel %vm2655_vm14, %v6602_v25, inf  ;;  %7399 = vst [vmem:[#allocation20_spill] sm:$0xff] %v6610_v22  ;;  %v3443_v59 = vsel %vm2655_vm14, %v6610_v22, inf  ;;  %v5252_v4 = vpop.eup %5251  ;;  %v3350_v50 = vsel %vm3348_vm10, %v3349_v52, %v3347_v57  ;;  %vm3353_vm7 = vcmp.eq.f32.partialorder %v6528_v31, inf }
 0xb4a   : > { %3447 = vmin.xlane.f32.xlu1 %v3446_v33  ;;  %3444 = vmin.xlane.f32.xlu0 %v3443_v59  ;;  %v5254_v7 = vpop.eup %5253  ;;  %v3359_v9 = vmul.f32 %v5252_v4, %v6526_v61  ;;  %v3340_v55 = vsel %vm3339_vm11, %v6520_v56, %v3338_v6  ;;  %v3394_v49 = vadd.f32 1e-08, %v3350_v50  ;;  %vm3362_vm10 = vcmp.eq.f32.partialorder %v6526_v61, 0.0 }
 0xb4b   : > { %v3352_v38 = vmul.f32 %v5254_v7, %v6528_v31  ;;  %v3343_v11 = vsel %vm3341_vm0, %v3342_v2, %v3340_v55  ;;  %vm3355_vm11 = vcmp.eq.f32.partialorder %v6528_v31, 0.0  ;;  %vm3374_vm0 = vcmp.eq.f32.partialorder %v6550_v21, inf }
 0xb4c   : > { %v3361_v45 = vsel %vm3360_vm8, %v6526_v61, %v3359_v9  ;;  %5259 = vrcp.f32 %v3394_v49  ;;  %v3393_v26 = vadd.f32 1e-08, %v3343_v11  ;;  %vm3376_vm8 = vcmp.eq.f32.partialorder %v6550_v21, 0.0 }
 0xb4d   : > { %v5256_v35 = vpop.eup %5255  ;;  %v3354_v13 = vsel %vm3353_vm7, %v6528_v31, %v3352_v38  ;;  %v3364_v18 = vsel %vm3362_vm10, %v3363_v39, %v3361_v45  ;;  %vm3367_vm7 = vcmp.eq.f32.partialorder %v6552_v36, inf  ;;  %v2905_v17 = vstv %s2902_s29 }
 0xb4e   : > { %v5258_v53 = vpop.eup %5257  ;;  %v3373_v32 = vmul.f32 %v5256_v35, %v6550_v21  ;;  %v3357_v34 = vsel %vm3355_vm11, %v3356_v51, %v3354_v13  ;;  %v3396_v10 = vadd.f32 1e-08, %v3364_v18 }
 0xb4f   : > { %v3366_v46 = vmul.f32 %v5258_v53, %v6552_v36  ;;  %v3395_v33 = vadd.f32 1e-08, %v3357_v34 }
 0xb50   : > { %v3375_v8 = vsel %vm3374_vm0, %v6550_v21, %v3373_v32  ;;  %vm3369_vm0 = vcmp.eq.f32.partialorder %v6552_v36, 0.0 }
 0xb51   : > { %v3368_v23 = vsel %vm3367_vm7, %v6552_v36, %v3366_v46  ;;  %v3378_v4 = vsel %vm3376_vm8, %v3377_v29, %v3375_v8 }
 0xb52   : > { %v3371_v6 = vsel %vm3369_vm0, %v3370_v14, %v3368_v23  ;;  %v6688_v52 = vadd.f32 1e-08, %v3378_v4 }
 0xb53   : > { %v6706_v35 = vadd.f32 1e-08, %v3371_v6 }
 0xb56   : > { %v6712_v53 = vpop.eup %5259 }
 0xbcb   : > { %v6643_v48 = vpop.xlane.xlu1 %3429  ;;  %v6645_v27 = vpop.xlane.xlu0 %3426 }
 0xbcc   : > { %5261 = vrsqrt.f32 %v6643_v48  ;;  %vm7302_vm10 = vcmp.le.f32.partialorder %v6534_v37, %v6643_v48  ;;  %vm7299_vm11 = vcmp.le.f32.partialorder %v6540_v40, %v6645_v27  ;;  %vm3482_vm0 = vcmp.eq.f32.partialorder %v6643_v48, inf }
 0xbcd   : > { %5263 = vrsqrt.f32 %v6645_v27  ;;  %v6663_v59 = vsel %vm7302_vm10, 1e+30, %v6534_v37  ;;  %v6671_v60 = vsel %vm7299_vm11, 1e+30, %v6540_v40  ;;  %vm3484_vm2 = vcmp.eq.f32.partialorder %v6643_v48, 0.0 }
 0xbce   : > { %5265 = vrcp.f32 %v3393_v26  ;;  %v3564_v57 = vsel %vm2655_vm14, %v6663_v59, inf  ;;  %v3561_v7 = vsel %vm2655_vm14, %v6671_v60, inf  ;;  %v3485_v49 = vand.u32 2147483648, %v6643_v48 }
 0xbcf   : > { %v6665_v24 = vpop.xlane.xlu1 %3435  ;;  %v6673_v42 = vpop.xlane.xlu0 %3432  ;;  %3565 = vmin.xlane.f32.xlu1 %v3564_v57  ;;  %3562 = vmin.xlane.f32.xlu0 %v3561_v7  ;;  %vm3475_vm15 = vcmp.eq.f32.partialorder %v6645_v27, inf  ;;  %vm3477_vm13 = vcmp.eq.f32.partialorder %v6645_v27, 0.0  ;;  %v3478_v32 = vand.u32 2147483648, %v6645_v27 }
 0xbd0   : > { %5267 = vrsqrt.f32 %v6665_v24  ;;  %vm7298_vm7 = vcmp.le.f32.partialorder %v6558_v0, %v6665_v24  ;;  %vm7297_vm8 = vcmp.le.f32.partialorder %v6564_v3, %v6673_v42  ;;  %vm3496_vm11 = vcmp.eq.f32.partialorder %v6665_v24, inf }
 0xbd1   : > { %5269 = vrsqrt.f32 %v6673_v42  ;;  %v6694_v50 = vsel %vm7298_vm7, 1e+30, %v6558_v0  ;;  %v6702_v55 = vsel %vm7297_vm8, 1e+30, %v6564_v3  ;;  %vm3491_vm10 = vcmp.eq.f32.partialorder %v6673_v42, 0.0 }
 0xbd2   : > { %5271 = vrcp.f32 %v3396_v10  ;;  %v3570_v2 = vsel %vm2655_vm14, %v6694_v50, inf  ;;  %v3567_v11 = vsel %vm2655_vm14, %v6702_v55, inf  ;;  %v3499_v10 = vand.u32 2147483648, %v6665_v24 }
 0xbd3   : > { %5273 = vrcp.f32 %v3395_v33  ;;  %v6696_v9 = vpop.xlane.xlu1 %3441  ;;  %v6704_v38 = vpop.xlane.xlu0 %3438  ;;  %3571 = vmin.xlane.f32.xlu1 %v3570_v2  ;;  %3568 = vmin.xlane.f32.xlu0 %v3567_v11  ;;  %v3492_v11 = vand.u32 2147483648, %v6673_v42  ;;  %vm7423_vm6 = vcmp.le.f32.partialorder %v6558_v0, %v6665_v24  ;;  %vm7424_vm12 = vcmp.le.f32.partialorder %v6564_v3, %v6673_v42 }
 0xbd4   : > { %5275 = vrsqrt.f32 %v6696_v9  ;;  %vm7301_vm8 = vcmp.le.f32.partialorder %v6578_v41, %v6696_v9  ;;  %vm7300_vm7 = vcmp.le.f32.partialorder %v6586_v19, %v6704_v38 }
 0xbd5   : > { %5277 = vrsqrt.f32 %v6704_v38  ;;  %v6731_v51 = vsel %vm7301_vm8, 1e+30, %v6578_v41  ;;  %v6737_v46 = vsel %vm7300_vm7, 1e+30, %v6586_v19  ;;  %vm3498_vm7 = vcmp.eq.f32.partialorder %v6665_v24, 0.0 }
 0xbd6   : > { %v5262_v45 = vpop.eup %5261  ;;  %7400 = vst [vmem:[#allocation21_spill] sm:$0xff] %v6731_v51  ;;  %7401 = vst [vmem:[#allocation22_spill] sm:$0xff] %v6737_v46  ;;  %v3576_v18 = vsel %vm2655_vm14, %v6731_v51, inf  ;;  %v3573_v29 = vsel %vm2655_vm14, %v6737_v46, inf  ;;  %vm3489_vm8 = vcmp.eq.f32.partialorder %v6673_v42, inf }
 0xbd7   : > { %v5264_v39 = vpop.eup %5263  ;;  %v3481_v13 = vmul.f32 %v5262_v45, %v6643_v48  ;;  %v6743_v34 = vpop.xlane.xlu1 %3447  ;;  %3577 = vmin.xlane.f32.xlu1 %v3576_v18  ;;  %3574 = vmin.xlane.f32.xlu0 %v3573_v29 }
 0xbd8   : > { %v3474_v26 = vmul.f32 %v5264_v39, %v6645_v27  ;;  %7402 = vst [vmem:[#allocation23_spill] sm:$0xff] %v6743_v34  ;;  %v6747_v8 = vpop.eup %5265  ;;  %v6778_v18 = vpop.xlane.xlu0 %3444 }
 0xbd9   : > { %7403 = vst [vmem:[#allocation24_spill] sm:$0xff] %v6747_v8  ;;  %v3483_v14 = vsel %vm3482_vm0, %v6643_v48, %v3481_v13  ;;  %vm3456_vm0 = vcmp.le.f32.partialorder %v6602_v25, %v6743_v34  ;;  %7406 = vst [vmem:[#allocation27_spill] sm:$0xff] %v6778_v18 }
 0xbda   : > { %v5268_v23 = vpop.eup %5267  ;;  %v3486_v33 = vsel %vm3484_vm2, %v3485_v49, %v3483_v14  ;;  %v3476_v4 = vsel %vm3475_vm15, %v6645_v27, %v3474_v26  ;;  %vm3510_vm2 = vcmp.eq.f32.partialorder %v6696_v9, inf  ;;  %vm3512_vm15 = vcmp.eq.f32.partialorder %v6696_v9, 0.0 }
 0xbdb   : > { %v5270_v57 = vpop.eup %5269  ;;  %v3530_v6 = vadd.f32 1e-08, %v3486_v33  ;;  %v3479_v7 = vsel %vm3477_vm13, %v3478_v32, %v3476_v4  ;;  %v3495_v2 = vmul.f32 %v5268_v23, %v6665_v24  ;;  %v3513_v26 = vand.u32 2147483648, %v6696_v9 }
 0xbdc   : > { %v6767_v49 = vpop.eup %5271  ;;  %v3529_v45 = vadd.f32 1e-08, %v3479_v7  ;;  %v3488_v39 = vmul.f32 %v5270_v57, %v6673_v42  ;;  %v6784_v29 = vsel %vm3456_vm0, 1e+30, %v6602_v25  ;;  %vm3503_vm13 = vcmp.eq.f32.partialorder %v6704_v38, inf }
 0xbdd   : > { %7404 = vst [vmem:[#allocation25_spill] sm:$0xff] %v6767_v49  ;;  %v6772_v13 = vpop.eup %5273  ;;  %5279 = vrcp.f32 %v3530_v6  ;;  %v3497_v32 = vsel %vm3496_vm11, %v6665_v24, %v3495_v2  ;;  %7407 = vst [vmem:[#allocation28_spill] sm:$0xff] %v6784_v29  ;;  %v3582_v4 = vsel %vm2655_vm14, %v6784_v29, inf  ;;  %vm3505_vm11 = vcmp.eq.f32.partialorder %v6704_v38, 0.0  ;;  %v2908_v29 = vld [vmem:[%s7419_s2 + $0x8] sm:$0xff] }
 0xbde   : > { %7405 = vst [vmem:[#allocation26_spill] sm:$0xff] %v6772_v13  ;;  %v5276_v14 = vpop.eup %5275  ;;  %5281 = vrcp.f32 %v3529_v45  ;;  %v3500_v23 = vsel %vm3498_vm7, %v3499_v10, %v3497_v32  ;;  %v3490_v33 = vsel %vm3489_vm8, %v6673_v42, %v3488_v39  ;;  %3583 = vmin.xlane.f32.xlu1 %v3582_v4  ;;  %vm3455_vm7 = vcmp.le.f32.partialorder %v6610_v22, %v6778_v18 }
 0xbdf   : > { %v5278_v57 = vpop.eup %5277  ;;  %v3532_v6 = vadd.f32 1e-08, %v3500_v23  ;;  %v3493_v7 = vsel %vm3491_vm10, %v3492_v11, %v3490_v33  ;;  %v3509_v2 = vmul.f32 %v5276_v14, %v6696_v9  ;;  %v3506_v11 = vand.u32 2147483648, %v6704_v38 }
 0xbe0   : > { %v3531_v45 = vadd.f32 1e-08, %v3493_v7  ;;  %v3502_v10 = vmul.f32 %v5278_v57, %v6704_v38  ;;  %v6809_v32 = vsel %vm3455_vm7, 1e+30, %v6610_v22  ;;  %vm3524_vm8 = vcmp.eq.f32.partialorder %v6743_v34, inf }
 0xbe1   : > { %5283 = vrcp.f32 %v3532_v6  ;;  %v3511_v39 = vsel %vm3510_vm2, %v6696_v9, %v3509_v2  ;;  %7408 = vst [vmem:[#allocation29_spill] sm:$0xff] %v6809_v32  ;;  %v3579_v33 = vsel %vm2655_vm14, %v6809_v32, inf  ;;  %v2907_v32 = vld [vmem:[%s7419_s2] sm:$0xff]  ;;  %vm3388_vm2 = vcmp.eq.f32.partialorder %v6588_v20, inf  ;;  %s5375_s2 = sshll.u32 %s5443_s1, 4  ;;  %s5376_s2 = int_to_ptr.vmem [resolvable:$false] %s5375_s2 }
 0xbe2   : > { %5285 = vrcp.f32 %v3531_v45  ;;  %v3514_v14 = vsel %vm3512_vm15, %v3513_v26, %v3511_v39  ;;  %v3504_v23 = vsel %vm3503_vm13, %v6704_v38, %v3502_v10  ;;  %3580 = vmin.xlane.f32.xlu0 %v3579_v33  ;;  %vm3381_vm15 = vcmp.eq.f32.partialorder %v6592_v15, inf  ;;  %s5377_s27 = scalar_lea.vmem %s5376_s2, 512  ;;  %p5378_p5 = scmp.lt.s32.totalorder %s7199_s5, %s5376_s2 }
 0xbe3   : > { %5287 = vrcp.f32 %v6688_v52  ;;  %v3534_v4 = vadd.f32 1e-08, %v3514_v14  ;;  %v3507_v57 = vsel %vm3505_vm11, %v3506_v11, %v3504_v23  ;;  %v1956_v14 = vld [vmem:[%s7414_s7 + $0x8] sm:$0xff]  ;;  %vm3526_vm13 = vcmp.eq.f32.partialorder %v6743_v34, 0.0  ;;  %p5379_p6 = scmp.lt.s32.totalorder %s5377_s27, %s5371_s30 }
 0xbe4   : > { %5289 = vrcp.f32 %v6706_v35  ;;  %v3533_v6 = vadd.f32 1e-08, %v3507_v57  ;;  %vm3517_vm11 = vcmp.eq.f32.partialorder %v6778_v18, inf }
 0xbe5   : > { %5291 = vrcp.f32 %v3534_v4  ;;  %p5380_p7 = por %p5379_p6, %p5378_p5 }
 0xbe6   : > { %5293 = vrcp.f32 %v3533_v6 }
 0xbe7   : > { %v6818_v7 = vpop.eup %5279  ;;  %5295 = vrsqrt.f32 %v6743_v34  ;;  %p5381_p8 = pnand %p5380_p7, %p5374_p4 }
 0xbe8   : > { %7409 = vst [vmem:[#allocation30_spill] sm:$0xff] %v6818_v7  ;;  %v6820_v2 = vpop.eup %5281  ;;  %v6824_v26 = vadd.f32 %v6818_v7, %v6712_v53  ;;  %5297 = vrsqrt.f32 %v6588_v20 }
 0xbe9   : > { %7410 = vst [vmem:[#allocation31_spill] sm:$0xff] %v6820_v2  ;;  %v6828_v45 = vadd.f32 %v6820_v2, %v6747_v8  ;;  %5299 = vrsqrt.f32 %v6592_v15 }
 0xbea   : > { %5301 = vrsqrt.f32 %v6778_v18 }
 0xbeb   : > { %v6830_v52 = vpop.eup %5283 }
 0xbec   : > { %7411 = vst [vmem:[#allocation32_spill] sm:$0xff] %v6830_v52  ;;  %v6832_v10 = vpop.eup %5285  ;;  %v6836_v35 = vadd.f32 %v6830_v52, %v6767_v49  ;;  %v3520_v52 = vand.u32 2147483648, %v6778_v18 }
 0xbed   : > { %7412 = vst [vmem:[#allocation33_spill] sm:$0xff] %v6832_v10  ;;  %v6838_v39 = vpop.eup %5287  ;;  %v6842_v11 = vadd.f32 %v6832_v10, %v6772_v13 }
 0xbee   : > { %7413 = vst [vmem:[#allocation34_spill] sm:$0xff] %v6838_v39  ;;  %v6847_v23 = vpop.eup %5289 }
 0xbef   : > { %7415 = vst [vmem:[#allocation35_spill] sm:$0xff] %v6847_v23  ;;  %v6849_v33 = vpop.eup %5291  ;;  %2788 = vperm.xlu1 %5162, %v1956_v14   ;;  %v7418_v14 = vlaneseq }
 0xbf0   : > { %7416 = vst [vmem:[#allocation36_spill] sm:$0xff] %v6849_v33  ;;  %v6851_v4 = vpop.eup %5293  ;;  %v6855_v57 = vadd.f32 %v6849_v33, %v6838_v39 }
 0xbf1   : > { %7417 = vst [vmem:[#allocation37_spill] sm:$0xff] %v6851_v4  ;;  %v6859_v6 = vadd.f32 %v6851_v4, %v6847_v23  ;;  %v2904_v22 = vand.u32 127, %v7418_v14 }
 0xbf3   : > { %2793 = vperm.xlu1 %5162, %v1957_v43   ;;  %vm2906_vm10 = vcmp.eq.s32.totalorder %v2904_v22, %v2905_v17  ;;  %v3005_v17 = vld [vmem:[%s7271_s22 + $0x8] sm:$0xff]  ;;  %v3008_v22 = vld [vmem:[%s7273_s24] sm:$0xff] }
 0xbf4   : > { %v2911_v43 = vsel %vm2906_vm10, %v2907_v32, 0.0  ;;  %v2912_v25 = vsel %vm2906_vm10, %v2908_v29, 0.0  ;;  %v3004_v32 = vld [vmem:[%s7271_s22] sm:$0xff]  ;;  %v5296_v29 = vpop.eup %5295  ;;  %vm3390_vm10 = vcmp.eq.f32.partialorder %v6588_v20, 0.0 }
 0xbf5   : > { %v5298_v14 = vpop.eup %5297 }
 0xbf8   : > { %2783 = vperm.xlu0 %5161, %v1955_v12   ;;  %v2913_v12 = vsel %vm2168_vm5, %v2911_v43, 0.0 }
 0xbfc   : > { %2798 = vperm.xlu0 %5161, %v1958_v62   ;;  %v2916_v62 = vsel %vm2168_vm5, %v2912_v25, 0.0  ;;  %v3009_v25 = vld [vmem:[%s7273_s24 + $0x8] sm:$0xff] }
 0xc17   : > { %2914 = vadd.xlane.f32.xlu1 %v2913_v12  ;;  %v5300_v12 = vpop.eup %5299 }
 0xc18   : > { %v3380_v54 = vmul.f32 %v5300_v12, %v6592_v15 }
 0xc1b   : > { %2917 = vadd.xlane.f32.xlu0 %v2916_v62 }
 0xc28   : > { %3996 = vperm.xlu1 %5162, %v3005_v17   ;;  %v5302_v17 = vpop.eup %5301 }
 0xc29   : > { %v3516_v33 = vmul.f32 %v5302_v17, %v6778_v18 }
 0xc2b   : > { %v3518_v10 = vsel %vm3517_vm11, %v6778_v18, %v3516_v33 }
 0xc2c   : > { %4005 = vperm.xlu1 %5162, %v3008_v22   ;;  %v3523_v22 = vmul.f32 %v5296_v29, %v6743_v34  ;;  %v3391_v29 = vand.u32 2147483648, %v6588_v20 }
 0xc2e   : > { %v3525_v23 = vsel %vm3524_vm8, %v6743_v34, %v3523_v22  ;;  %v3382_v22 = vsel %vm3381_vm15, %v6592_v15, %v3380_v54  ;;  %vm3383_vm8 = vcmp.eq.f32.partialorder %v6592_v15, 0.0 }
 0xc31   : > { %3991 = vperm.xlu0 %5161, %v3004_v32   ;;  %v3387_v32 = vmul.f32 %v5298_v14, %v6588_v20  ;;  %v3527_v14 = vand.u32 2147483648, %v6743_v34 }
 0xc33   : > { %v3389_v12 = vsel %vm3388_vm2, %v6588_v20, %v3387_v32  ;;  %v3528_v39 = vsel %vm3526_vm13, %v3527_v14, %v3525_v23  ;;  %v3384_v32 = vand.u32 2147483648, %v6592_v15  ;;  %vm3519_vm2 = vcmp.eq.f32.partialorder %v6778_v18, 0.0 }
 0xc34   : > { %v3392_v49 = vsel %vm3390_vm10, %v3391_v29, %v3389_v12  ;;  %v3536_v33 = vadd.f32 1e-08, %v3528_v39  ;;  %v3521_v14 = vsel %vm3519_vm2, %v3520_v52, %v3518_v10 }
 0xc35   : > { %4010 = vperm.xlu0 %5161, %v3009_v25   ;;  %v3385_v23 = vsel %vm3383_vm8, %v3384_v32, %v3382_v22 }
 0xc5c   : > { %v6896_v43 = vpop.xlane.xlu1 %3565  ;;  %v6899_v62 = vpop.xlane.xlu0 %3562 }
 0xc5d   : > { %5303 = vrsqrt.f32 %v6896_v43  ;;  %vm3618_vm15 = vcmp.eq.f32.partialorder %v6896_v43, inf  ;;  %vm3620_vm13 = vcmp.eq.f32.partialorder %v6896_v43, 0.0  ;;  %v3621_v20 = vand.u32 2147483648, %v6896_v43 }
 0xc5e   : > { %5305 = vrsqrt.f32 %v6899_v62  ;;  %vm3611_vm11 = vcmp.eq.f32.partialorder %v6899_v62, inf  ;;  %vm3613_vm10 = vcmp.eq.f32.partialorder %v6899_v62, 0.0  ;;  %v3614_v12 = vand.u32 2147483648, %v6899_v62 }
 0xc5f   : > { %vm3586_vm3 = vcmp.le.f32.partialorder %v6663_v59, %v6896_v43 }
 0xc60   : > { %v6904_v25 = vpop.xlane.xlu1 %3571  ;;  %v6910_v4 = vpop.xlane.xlu0 %3568  ;;  %v4404_v59 = vsel %vm3586_vm3, 1.0, %v7358_v63 }
 0xc61   : > { %5307 = vrsqrt.f32 %v6904_v25  ;;  %vm3632_vm8 = vcmp.eq.f32.partialorder %v6904_v25, inf  ;;  %vm3634_vm2 = vcmp.eq.f32.partialorder %v6904_v25, 0.0  ;;  %v3635_v15 = vand.u32 2147483648, %v6904_v25 }
 0xc62   : > { %5309 = vrsqrt.f32 %v6910_v4 }
 0xc64   : > { %v6921_v17 = vpop.xlane.xlu1 %3577  ;;  %v6926_v13 = vpop.xlane.xlu0 %3574 }
 0xc65   : > { %7420 = vst [vmem:[#allocation38_spill] sm:$0xff] %v6921_v17  ;;  %5311 = vrsqrt.f32 %v6921_v17  ;;  %v3649_v8 = vand.u32 2147483648, %v6921_v17 }
 0xc66   : > { %5313 = vrsqrt.f32 %v6926_v13 }
 0xc67   : > { %v5304_v34 = vpop.eup %5303 }
 0xc68   : > { %v5306_v54 = vpop.eup %5305  ;;  %v3617_v51 = vmul.f32 %v5304_v34, %v6896_v43 }
 0xc69   : > { %v3610_v46 = vmul.f32 %v5306_v54, %v6899_v62 }
 0xc6a   : > { %v3619_v29 = vsel %vm3618_vm15, %v6896_v43, %v3617_v51  ;;  %vm3625_vm15 = vcmp.eq.f32.partialorder %v6910_v4, inf }
 0xc6b   : > { %v6943_v39 = vpop.xlane.xlu1 %3583  ;;  %v5308_v52 = vpop.eup %5307  ;;  %v3622_v34 = vsel %vm3620_vm13, %v3621_v20, %v3619_v29  ;;  %v3612_v10 = vsel %vm3611_vm11, %v6899_v62, %v3610_v46  ;;  %vm3627_vm13 = vcmp.eq.f32.partialorder %v6910_v4, 0.0  ;;  %v3628_v46 = vand.u32 2147483648, %v6910_v4 }
 0xc6c   : > { %5315 = vrsqrt.f32 %v6943_v39  ;;  %v5310_v22 = vpop.eup %5309  ;;  %v3666_v32 = vadd.f32 1e-08, %v3622_v34  ;;  %v3615_v54 = vsel %vm3613_vm10, %v3614_v12, %v3612_v10  ;;  %v3631_v51 = vmul.f32 %v5308_v52, %v6904_v25 }
 0xc6d   : > { %v3665_v18 = vadd.f32 1e-08, %v3615_v54  ;;  %v3624_v2 = vmul.f32 %v5310_v22, %v6910_v4  ;;  %vm3646_vm11 = vcmp.eq.f32.partialorder %v6921_v17, inf  ;;  %vm3648_vm10 = vcmp.eq.f32.partialorder %v6921_v17, 0.0 }
 0xc6e   : > { %5317 = vrcp.f32 %v3666_v32  ;;  %v3633_v20 = vsel %vm3632_vm8, %v6904_v25, %v3631_v51  ;;  %vm3639_vm8 = vcmp.eq.f32.partialorder %v6926_v13, inf }
 0xc6f   : > { %v6956_v29 = vpop.xlane.xlu0 %3580  ;;  %v5312_v12 = vpop.eup %5311  ;;  %5319 = vrcp.f32 %v3665_v18  ;;  %v3636_v52 = vsel %vm3634_vm2, %v3635_v15, %v3633_v20  ;;  %v3626_v34 = vsel %vm3625_vm15, %v6910_v4, %v3624_v2  ;;  %v3642_v18 = vand.u32 2147483648, %v6926_v13 }
 0xc70   : > { %v5314_v10 = vpop.eup %5313  ;;  %v3668_v22 = vadd.f32 1e-08, %v3636_v52  ;;  %v3629_v54 = vsel %vm3627_vm13, %v3628_v46, %v3626_v34  ;;  %v3645_v32 = vmul.f32 %v5312_v12, %v6921_v17  ;;  %5321 = vrsqrt.f32 %v6956_v29 }
 0xc71   : > { %v3667_v51 = vadd.f32 1e-08, %v3629_v54  ;;  %v3638_v7 = vmul.f32 %v5314_v10, %v6926_v13  ;;  %vm3641_vm2 = vcmp.eq.f32.partialorder %v6926_v13, 0.0  ;;  %v3535_v46 = vadd.f32 1e-08, %v3521_v14 }
 0xc72   : > { %5323 = vrcp.f32 %v3668_v22  ;;  %v3647_v15 = vsel %vm3646_vm11, %v6921_v17, %v3645_v32  ;;  %v3400_v54 = vadd.f32 1e-08, %v3392_v49  ;;  %v3399_v22 = vadd.f32 1e-08, %v3385_v23 }
 0xc73   : > { %5325 = vrcp.f32 %v3667_v51  ;;  %v3650_v2 = vsel %vm3648_vm10, %v3649_v8, %v3647_v15  ;;  %v3640_v20 = vsel %vm3639_vm8, %v6926_v13, %v3638_v7  ;;  %vm3660_vm15 = vcmp.eq.f32.partialorder %v6943_v39, inf }
 0xc74   : > { %v3670_v12 = vadd.f32 1e-08, %v3650_v2  ;;  %v3643_v52 = vsel %vm3641_vm2, %v3642_v18, %v3640_v20  ;;  %5327 = vrcp.f32 %v3536_v33  ;;  %v3663_v8 = vand.u32 2147483648, %v6943_v39 }
 0xc75   : > { %v3669_v10 = vadd.f32 1e-08, %v3643_v52  ;;  %vm3662_vm13 = vcmp.eq.f32.partialorder %v6943_v39, 0.0  ;;  %vm3653_vm11 = vcmp.eq.f32.partialorder %v6956_v29, inf  ;;  %vm3655_vm10 = vcmp.eq.f32.partialorder %v6956_v29, 0.0 }
 0xc76   : > { %v5316_v34 = vpop.eup %5315  ;;  %5329 = vrcp.f32 %v3670_v12  ;;  %vm3587_vm8 = vcmp.le.f32.partialorder %v6702_v55, %v6910_v4  ;;  %vm7425_vm2 = vcmp.le.f32.partialorder %v6578_v41, %v6696_v9 }
 0xc77   : > { %v3659_v32 = vmul.f32 %v5316_v34, %v6943_v39  ;;  %v2784_v17 = vpop.permute.xlu0 %2783  ;;  %5331 = vrcp.f32 %v3669_v10  ;;  %v4388_v10 = vsel %vm3314_vm4, 1.0, %v7358_v63  ;;  %vm7421_vm4 = vcmp.le.f32.partialorder %v6534_v37, %v6643_v48 }
 0xc78   : > { %v2880_v7 = vadd.f32 %v6479_v5, %v2784_v17  ;;  %v6974_v51 = vpop.eup %5317  ;;  %5333 = vrcp.f32 %v3535_v46  ;;  %v4396_v28 = vsel %vm7421_vm4, 1.0, %v7358_v63  ;;  %v4398_v37 = vsel %vm7423_vm6, 1.0, %v7358_v63  ;;  %vm7110_vm4 = vmpackc.low %vm2655_vm14, %vm2655_vm14 }
 0xc79   : > { %v3661_v14 = vsel %vm3660_vm15, %v6943_v39, %v3659_v32  ;;  %v6978_v49 = vpop.eup %5319  ;;  %5335 = vrcp.f32 %v3400_v54  ;;  %v3698_v23 = vadd.f32 %v6974_v51, %v6824_v26  ;;  %v3656_v26 = vand.u32 2147483648, %v6956_v29 }
 0xc7a   : > { %v3664_v33 = vsel %vm3662_vm13, %v3663_v8, %v3661_v14  ;;  %v2898_v15 = vmax.f32 %v2880_v7, 0.0  ;;  %v5322_v18 = vpop.eup %5321  ;;  %5337 = vrcp.f32 %v3399_v22  ;;  %v3697_v5 = vadd.f32 %v6978_v49, %v6828_v45  ;;  %v7430_v7 = vld [vmem:[#allocation22_spill] sm:$0xff]  ;;  %v7432_v14 = vld [vmem:[#allocation21_spill] sm:$0xff] }
 0xc7b   : > { %v3672_v17 = vadd.f32 1e-08, %v3664_v33  ;;  %5339 = vrcp.f32 %v3698_v23  ;;  %v3652_v2 = vmul.f32 %v5322_v18, %v6956_v29  ;;  %v7070_v36 = vsel %vm7425_vm2, 1.0, %v7358_v63 }
 0xc7c   : > { %4890 = vmatprep.mubr.msk.f32.mxu0 %vm2655_vm14, %v2898_v15  ;;  %v6986_v20 = vpop.eup %5323  ;;  %5341 = vrcp.f32 %v3697_v5  ;;  %vm7426_vm15 = vcmp.le.f32.partialorder %v6586_v19, %v6704_v38  ;;  %vm3588_vm13 = vcmp.le.f32.partialorder %v6694_v50, %v6904_v25  ;;  %v4405_v50 = vsel %vm3587_vm8, 1.0, %v7358_v63  ;;  %v7428_v38 = vld [vmem:[#allocation24_spill] sm:$0xff] }
 0xc7d   : > { %v6990_v46 = vpop.eup %5325  ;;  %v3700_v12 = vadd.f32 %v6986_v20, %v6836_v35  ;;  %5343 = vrcp.f32 %v3672_v17  ;;  %v3654_v45 = vsel %vm3653_vm11, %v6956_v29, %v3652_v2  ;;  %v4387_v35 = vsel %vm3313_vm1, 1.0, %v7358_v63  ;;  %v7433_v2 = vld [vmem:[#allocation25_spill] sm:$0xff] }
 0xc7e   : > { %v3699_v52 = vadd.f32 %v6990_v46, %v6842_v11  ;;  %v3657_v34 = vsel %vm3655_vm10, %v3656_v26, %v3654_v45  ;;  %v6998_v54 = vpop.eup %5327  ;;  %v4390_v11 = vsel %vm3316_vm9, 1.0, %v7358_v63  ;;  %vm7422_vm1 = vcmp.le.f32.partialorder %v6540_v40, %v6645_v27 }
 0xc7f   : > { %5345 = vrcp.f32 %v3700_v12  ;;  %v3671_v22 = vadd.f32 1e-08, %v3657_v34  ;;  %v4395_v61 = vsel %vm7422_vm1, 1.0, %v7358_v63  ;;  %vm3585_vm9 = vcmp.le.f32.partialorder %v6671_v60, %v6899_v62  ;;  %v7427_v60 = vld [vmem:[#allocation30_spill] sm:$0xff]  ;;  %v7434_v12 = vld [vmem:[#allocation32_spill] sm:$0xff] }
 0xc80   : > { %v7008_v32 = vpop.eup %5329  ;;  %5347 = vrcp.f32 %v3699_v52  ;;  %v4397_v40 = vsel %vm7424_vm12, 1.0, %v7358_v63  ;;  %v7076_v0 = vsel %vm7426_vm15, 1.0, %v7358_v63  ;;  %v4403_v41 = vsel %vm3585_vm9, 1.0, %v7358_v63 }
 0xc81   : > { %v7026_v30 = vpop.eup %5331  ;;  %v3702_v56 = vadd.f32 %v7008_v32, %v6855_v57  ;;  %5349 = vrcp.f32 %v3671_v22  ;;  %v7429_v57 = vld [vmem:[#allocation31_spill] sm:$0xff]  ;;  %v4406_v62 = vsel %vm3588_vm13, 1.0, %v7358_v63  ;;  %vm3589_vm11 = vcmp.le.f32.partialorder %v7430_v7, %v6926_v13  ;;  %v7443_v13 = vld [vmem:[#allocation16_spill] sm:$0xff]  ;;  %v7444_v7 = vld [vmem:[#allocation17_spill] sm:$0xff] }
 0xc82   : > { %v7040_v58 = vpop.eup %5333  ;;  %v3701_v16 = vadd.f32 %v7026_v30, %v6859_v6  ;;  %vm7445_vm1 = vcmp.le.f32.partialorder %v7443_v13, %v7444_v7 }
 0xc83   : > { %v7052_v31 = vpop.eup %5335  ;;  %5351 = vrcp.f32 %v3702_v56 }
 0xc84   : > { %v7064_v21 = vpop.eup %5337  ;;  %5353 = vrcp.f32 %v3701_v16  ;;  %v3696_v48 = vadd.f32 %v7052_v31, %v6998_v54 }
 0xc85   : > { %v5340_v3 = vpop.eup %5339  ;;  %v3695_v27 = vadd.f32 %v7064_v21, %v7040_v58 }
 0xc86   : > { %v5342_v24 = vpop.eup %5341  ;;  %v3722_v19 = vmul.f32 %v5340_v3, %v6712_v53  ;;  %v3738_v42 = vmul.f32 %v5340_v3, %v7427_v60  ;;  %v3762_v9 = vmul.f32 %v5340_v3, %v6974_v51  ;;  %v7431_v51 = vld [vmem:[#allocation38_spill] sm:$0xff] }
 0xc87   : > { %v7090_v55 = vpop.eup %5343  ;;  %v3721_v4 = vmul.f32 %v5342_v24, %v7428_v38  ;;  %v3737_v6 = vmul.f32 %v5342_v24, %v7429_v57  ;;  %v3761_v43 = vmul.f32 %v5342_v24, %v6978_v49  ;;  %vm3590_vm10 = vcmp.le.f32.partialorder %v7432_v14, %v7431_v51  ;;  %v7439_v38 = vld [vmem:[#allocation34_spill] sm:$0xff] }
 0xc88   : > { %v3704_v25 = vadd.f32 %v7090_v55, %v3696_v48  ;;  %v3730_v8 = vmul.f32 %v4388_v10, %v3722_v19  ;;  %v3746_v53 = vmul.f32 %v4396_v28, %v3738_v42  ;;  %v3770_v5 = vmul.f32 %v4404_v59, %v3762_v9  ;;  %v7435_v10 = vld [vmem:[#allocation26_spill] sm:$0xff]  ;;  %v7436_v28 = vld [vmem:[#allocation33_spill] sm:$0xff]  ;;  %v3002_v9 = vld [vmem:[%s7270_s21] sm:$0xff] }
 0xc89   : > { %v5346_v23 = vpop.eup %5345  ;;  %v3729_v33 = vmul.f32 %v4387_v35, %v3721_v4  ;;  %v3745_v15 = vmul.f32 %v4395_v61, %v3737_v6  ;;  %v3769_v18 = vmul.f32 %v4403_v41, %v3761_v43  ;;  %v7440_v6 = vld [vmem:[#allocation35_spill] sm:$0xff]  ;;  %4904 = vmatprep.mubr.msk.f32.mxu1 %vm2655_vm14, %v3002_v9 }
 0xc8a   : > { %v5348_v17 = vpop.eup %5347  ;;  %5355 = vrcp.f32 %v3704_v25  ;;  %v3754_v49 = vadd.f32 %v3746_v53, %v3730_v8  ;;  %v3724_v26 = vmul.f32 %v5346_v23, %v7433_v2  ;;  %v3740_v45 = vmul.f32 %v5346_v23, %v7434_v12  ;;  %v7442_v25 = vld [vmem:[#allocation36_spill] sm:$0xff] }
 0xc8b   : > { %v5350_v52 = vpop.eup %5349  ;;  %v3753_v34 = vadd.f32 %v3745_v15, %v3729_v33  ;;  %v3723_v22 = vmul.f32 %v5348_v17, %v7435_v10  ;;  %v3739_v56 = vmul.f32 %v5348_v17, %v7436_v28  ;;  %v3763_v16 = vmul.f32 %v5348_v17, %v6990_v46  ;;  %v7448_v10 = vld [vmem:[#allocation28_spill] sm:$0xff] }
 0xc8c   : > { %v3703_v3 = vadd.f32 %v5350_v52, %v3695_v27  ;;  %v3778_v35 = vadd.f32 %v3770_v5, %v3754_v49  ;;  %v3732_v61 = vmul.f32 %v4390_v11, %v3724_v26  ;;  %v3748_v48 = vmul.f32 %v4398_v37, %v3740_v45 }
 0xc8d   : > { %v5352_v41 = vpop.eup %5351  ;;  %v3777_v59 = vadd.f32 %v3769_v18, %v3753_v34  ;;  %v3731_v24 = vmul.f32 %v7018_v1, %v3723_v22  ;;  %v3747_v19 = vmul.f32 %v4397_v40, %v3739_v56  ;;  %v3764_v60 = vmul.f32 %v5346_v23, %v6986_v20  ;;  %v7441_v20 = vld [vmem:[#allocation37_spill] sm:$0xff] }
 0xc8e   : > { %v5354_v42 = vpop.eup %5353  ;;  %5357 = vrcp.f32 %v3703_v3  ;;  %v3756_v46 = vadd.f32 %v3748_v48, %v3732_v61  ;;  %v3771_v27 = vmul.f32 %v4405_v50, %v3763_v16  ;;  %v3726_v11 = vmul.f32 %v5352_v41, %v7439_v38  ;;  %v7449_v16 = vld [vmem:[#allocation29_spill] sm:$0xff] }
 0xc8f   : > { %v5062_v37 = vpack.c.bf16 %v3778_v35, %v3777_v59  ;;  %v3755_v4 = vadd.f32 %v3747_v19, %v3731_v24  ;;  %v3772_v57 = vmul.f32 %v4406_v62, %v3764_v60  ;;  %v3725_v1 = vmul.f32 %v5354_v42, %v7440_v6  ;;  %v7451_v59 = vld [vmem:[#allocation18_spill] sm:$0xff] }
 0xc90   : > { %v3734_v40 = vmul.f32 %v7024_v47, %v3726_v11  ;;  %v3741_v43 = vmul.f32 %v5354_v42, %v7441_v20  ;;  %v3742_v8 = vmul.f32 %v5352_v41, %v7442_v25  ;;  %v3765_v53 = vmul.f32 %v5354_v42, %v7026_v30 }
 0xc91   : > { %5064 = vmatprep.subr.msk.bf16.mxu0 %vm7110_vm4, %v5062_v37  ;;  %v3779_v23 = vadd.f32 %v3771_v27, %v3755_v4  ;;  %v3780_v50 = vadd.f32 %v3772_v57, %v3756_v46  ;;  %v3733_v33 = vmul.f32 %v7032_v44, %v3725_v1  ;;  %v3766_v15 = vmul.f32 %v5352_v41, %v7008_v32  ;;  %v7450_v41 = vld [vmem:[#allocation12_spill] sm:$0xff]  ;;  %v7455_v57 = vld [vmem:[#allocation13_spill] sm:$0xff]  ;;  %v7456_v1 = vld [vmem:[#allocation15_spill] sm:$0xff] }
 0xc92   : > { %5067 = vmatpush3.bf16.xpose.msk.msra.mxu0 %vm7110_vm4, %v5062_v37  ;;  %v3749_v47 = vmul.f32 %v7076_v0, %v3741_v43  ;;  %v3750_v62 = vmul.f32 %v7070_v36, %v3742_v8  ;;  %v4407_v30 = vsel %vm3589_vm11, 1.0, %v7358_v63  ;;  %v4408_v44 = vsel %vm3590_vm10, 1.0, %v7358_v63  ;;  %v2789_v37 = vpop.permute.xlu1 %2788  ;;  %v7457_v43 = vld [vmem:[#allocation14_spill] sm:$0xff] }
 0xc93   : > { %v5068_v18 = vpack.c.bf16 %v3780_v50, %v3779_v23  ;;  %v3773_v49 = vmul.f32 %v4407_v30, %v3765_v53  ;;  %v3774_v2 = vmul.f32 %v4408_v44, %v3766_v15  ;;  %v4394_v26 = vsel %vm7445_vm1, 1.0, %v7358_v63  ;;  %v3006_v30 = vld [vmem:[%s7272_s23] sm:$0xff] }
 0xc94   : > { %v5356_v5 = vpop.eup %5355  ;;  %v3757_v32 = vadd.f32 %v3749_v47, %v3733_v33  ;;  %v3758_v17 = vadd.f32 %v3750_v62, %v3734_v40  ;;  %v4402_v12 = vsel %vm3456_vm0, 1.0, %v7358_v63  ;;  %vm3592_vm9 = vcmp.le.f32.partialorder %v7448_v10, %v6943_v39  ;;  %v2799_v40 = vpop.permute.xlu0 %2798 }
 0xc95   : > { %5070 = vmatprep.subr.msk.bf16.mxu0 %vm7110_vm4, %v5068_v18  ;;  %v3728_v36 = vmul.f32 %v5356_v5, %v7052_v31  ;;  %v3744_v0 = vmul.f32 %v5356_v5, %v6998_v54  ;;  %v3768_v31 = vmul.f32 %v5356_v5, %v7090_v55  ;;  %vm3591_vm3 = vcmp.le.f32.partialorder %v7449_v16, %v6956_v29 }
 0xc96   : > { %v3781_v45 = vadd.f32 %v3773_v49, %v3757_v32  ;;  %v3782_v34 = vadd.f32 %v3774_v2, %v3758_v17  ;;  %vm7452_vm0 = vcmp.le.f32.partialorder %v7450_v41, %v7451_v59  ;;  %v4401_v55 = vsel %vm3455_vm7, 1.0, %v7358_v63  ;;  %v2794_v4 = vpop.permute.xlu1 %2793 }
 0xc97   : > { %v3736_v22 = vmul.f32 %v4394_v26, %v3728_v36  ;;  %v3752_v28 = vmul.f32 %v4402_v12, %v3744_v0  ;;  %v4393_v39 = vsel %vm7452_vm0, 1.0, %v7358_v63  ;;  %v4410_v29 = vsel %vm3592_vm9, 1.0, %v7358_v63  ;;  %v3007_v12 = vld [vmem:[%s7272_s23 + $0x8] sm:$0xff] }
 0xc98   : > { %v5358_v54 = vpop.eup %5357  ;;  %v5074_v56 = vpack.c.bf16 %v3782_v34, %v3781_v45  ;;  %v4409_v60 = vsel %vm3591_vm3, 1.0, %v7358_v63  ;;  %v2885_v6 = vadd.f32 %v7455_v57, %v2789_v37  ;;  %v2890_v63 = vadd.f32 %v7456_v1, %v2794_v4 }
 0xc99   : > { %v3727_v3 = vmul.f32 %v5358_v54, %v7064_v21  ;;  %v3743_v35 = vmul.f32 %v5358_v54, %v7040_v58  ;;  %v3760_v61 = vadd.f32 %v3752_v28, %v3736_v22  ;;  %v3767_v48 = vmul.f32 %v5358_v54, %v5350_v52 }
 0xc9a   : > { %5073 = vmatpush3.bf16.xpose.msk.msra.mxu0 %vm7110_vm4, %v5068_v18  ;;  %v3776_v52 = vmul.f32 %v4410_v29, %v3768_v31  ;;  %v2899_v20 = vmax.f32 %v2885_v6, 0.0  ;;  %v2895_v25 = vadd.f32 %v7457_v43, %v2799_v40  ;;  %v2900_v8 = vmax.f32 %v2890_v63, 0.0  ;;  %v3003_v18 = vld [vmem:[%s7270_s21 + $0x8] sm:$0xff] }
 0xc9b   : > { %5076 = vmatprep.subr.msk.bf16.mxu0 %vm7110_vm4, %v5074_v56  ;;  %v3735_v58 = vmul.f32 %v4393_v39, %v3727_v3  ;;  %v3751_v21 = vmul.f32 %v4401_v55, %v3743_v35  ;;  %v3775_v46 = vmul.f32 %v4409_v60, %v3767_v48 }
 0xc9c   : > { %v3784_v27 = vadd.f32 %v3776_v52, %v3760_v61  ;;  %v2901_v53 = vmax.f32 %v2895_v25, 0.0 }
 0xc9d   : > { %v3759_v42 = vadd.f32 %v3751_v21, %v3735_v58 }
 0xc9f   : > { %v3783_v38 = vadd.f32 %v3775_v46, %v3759_v42 }
 0xca1   : > { %v5080_v11 = vpack.c.bf16 %v3784_v27, %v3783_v38 }
 0xca2   : > { %5079 = vmatpush3.bf16.xpose.msk.msra.mxu0 %vm7110_vm4, %v5074_v56 }
 0xca3   : > { %5082 = vmatprep.subr.msk.bf16.mxu0 %vm7110_vm4, %v5080_v11 }
 0xca4   : > { %v2915_v44 = vpop.xlane.xlu1 %2914 }
 0xca8   : > { %v2918_v5 = vpop.xlane.xlu0 %2917  ;;  %v3997_v2 = vpop.permute.xlu1 %3996 }
 0xcaa   : > { %5085 = vmatpush3.bf16.xpose.msk.msra.mxu0 %vm7110_vm4, %v5080_v11 }
 0xcac   : > { %v4006_v10 = vpop.permute.xlu1 %4005 }
 0xcb0   : > { %v3992_v0 = vpop.permute.xlu0 %3991 }
 0xcb1   : > { %4891 = vmatmul.mubr.msk.f32.vlgmr.msra.gmra.mrb[30].mxu0 %vm2655_vm14, %v2899_v20 }
 0xcb2   : > { %4893 = vmatprep.mubr.msk.f32.mxu0 %vm2655_vm14, %v2900_v8 }
 0xcb4   : > { %v4011_v45 = vpop.permute.xlu0 %4010 }
 0xcb5   : > { %4894 = vmatmul.mubr.msk.f32.gmra.mrb[32].mxu0 %vm2655_vm14, %v2901_v53 }
 0xd84   : > { %v4892_v23 = vpop.f32.mrb[30].mxu0 }
 0xd85   : > { %v3887_v50 = vpop.f32.mrb[31].mxu0 }
 0xd86   : > { %v5086_v33 = vpack.c.bf16 %v4892_v23, %v3887_v50 }
 0xd88   : > { %v4895_v15 = vpop.f32.mrb[32].mxu0  ;;  %5087 = vmatprep.subr.bf16.mxu1 %v5086_v33 }
 0xd89   : > { %v3897_v47 = vpop.f32.mrb[33].mxu0  ;;  %5089 = vmatpush3.bf16.msra.mxu1 %v5086_v33 }
 0xd8a   : > { %v5090_v62 = vpack.c.bf16 %v4895_v15, %v3897_v47 }
 0xd8c   : > { %5091 = vmatprep.subr.bf16.mxu1 %v5090_v62 }
 0xd8d   : > { %5093 = vmatpush3.bf16.msra.mxu1 %v5090_v62 }
 0xd90   : > { %4905 = vmatmul.mubr.msk.f32.vlgmr.msra.gmra.mrb[36].mxu1 %vm2655_vm14, %v3003_v18 }
 0xd91   : > { %4911 = vmatprep.mubr.msk.f32.mxu1 %vm2168_vm5, %v3006_v30 }
 0xe63   : > { %v4906_v32 = vpop.f32.mrb[36].mxu1 }
 0xe64   : > { %v5098_v17 = vadd.f32 %v4906_v32, %v2918_v5  ;;  %v3978_v49 = vpop.f32.mrb[37].mxu1 }
 0xe65   : > { %v5099_v36 = vadd.f32 %v3978_v49, %v2915_v44 }
 0xe66   : > { %v4000_v13 = vadd.f32 %v5098_v17, %v3997_v2 }
 0xe67   : > { %v3999_v7 = vadd.f32 %v5099_v36, %v3992_v0 }
 0xe68   : > { %v4002_v26 = vmax.f32 %v4000_v13, 0.0 }
 0xe69   : > { %v4001_v51 = vmax.f32 %v3999_v7, 0.0 }
 0xe6b   : > { %v5094_v14 = vpack.c.bf16 %v4002_v26, %v4001_v51 }
 0xe6d   : > { %5095 = vmatprep.subr.bf16.mxu1 %v5094_v14 }
 0xe6e   : > { %5097 = vmatpush3.bf16.msra.mxu1 %v5094_v14 }
 0xe71   : > { %4912 = vmatmul.mubr.msk.f32.vlgmr.msra.gmra.mrb[40].mxu1 %vm2168_vm5, %v3007_v12  ;;  %vm7458_vm5 = vcmask 523264  }
 0xe72   : > { %vm7459_vm14 = vmmov %vm7458_vm5 }
 0xf44   : > { %v4913_v34 = vpop.f32.mrb[40].mxu1 }
 0xf45   : > { %v4091_v22 = vadd.f32 %v4913_v34, %v4011_v45  ;;  %v4085_v28 = vpop.f32.mrb[41].mxu1 }
 0xf46   : > { %v4086_v31 = vadd.f32 %v4085_v28, %v4006_v10 }
 0xf47   : > { %v4095_v54 = vmax.f32 %v4091_v22, 0.0 }
 0xf48   : > { %v4094_v56 = vmax.f32 %v4086_v31, 0.0 }
 0xf49   : > { %4097 = vst.msk [vmem:[%s840_s4 + $0x8] sm:$0xff] %vm7458_vm5, %v4095_v54 }
 0xf4a   : > { %4096 = vst.msk [vmem:[%s840_s4] sm:$0xff] %vm7459_vm14, %v4094_v56 }
 0xf4b   : > { %5384 = shalt.err (!%p5381_p8)
}
 0xf4c   : > { %s5385_s28 = scalar_lea.hbm %s7204_s6, 256  ;;  %s5389_s29 = scalar_lea.hbm %s7274_s25, 512 }
 0xf4d   : > { %p5386_p9 = scmp.ne.s32.totalorder %s7204_s6, %s5385_s28  ;;  %p5390_p0 = scmp.lt.u32.totalorder %s7204_s6, %s7274_s25 }
 0xf4e   : > { %p5391_p1 = scmp.lt.u32.totalorder %s5389_s29, %s5385_s28  ;;  %p5393_p3 = scmp.lt.u32.totalorder %s5385_s28, %s7204_s6 }
 0xf4f   : > { %p5387_p12 = pnand %p5386_p9, %p5617_p10 }
 0xf50   : > { %p5392_p2 = por %p5391_p1, %p5390_p0 }
 0xf51   : > { %p5388_p13 = pneg %p5387_p12 }
 0xf52   : > { %p5394_p4 = por %p5393_p3, %p5392_p2 }
 0xf54   : > { %p5395_p5 = pnand %p5394_p4, %p5388_p13 }
 0xf56   : > { %5398 = shalt.err (!%p5395_p5)
}
 0xf57   : > { %s5444_s30 = smov 128   ;;  %s5445_s27 = smov 8  }
 0xf58   : > { %5114 = dma.vmem_to_hbm [thread:$0]  (%p5617_p10), %s7199_s5, 256, %s7204_s6, %s7208_s19, %s5444_s30, %s5444_s30, %s5445_s27  }
 0xf59 PF: > { %p5120_p6 = scmp.ge.s32.totalorder %s5435_s8, 2  ;;  %s4127_s9 = sand.u32 1, %s5423_s3  }
 0xf5a   : > { %s4128_s28 = scalar_lea.sflag [#allocation5], %s4127_s9 }
 0xf5b   : > { %p5117_p7 = pnand %p5120_p6, %p5621_p11 }
 0xf5d   : > { %5418 = dma.done.wait (!%p5117_p7), %s4128_s28, 256  }
 0xf5e   : > { %5420 = vsyncadd (!%p5117_p7), %s4128_s28, 4294967040  ;;  %s7461_s8 = sld [smem:[#allocation9_spill]]  ;;  %s7462_s29 = sld [smem:[#allocation8_spill]] }
 0xf5f   : > { %s7463_s1 = sld [smem:[#allocation10_spill]]  ;;  %s7464_s3 = smov %s5427_s26 }
 0xf64   : > { %p41_p8 = scmp.ge.s32.totalorder %s7461_s8, 4   ;;  %s7465_s26 = smov %s7462_s29 }
 0xf66   :  { %43 = sbr.rel (!%p41_p8) target bundleno = 30 (0x1e), region = 172 }
 0xf6d   :  { %4133 = vsyncpa [#allocation5], 1 }
 0xf6e   :  { %4135 = vsyncpa [#allocation5 + $0x1], 1 }

</bundles_post_ra>
